<compile_context>
chip_gen: v6e
topology: v6e:2x2x1
jax: 0.10.0
libtpu: 0.0.40
codegen_flags: <defaults>
</compile_context>

<pallas_src>
import functools

import jax
import jax.numpy as jnp
import numpy as np
from jax.experimental import pallas as pl
from jax.experimental.pallas import tpu as pltpu

K = 7                 # spatial-filter conv kernel size
PAD = (K - 1) // 2    # = 3
BN_EPS = 1e-5


def _cbam_stage1_kernel(x_ref, w1_ref, b1_ref, w2_ref, b2_ref, masks_ref,
                        cw_ref, ca_ref, conv_ref, *, H, W):
    """Per-image channel attention + 7x7 spatial conv (pre-BatchNorm).

    Blocks (grid over batch index n):
      x_ref     (1, C, H*W)  lane-dense image
      w1_ref    (Ch, C), b1_ref (Ch, 1), w2_ref (C, Ch), b2_ref (C, 1)
      masks_ref (K*K, H*W)   per-tap zero-padding validity masks (0/1 f32)
      cw_ref    (2*K*K,)     SMEM conv weights [max-channel taps | mean-channel taps]
      ca_ref    (1, C, 1)    channel attention (post-sigmoid)
      conv_ref  (1, 1, H*W)  spatial conv output (pre-BatchNorm)
    """
    C = x_ref.shape[1]
    HW = H * W
    x = x_ref[0]                                                 # (C, HW) f32

    # ---------------- channel attention ----------------
    avg_p = jnp.sum(x, axis=-1, keepdims=True) * (1.0 / float(HW))   # (C, 1)
    max_p = jnp.max(x, axis=-1, keepdims=True)                        # (C, 1)
    pooled = jnp.concatenate([avg_p, max_p], axis=1)                  # (C, 2)

    # shared MLP applied to both pooled columns with a single pair of dots
    h = jnp.dot(w1_ref[...], pooled, preferred_element_type=jnp.float32)
    h = jnp.maximum(h + b1_ref[...], 0.0)                             # (Ch, 2)
    o = jnp.dot(w2_ref[...], h, preferred_element_type=jnp.float32)
    o = o + b2_ref[...]                                               # (C, 2)
    ca = jax.nn.sigmoid(jnp.sum(o, axis=1, keepdims=True))            # (C, 1)

    y = x * ca                                                        # (C, HW)

    # ------------- spatial attention: 7x7 conv via rolls -------------
    max_c = jnp.max(y, axis=0, keepdims=True)                         # (1, HW)
    mean_c = jnp.sum(y, axis=0, keepdims=True) * (1.0 / float(C))     # (1, HW)
    # Concatenate on a 128-aligned lane boundary so one roll shifts both maps
    # and the post-roll split is a free vreg selection (no relayout).
    feat = jnp.concatenate([max_c, mean_c], axis=1)                   # (1, 2*HW)
    L = 2 * HW

    conv = jnp.zeros((1, HW), jnp.float32)
    for ki in range(K):
        for kj in range(K):
            t = ki * K + kj
            s = (ki - PAD) * W + (kj - PAD)        # flat source offset of this tap
            sh = (-s) % L                          # rolled[p] = feat[(p + s) mod L]
            rolled = feat if sh == 0 else pltpu.roll(feat, shift=sh, axis=1)
            sh_max = rolled[:, 0:HW]               # 128-aligned slices: no relayout
            sh_mean = rolled[:, HW:2 * HW]
            m = masks_ref[pl.ds(t, 1), :]          # (1, HW) zero-padding mask
            conv = conv + (cw_ref[t] * sh_max + cw_ref[K * K + t] * sh_mean) * m

    ca_ref[0] = ca
    conv_ref[0] = conv


def _cbam_stage2_kernel(bn_ref, x_ref, ca_ref, conv_ref, out_ref):
    """out = (x * ca) * sigmoid(relu(conv * scale + shift)); fully lane-dense."""
    scale = bn_ref[0]
    shift = bn_ref[1]
    sa = jax.nn.sigmoid(jnp.maximum(conv_ref[0] * scale + shift, 0.0))   # (1, HW)
    out_ref[0] = (x_ref[0] * ca_ref[0] * sa).astype(out_ref.dtype)


def _tap_masks(H, W):
    """Validity mask (1 = in-bounds source) for every 7x7 tap, flattened over HW."""
    HW = H * W
    pos = np.arange(HW)
    hh, ww = pos // W, pos % W
    masks = np.zeros((K * K, HW), np.float32)
    for ki in range(K):
        for kj in range(K):
            di, dj = ki - PAD, kj - PAD
            valid = ((hh + di >= 0) & (hh + di < H)
                     & (ww + dj >= 0) & (ww + dj < W))
            masks[ki * K + kj] = valid.astype(np.float32)
    return masks


@jax.jit
def cbam_pallas(x, w1, b1, w2, b2, conv_w, gamma, beta):
    """x: (N, C, H, W) f32. Params use PyTorch conventions:
       w1 (Ch, C), b1 (Ch,), w2 (C, Ch), b2 (C,), conv_w (2, K, K),
       gamma/beta: BatchNorm2d(1) affine scalars."""
    N, C, H, W = x.shape
    HW = H * W
    Ch = w1.shape[0]

    # lane-dense layout: last dim = H*W (multiple of 128 for the shapes used here)
    x3 = x.reshape(N, C, HW).astype(jnp.float32)
    w1f = jnp.asarray(w1, jnp.float32)                      # (Ch, C)
    b1f = jnp.asarray(b1, jnp.float32).reshape(Ch, 1)       # (Ch, 1)
    w2f = jnp.asarray(w2, jnp.float32)                      # (C, Ch)
    b2f = jnp.asarray(b2, jnp.float32).reshape(C, 1)        # (C, 1)
    cw_flat = jnp.asarray(conv_w, jnp.float32).reshape(-1)  # (2*K*K,)
    masks = jnp.asarray(_tap_masks(H, W))                   # (K*K, HW)

    cparams = pltpu.CompilerParams(
        dimension_semantics=("parallel",),
        vmem_limit_bytes=32 * 1024 * 1024)

    # ---- pass 1: per-image channel attention + spatial 7x7 conv ----
    ca, conv = pl.pallas_call(
        functools.partial(_cbam_stage1_kernel, H=H, W=W),
        grid=(N,),
        out_shape=(jax.ShapeDtypeStruct((N, C, 1), jnp.float32),
                   jax.ShapeDtypeStruct((N, 1, HW), jnp.float32)),
        in_specs=[
            pl.BlockSpec((1, C, HW), lambda n: (n, 0, 0)),        # x (per image)
            pl.BlockSpec((Ch, C), lambda n: (0, 0)),              # w1
            pl.BlockSpec((Ch, 1), lambda n: (0, 0)),              # b1
            pl.BlockSpec((C, Ch), lambda n: (0, 0)),              # w2
            pl.BlockSpec((C, 1), lambda n: (0, 0)),               # b2
            pl.BlockSpec((K * K, HW), lambda n: (0, 0)),          # tap masks
            pl.BlockSpec(memory_space=pltpu.MemorySpace.SMEM),    # conv weights
        ],
        out_specs=(
            pl.BlockSpec((1, C, 1), lambda n: (n, 0, 0)),
            pl.BlockSpec((1, 1, HW), lambda n: (n, 0, 0)),
        ),
        compiler_params=cparams,
    )(x3, w1f, b1f, w2f, b2f, masks, cw_flat)

    # ---- BatchNorm2d(1) training-mode batch stats over (N, H, W) ----
    # Tiny global reduction over the (N, HW) conv maps, done in plain XLA
    # between the two fully "parallel" Pallas passes.
    # TODO(synk): running_mean/running_var momentum updates are a training-time
    # buffer side effect that does not affect the returned tensor; not materialized.
    mu = jnp.mean(conv)
    var = jnp.mean(jnp.square(conv - mu))                    # biased variance
    scale = jnp.asarray(gamma, jnp.float32) * jax.lax.rsqrt(var + BN_EPS)
    shift = jnp.asarray(beta, jnp.float32) - mu * scale
    bn_ss = jnp.stack([scale, shift]).astype(jnp.float32)    # (2,)

    # ---- pass 2: BN + ReLU + sigmoid + elementwise scaling (lane-dense store) ----
    out3 = pl.pallas_call(
        _cbam_stage2_kernel,
        grid=(N,),
        out_shape=jax.ShapeDtypeStruct((N, C, HW), x.dtype),
        in_specs=[
            pl.BlockSpec(memory_space=pltpu.MemorySpace.SMEM),    # (scale, shift)
            pl.BlockSpec((1, C, HW), lambda n: (n, 0, 0)),        # x
            pl.BlockSpec((1, C, 1), lambda n: (n, 0, 0)),         # ca
            pl.BlockSpec((1, 1, HW), lambda n: (n, 0, 0)),        # conv
        ],
        out_specs=pl.BlockSpec((1, C, HW), lambda n: (n, 0, 0)),
        compiler_params=cparams,
    )(bn_ss, x3, ca, conv)

    return out3.reshape(N, C, H, W)


def cbam_ref(x, w1, b1, w2, b2, conv_w, gamma, beta):
    """Plain-JAX reference (same math, used only for verification)."""
    N, C, H, W = x.shape
    avg_pool = x.mean(axis=(2, 3))
    max_pool = x.max(axis=(2, 3))

    def mlp(p):
        h = jnp.maximum(jnp.sum(p[:, :, None] * w1.T[None], axis=1) + b1, 0.0)
        return jnp.sum(h[:, :, None] * w2.T[None], axis=1) + b2

    ca = jax.nn.sigmoid(mlp(avg_pool) + mlp(max_pool))
    y = x * ca[:, :, None, None]

    feat = jnp.stack([y.max(axis=1), y.mean(axis=1)], axis=1)      # (N, 2, H, W)
    fp = jnp.pad(feat, ((0, 0), (0, 0), (PAD, PAD), (PAD, PAD)))
    conv = jnp.zeros((N, H, W), jnp.float32)
    for ki in range(K):
        for kj in range(K):
            conv = conv + conv_w[0, ki, kj] * fp[:, 0, ki:ki + H, kj:kj + W] \
                        + conv_w[1, ki, kj] * fp[:, 1, ki:ki + H, kj:kj + W]
    mu = conv.mean()
    var = ((conv - mu) ** 2).mean()
    bn = (conv - mu) * jax.lax.rsqrt(var + BN_EPS) * gamma + beta
    sa = jax.nn.sigmoid(jnp.maximum(bn, 0.0))
    return y * sa[:, None, :, :]


if __name__ == "__main__":
    # Small deterministic example consistent with CBAM(in_channel=32, reduction_ratio=16)
    N, C, H, W = 2, 32, 16, 16
    reduction_ratio = 16
    hidden = C // reduction_ratio   # = 2

    key = jax.random.PRNGKey(0)
    kx, k1, k2, k3, k4, k5 = jax.random.split(key, 6)
    x = jax.random.normal(kx, (N, C, H, W), jnp.float32)

    # Deterministic synthetic parameters (PyTorch shapes).
    w1 = jax.random.normal(k1, (hidden, C), jnp.float32) * 0.1    # Linear(C, C//r).weight
    b1 = jax.random.normal(k2, (hidden,), jnp.float32) * 0.1      # Linear(C, C//r).bias
    w2 = jax.random.normal(k3, (C, hidden), jnp.float32) * 0.1    # Linear(C//r, C).weight
    b2 = jax.random.normal(k4, (C,), jnp.float32) * 0.1           # Linear(C//r, C).bias
    conv_w = jax.random.normal(k5, (2, K, K), jnp.float32) * 0.1  # Conv2d(2,1,7).weight[0]
    gamma, beta = 1.0, 0.0                                        # BatchNorm2d default affine

    out = cbam_pallas(x, w1, b1, w2, b2, conv_w, gamma, beta)
    out = jax.block_until_ready(out)

    ref = cbam_ref(x, w1, b1, w2, b2, conv_w, gamma, beta)
    assert out.shape == (N, C, H, W) and out.dtype == jnp.float32
    assert bool(jnp.allclose(out, ref, rtol=2e-4, atol=2e-4)), "mismatch vs JAX reference"

    print("KERNEL_OK")
</pallas_src>

<mosaic_0001>
module attributes {stable_mosaic.version = 11 : i64} {
  func.func @_cbam_stage1_kernel(%arg0: i32, %arg1: memref<1x32x256xf32, #tpu.memory_space<vmem>>, %arg2: memref<2x32xf32, #tpu.memory_space<vmem>>, %arg3: memref<2x1xf32, #tpu.memory_space<vmem>>, %arg4: memref<32x2xf32, #tpu.memory_space<vmem>>, %arg5: memref<32x1xf32, #tpu.memory_space<vmem>>, %arg6: memref<49x256xf32, #tpu.memory_space<vmem>>, %arg7: memref<98xf32, #tpu.memory_space<smem>>, %arg8: memref<1x32x1xf32, #tpu.memory_space<vmem>>, %arg9: memref<1x1x256xf32, #tpu.memory_space<vmem>>) attributes {dimension_semantics = [#tpu.dimension_semantics<parallel>], iteration_bounds = array<i64: 2>, scalar_prefetch = 0 : i64, scratch_operands = 0 : i64, tpu.core_type = #tpu.core_type<tc>, window_params = [{transform_indices = @transform_0, window_bounds = array<i64: 1, 32, 256>}, {pipeline_mode = #tpu.pipeline_mode<synchronous>, transform_indices = @transform_1, window_bounds = array<i64: 2, 32>}, {pipeline_mode = #tpu.pipeline_mode<synchronous>, transform_indices = @transform_2, window_bounds = array<i64: 2, 1>}, {pipeline_mode = #tpu.pipeline_mode<synchronous>, transform_indices = @transform_3, window_bounds = array<i64: 32, 2>}, {pipeline_mode = #tpu.pipeline_mode<synchronous>, transform_indices = @transform_4, window_bounds = array<i64: 32, 1>}, {pipeline_mode = #tpu.pipeline_mode<synchronous>, transform_indices = @transform_5, window_bounds = array<i64: 49, 256>}, {transform_indices = @transform_6, window_bounds = array<i64: 98>}, {transform_indices = @transform_7, window_bounds = array<i64: 1, 32, 1>}, {transform_indices = @transform_8, window_bounds = array<i64: 1, 1, 256>}]} {
    %c0 = arith.constant 0 : index
    %c0_0 = arith.constant 0 : index
    %c0_1 = arith.constant 0 : index
    %0 = vector.load %arg1[%c0, %c0_0, %c0_1] : memref<1x32x256xf32, #tpu.memory_space<vmem>>, vector<1x32x256xf32>
    %1 = vector.shape_cast %0 : vector<1x32x256xf32> to vector<32x256xf32>
    %cst = arith.constant dense<0.000000e+00> : vector<32xf32>
    %2 = vector.multi_reduction <add>, %1, %cst [1] : vector<32x256xf32> to vector<32xf32>
    %3 = vector.shape_cast %2 : vector<32xf32> to vector<32x1xf32>
    %cst_2 = arith.constant 3.906250e-03 : f32
    %4 = vector.broadcast %cst_2 : f32 to vector<32x1xf32>
    %5 = arith.mulf %3, %4 : vector<32x1xf32>
    %cst_3 = arith.constant dense<0xFF800000> : vector<32xf32>
    %6 = vector.multi_reduction <maximumf>, %1, %cst_3 [1] : vector<32x256xf32> to vector<32xf32>
    %7 = vector.shape_cast %6 : vector<32xf32> to vector<32x1xf32>
    %8 = tpu.concatenate %5, %7 in 1 : vector<32x1xf32>, vector<32x1xf32> -> vector<32x2xf32>
    %c0_4 = arith.constant 0 : index
    %c0_5 = arith.constant 0 : index
    %9 = vector.load %arg2[%c0_4, %c0_5] : memref<2x32xf32, #tpu.memory_space<vmem>>, vector<2x32xf32>
    %cst_6 = arith.constant dense<0.000000e+00> : vector<2x2xf32>
    %10 = tpu.matmul %9, %8, %cst_6 {dimension_numbers = #tpu.dot_dimension_numbers<[1], [0], [0], [1], [0, 0, 1, 1], [], []>} : vector<2x32xf32>, vector<32x2xf32>, vector<2x2xf32> -> vector<2x2xf32>
    %c0_7 = arith.constant 0 : index
    %c0_8 = arith.constant 0 : index
    %11 = vector.load %arg3[%c0_7, %c0_8] : memref<2x1xf32, #tpu.memory_space<vmem>>, vector<2x1xf32>
    %12 = vector.broadcast %11 : vector<2x1xf32> to vector<2x2xf32>
    %13 = arith.addf %10, %12 : vector<2x2xf32>
    %cst_9 = arith.constant 0.000000e+00 : f32
    %14 = vector.broadcast %cst_9 : f32 to vector<2x2xf32>
    %15 = arith.maximumf %13, %14 : vector<2x2xf32>
    %c0_10 = arith.constant 0 : index
    %c0_11 = arith.constant 0 : index
    %16 = vector.load %arg4[%c0_10, %c0_11] : memref<32x2xf32, #tpu.memory_space<vmem>>, vector<32x2xf32>
    %cst_12 = arith.constant dense<0.000000e+00> : vector<32x2xf32>
    %17 = tpu.matmul %16, %15, %cst_12 {dimension_numbers = #tpu.dot_dimension_numbers<[1], [0], [0], [1], [0, 0, 1, 1], [], []>} : vector<32x2xf32>, vector<2x2xf32>, vector<32x2xf32> -> vector<32x2xf32>
    %c0_13 = arith.constant 0 : index
    %c0_14 = arith.constant 0 : index
    %18 = vector.load %arg5[%c0_13, %c0_14] : memref<32x1xf32, #tpu.memory_space<vmem>>, vector<32x1xf32>
    %19 = vector.broadcast %18 : vector<32x1xf32> to vector<32x2xf32>
    %20 = arith.addf %17, %19 : vector<32x2xf32>
    %cst_15 = arith.constant dense<0.000000e+00> : vector<32xf32>
    %21 = vector.multi_reduction <add>, %20, %cst_15 [1] : vector<32x2xf32> to vector<32xf32>
    %22 = vector.shape_cast %21 : vector<32xf32> to vector<32x1xf32>
    %23 = arith.negf %22 : vector<32x1xf32>
    %24 = math.exp %23 : vector<32x1xf32>
    %cst_16 = arith.constant 1.000000e+00 : f32
    %25 = vector.broadcast %cst_16 : f32 to vector<32x1xf32>
    %26 = arith.addf %25, %24 : vector<32x1xf32>
    %27 = arith.divf %25, %26 : vector<32x1xf32>
    %28 = vector.broadcast %27 : vector<32x1xf32> to vector<32x256xf32>
    %29 = arith.mulf %1, %28 : vector<32x256xf32>
    %cst_17 = arith.constant dense<0xFF800000> : vector<256xf32>
    %30 = vector.multi_reduction <maximumf>, %29, %cst_17 [0] : vector<32x256xf32> to vector<256xf32>
    %31 = vector.shape_cast %30 : vector<256xf32> to vector<1x256xf32>
    %cst_18 = arith.constant dense<0.000000e+00> : vector<256xf32>
    %32 = vector.multi_reduction <add>, %29, %cst_18 [0] : vector<32x256xf32> to vector<256xf32>
    %33 = vector.shape_cast %32 : vector<256xf32> to vector<1x256xf32>
    %cst_19 = arith.constant 3.125000e-02 : f32
    %34 = vector.broadcast %cst_19 : f32 to vector<1x256xf32>
    %35 = arith.mulf %33, %34 : vector<1x256xf32>
    %36 = tpu.concatenate %31, %35 in 1 : vector<1x256xf32>, vector<1x256xf32> -> vector<1x512xf32>
    %cst_20 = arith.constant 0.000000e+00 : f32
    %37 = vector.broadcast %cst_20 : f32 to vector<1x256xf32>
    %c51_i32 = arith.constant 51 : i32
    %38 = tpu.dynamic_rotate %36 by %c51_i32 dim 1 : vector<1x512xf32>, i32 -> vector<1x512xf32>
    %39 = vector.extract_strided_slice %38 {offsets = [0, 0], sizes = [1, 256], strides = [1, 1]} : vector<1x512xf32> to vector<1x256xf32>
    %40 = vector.extract_strided_slice %38 {offsets = [0, 256], sizes = [1, 256], strides = [1, 1]} : vector<1x512xf32> to vector<1x256xf32>
    %c0_21 = arith.constant 0 : index
    %c0_22 = arith.constant 0 : index
    %41 = vector.load %arg6[%c0_21, %c0_22] : memref<49x256xf32, #tpu.memory_space<vmem>>, vector<1x256xf32>
    %c0_23 = arith.constant 0 : index
    %42 = memref.load %arg7[%c0_23] : memref<98xf32, #tpu.memory_space<smem>>
    %43 = vector.broadcast %42 : f32 to vector<1x256xf32>
    %44 = arith.mulf %43, %39 : vector<1x256xf32>
    %c49 = arith.constant 49 : index
    %45 = memref.load %arg7[%c49] : memref<98xf32, #tpu.memory_space<smem>>
    %46 = vector.broadcast %45 : f32 to vector<1x256xf32>
    %47 = arith.mulf %46, %40 : vector<1x256xf32>
    %48 = arith.addf %44, %47 : vector<1x256xf32>
    %49 = arith.mulf %48, %41 : vector<1x256xf32>
    %50 = arith.addf %37, %49 : vector<1x256xf32>
    %c50_i32 = arith.constant 50 : i32
    %51 = tpu.dynamic_rotate %36 by %c50_i32 dim 1 : vector<1x512xf32>, i32 -> vector<1x512xf32>
    %52 = vector.extract_strided_slice %51 {offsets = [0, 0], sizes = [1, 256], strides = [1, 1]} : vector<1x512xf32> to vector<1x256xf32>
    %53 = vector.extract_strided_slice %51 {offsets = [0, 256], sizes = [1, 256], strides = [1, 1]} : vector<1x512xf32> to vector<1x256xf32>
    %c1 = arith.constant 1 : index
    %c0_24 = arith.constant 0 : index
    %54 = vector.load %arg6[%c1, %c0_24] : memref<49x256xf32, #tpu.memory_space<vmem>>, vector<1x256xf32>
    %c1_25 = arith.constant 1 : index
    %55 = memref.load %arg7[%c1_25] : memref<98xf32, #tpu.memory_space<smem>>
    %56 = vector.broadcast %55 : f32 to vector<1x256xf32>
    %57 = arith.mulf %56, %52 : vector<1x256xf32>
    %c50 = arith.constant 50 : index
    %58 = memref.load %arg7[%c50] : memref<98xf32, #tpu.memory_space<smem>>
    %59 = vector.broadcast %58 : f32 to vector<1x256xf32>
    %60 = arith.mulf %59, %53 : vector<1x256xf32>
    %61 = arith.addf %57, %60 : vector<1x256xf32>
    %62 = arith.mulf %61, %54 : vector<1x256xf32>
    %63 = arith.addf %50, %62 : vector<1x256xf32>
    %c49_i32 = arith.constant 49 : i32
    %64 = tpu.dynamic_rotate %36 by %c49_i32 dim 1 : vector<1x512xf32>, i32 -> vector<1x512xf32>
    %65 = vector.extract_strided_slice %64 {offsets = [0, 0], sizes = [1, 256], strides = [1, 1]} : vector<1x512xf32> to vector<1x256xf32>
    %66 = vector.extract_strided_slice %64 {offsets = [0, 256], sizes = [1, 256], strides = [1, 1]} : vector<1x512xf32> to vector<1x256xf32>
    %c2 = arith.constant 2 : index
    %c0_26 = arith.constant 0 : index
    %67 = vector.load %arg6[%c2, %c0_26] : memref<49x256xf32, #tpu.memory_space<vmem>>, vector<1x256xf32>
    %c2_27 = arith.constant 2 : index
    %68 = memref.load %arg7[%c2_27] : memref<98xf32, #tpu.memory_space<smem>>
    %69 = vector.broadcast %68 : f32 to vector<1x256xf32>
    %70 = arith.mulf %69, %65 : vector<1x256xf32>
    %c51 = arith.constant 51 : index
    %71 = memref.load %arg7[%c51] : memref<98xf32, #tpu.memory_space<smem>>
    %72 = vector.broadcast %71 : f32 to vector<1x256xf32>
    %73 = arith.mulf %72, %66 : vector<1x256xf32>
    %74 = arith.addf %70, %73 : vector<1x256xf32>
    %75 = arith.mulf %74, %67 : vector<1x256xf32>
    %76 = arith.addf %63, %75 : vector<1x256xf32>
    %c48_i32 = arith.constant 48 : i32
    %77 = tpu.dynamic_rotate %36 by %c48_i32 dim 1 : vector<1x512xf32>, i32 -> vector<1x512xf32>
    %78 = vector.extract_strided_slice %77 {offsets = [0, 0], sizes = [1, 256], strides = [1, 1]} : vector<1x512xf32> to vector<1x256xf32>
    %79 = vector.extract_strided_slice %77 {offsets = [0, 256], sizes = [1, 256], strides = [1, 1]} : vector<1x512xf32> to vector<1x256xf32>
    %c3 = arith.constant 3 : index
    %c0_28 = arith.constant 0 : index
    %80 = vector.load %arg6[%c3, %c0_28] : memref<49x256xf32, #tpu.memory_space<vmem>>, vector<1x256xf32>
    %c3_29 = arith.constant 3 : index
    %81 = memref.load %arg7[%c3_29] : memref<98xf32, #tpu.memory_space<smem>>
    %82 = vector.broadcast %81 : f32 to vector<1x256xf32>
    %83 = arith.mulf %82, %78 : vector<1x256xf32>
    %c52 = arith.constant 52 : index
    %84 = memref.load %arg7[%c52] : memref<98xf32, #tpu.memory_space<smem>>
    %85 = vector.broadcast %84 : f32 to vector<1x256xf32>
    %86 = arith.mulf %85, %79 : vector<1x256xf32>
    %87 = arith.addf %83, %86 : vector<1x256xf32>
    %88 = arith.mulf %87, %80 : vector<1x256xf32>
    %89 = arith.addf %76, %88 : vector<1x256xf32>
    %c47_i32 = arith.constant 47 : i32
    %90 = tpu.dynamic_rotate %36 by %c47_i32 dim 1 : vector<1x512xf32>, i32 -> vector<1x512xf32>
    %91 = vector.extract_strided_slice %90 {offsets = [0, 0], sizes = [1, 256], strides = [1, 1]} : vector<1x512xf32> to vector<1x256xf32>
    %92 = vector.extract_strided_slice %90 {offsets = [0, 256], sizes = [1, 256], strides = [1, 1]} : vector<1x512xf32> to vector<1x256xf32>
    %c4 = arith.constant 4 : index
    %c0_30 = arith.constant 0 : index
    %93 = vector.load %arg6[%c4, %c0_30] : memref<49x256xf32, #tpu.memory_space<vmem>>, vector<1x256xf32>
    %c4_31 = arith.constant 4 : index
    %94 = memref.load %arg7[%c4_31] : memref<98xf32, #tpu.memory_space<smem>>
    %95 = vector.broadcast %94 : f32 to vector<1x256xf32>
    %96 = arith.mulf %95, %91 : vector<1x256xf32>
    %c53 = arith.constant 53 : index
    %97 = memref.load %arg7[%c53] : memref<98xf32, #tpu.memory_space<smem>>
    %98 = vector.broadcast %97 : f32 to vector<1x256xf32>
    %99 = arith.mulf %98, %92 : vector<1x256xf32>
    %100 = arith.addf %96, %99 : vector<1x256xf32>
    %101 = arith.mulf %100, %93 : vector<1x256xf32>
    %102 = arith.addf %89, %101 : vector<1x256xf32>
    %c46_i32 = arith.constant 46 : i32
    %103 = tpu.dynamic_rotate %36 by %c46_i32 dim 1 : vector<1x512xf32>, i32 -> vector<1x512xf32>
    %104 = vector.extract_strided_slice %103 {offsets = [0, 0], sizes = [1, 256], strides = [1, 1]} : vector<1x512xf32> to vector<1x256xf32>
    %105 = vector.extract_strided_slice %103 {offsets = [0, 256], sizes = [1, 256], strides = [1, 1]} : vector<1x512xf32> to vector<1x256xf32>
    %c5 = arith.constant 5 : index
    %c0_32 = arith.constant 0 : index
    %106 = vector.load %arg6[%c5, %c0_32] : memref<49x256xf32, #tpu.memory_space<vmem>>, vector<1x256xf32>
    %c5_33 = arith.constant 5 : index
    %107 = memref.load %arg7[%c5_33] : memref<98xf32, #tpu.memory_space<smem>>
    %108 = vector.broadcast %107 : f32 to vector<1x256xf32>
    %109 = arith.mulf %108, %104 : vector<1x256xf32>
    %c54 = arith.constant 54 : index
    %110 = memref.load %arg7[%c54] : memref<98xf32, #tpu.memory_space<smem>>
    %111 = vector.broadcast %110 : f32 to vector<1x256xf32>
    %112 = arith.mulf %111, %105 : vector<1x256xf32>
    %113 = arith.addf %109, %112 : vector<1x256xf32>
    %114 = arith.mulf %113, %106 : vector<1x256xf32>
    %115 = arith.addf %102, %114 : vector<1x256xf32>
    %c45_i32 = arith.constant 45 : i32
    %116 = tpu.dynamic_rotate %36 by %c45_i32 dim 1 : vector<1x512xf32>, i32 -> vector<1x512xf32>
    %117 = vector.extract_strided_slice %116 {offsets = [0, 0], sizes = [1, 256], strides = [1, 1]} : vector<1x512xf32> to vector<1x256xf32>
    %118 = vector.extract_strided_slice %116 {offsets = [0, 256], sizes = [1, 256], strides = [1, 1]} : vector<1x512xf32> to vector<1x256xf32>
    %c6 = arith.constant 6 : index
    %c0_34 = arith.constant 0 : index
    %119 = vector.load %arg6[%c6, %c0_34] : memref<49x256xf32, #tpu.memory_space<vmem>>, vector<1x256xf32>
    %c6_35 = arith.constant 6 : index
    %120 = memref.load %arg7[%c6_35] : memref<98xf32, #tpu.memory_space<smem>>
    %121 = vector.broadcast %120 : f32 to vector<1x256xf32>
    %122 = arith.mulf %121, %117 : vector<1x256xf32>
    %c55 = arith.constant 55 : index
    %123 = memref.load %arg7[%c55] : memref<98xf32, #tpu.memory_space<smem>>
    %124 = vector.broadcast %123 : f32 to vector<1x256xf32>
    %125 = arith.mulf %124, %118 : vector<1x256xf32>
    %126 = arith.addf %122, %125 : vector<1x256xf32>
    %127 = arith.mulf %126, %119 : vector<1x256xf32>
    %128 = arith.addf %115, %127 : vector<1x256xf32>
    %c35_i32 = arith.constant 35 : i32
    %129 = tpu.dynamic_rotate %36 by %c35_i32 dim 1 : vector<1x512xf32>, i32 -> vector<1x512xf32>
    %130 = vector.extract_strided_slice %129 {offsets = [0, 0], sizes = [1, 256], strides = [1, 1]} : vector<1x512xf32> to vector<1x256xf32>
    %131 = vector.extract_strided_slice %129 {offsets = [0, 256], sizes = [1, 256], strides = [1, 1]} : vector<1x512xf32> to vector<1x256xf32>
    %c7 = arith.constant 7 : index
    %c0_36 = arith.constant 0 : index
    %132 = vector.load %arg6[%c7, %c0_36] : memref<49x256xf32, #tpu.memory_space<vmem>>, vector<1x256xf32>
    %c7_37 = arith.constant 7 : index
    %133 = memref.load %arg7[%c7_37] : memref<98xf32, #tpu.memory_space<smem>>
    %134 = vector.broadcast %133 : f32 to vector<1x256xf32>
    %135 = arith.mulf %134, %130 : vector<1x256xf32>
    %c56 = arith.constant 56 : index
    %136 = memref.load %arg7[%c56] : memref<98xf32, #tpu.memory_space<smem>>
    %137 = vector.broadcast %136 : f32 to vector<1x256xf32>
    %138 = arith.mulf %137, %131 : vector<1x256xf32>
    %139 = arith.addf %135, %138 : vector<1x256xf32>
    %140 = arith.mulf %139, %132 : vector<1x256xf32>
    %141 = arith.addf %128, %140 : vector<1x256xf32>
    %c34_i32 = arith.constant 34 : i32
    %142 = tpu.dynamic_rotate %36 by %c34_i32 dim 1 : vector<1x512xf32>, i32 -> vector<1x512xf32>
    %143 = vector.extract_strided_slice %142 {offsets = [0, 0], sizes = [1, 256], strides = [1, 1]} : vector<1x512xf32> to vector<1x256xf32>
    %144 = vector.extract_strided_slice %142 {offsets = [0, 256], sizes = [1, 256], strides = [1, 1]} : vector<1x512xf32> to vector<1x256xf32>
    %c8 = arith.constant 8 : index
    %c0_38 = arith.constant 0 : index
    %145 = vector.load %arg6[%c8, %c0_38] : memref<49x256xf32, #tpu.memory_space<vmem>>, vector<1x256xf32>
    %c8_39 = arith.constant 8 : index
    %146 = memref.load %arg7[%c8_39] : memref<98xf32, #tpu.memory_space<smem>>
    %147 = vector.broadcast %146 : f32 to vector<1x256xf32>
    %148 = arith.mulf %147, %143 : vector<1x256xf32>
    %c57 = arith.constant 57 : index
    %149 = memref.load %arg7[%c57] : memref<98xf32, #tpu.memory_space<smem>>
    %150 = vector.broadcast %149 : f32 to vector<1x256xf32>
    %151 = arith.mulf %150, %144 : vector<1x256xf32>
    %152 = arith.addf %148, %151 : vector<1x256xf32>
    %153 = arith.mulf %152, %145 : vector<1x256xf32>
    %154 = arith.addf %141, %153 : vector<1x256xf32>
    %c33_i32 = arith.constant 33 : i32
    %155 = tpu.dynamic_rotate %36 by %c33_i32 dim 1 : vector<1x512xf32>, i32 -> vector<1x512xf32>
    %156 = vector.extract_strided_slice %155 {offsets = [0, 0], sizes = [1, 256], strides = [1, 1]} : vector<1x512xf32> to vector<1x256xf32>
    %157 = vector.extract_strided_slice %155 {offsets = [0, 256], sizes = [1, 256], strides = [1, 1]} : vector<1x512xf32> to vector<1x256xf32>
    %c9 = arith.constant 9 : index
    %c0_40 = arith.constant 0 : index
    %158 = vector.load %arg6[%c9, %c0_40] : memref<49x256xf32, #tpu.memory_space<vmem>>, vector<1x256xf32>
    %c9_41 = arith.constant 9 : index
    %159 = memref.load %arg7[%c9_41] : memref<98xf32, #tpu.memory_space<smem>>
    %160 = vector.broadcast %159 : f32 to vector<1x256xf32>
    %161 = arith.mulf %160, %156 : vector<1x256xf32>
    %c58 = arith.constant 58 : index
    %162 = memref.load %arg7[%c58] : memref<98xf32, #tpu.memory_space<smem>>
    %163 = vector.broadcast %162 : f32 to vector<1x256xf32>
    %164 = arith.mulf %163, %157 : vector<1x256xf32>
    %165 = arith.addf %161, %164 : vector<1x256xf32>
    %166 = arith.mulf %165, %158 : vector<1x256xf32>
    %167 = arith.addf %154, %166 : vector<1x256xf32>
    %c32_i32 = arith.constant 32 : i32
    %168 = tpu.dynamic_rotate %36 by %c32_i32 dim 1 : vector<1x512xf32>, i32 -> vector<1x512xf32>
    %169 = vector.extract_strided_slice %168 {offsets = [0, 0], sizes = [1, 256], strides = [1, 1]} : vector<1x512xf32> to vector<1x256xf32>
    %170 = vector.extract_strided_slice %168 {offsets = [0, 256], sizes = [1, 256], strides = [1, 1]} : vector<1x512xf32> to vector<1x256xf32>
    %c10 = arith.constant 10 : index
    %c0_42 = arith.constant 0 : index
    %171 = vector.load %arg6[%c10, %c0_42] : memref<49x256xf32, #tpu.memory_space<vmem>>, vector<1x256xf32>
    %c10_43 = arith.constant 10 : index
    %172 = memref.load %arg7[%c10_43] : memref<98xf32, #tpu.memory_space<smem>>
    %173 = vector.broadcast %172 : f32 to vector<1x256xf32>
    %174 = arith.mulf %173, %169 : vector<1x256xf32>
    %c59 = arith.constant 59 : index
    %175 = memref.load %arg7[%c59] : memref<98xf32, #tpu.memory_space<smem>>
    %176 = vector.broadcast %175 : f32 to vector<1x256xf32>
    %177 = arith.mulf %176, %170 : vector<1x256xf32>
    %178 = arith.addf %174, %177 : vector<1x256xf32>
    %179 = arith.mulf %178, %171 : vector<1x256xf32>
    %180 = arith.addf %167, %179 : vector<1x256xf32>
    %c31_i32 = arith.constant 31 : i32
    %181 = tpu.dynamic_rotate %36 by %c31_i32 dim 1 : vector<1x512xf32>, i32 -> vector<1x512xf32>
    %182 = vector.extract_strided_slice %181 {offsets = [0, 0], sizes = [1, 256], strides = [1, 1]} : vector<1x512xf32> to vector<1x256xf32>
    %183 = vector.extract_strided_slice %181 {offsets = [0, 256], sizes = [1, 256], strides = [1, 1]} : vector<1x512xf32> to vector<1x256xf32>
    %c11 = arith.constant 11 : index
    %c0_44 = arith.constant 0 : index
    %184 = vector.load %arg6[%c11, %c0_44] : memref<49x256xf32, #tpu.memory_space<vmem>>, vector<1x256xf32>
    %c11_45 = arith.constant 11 : index
    %185 = memref.load %arg7[%c11_45] : memref<98xf32, #tpu.memory_space<smem>>
    %186 = vector.broadcast %185 : f32 to vector<1x256xf32>
    %187 = arith.mulf %186, %182 : vector<1x256xf32>
    %c60 = arith.constant 60 : index
    %188 = memref.load %arg7[%c60] : memref<98xf32, #tpu.memory_space<smem>>
    %189 = vector.broadcast %188 : f32 to vector<1x256xf32>
    %190 = arith.mulf %189, %183 : vector<1x256xf32>
    %191 = arith.addf %187, %190 : vector<1x256xf32>
    %192 = arith.mulf %191, %184 : vector<1x256xf32>
    %193 = arith.addf %180, %192 : vector<1x256xf32>
    %c30_i32 = arith.constant 30 : i32
    %194 = tpu.dynamic_rotate %36 by %c30_i32 dim 1 : vector<1x512xf32>, i32 -> vector<1x512xf32>
    %195 = vector.extract_strided_slice %194 {offsets = [0, 0], sizes = [1, 256], strides = [1, 1]} : vector<1x512xf32> to vector<1x256xf32>
    %196 = vector.extract_strided_slice %194 {offsets = [0, 256], sizes = [1, 256], strides = [1, 1]} : vector<1x512xf32> to vector<1x256xf32>
    %c12 = arith.constant 12 : index
    %c0_46 = arith.constant 0 : index
    %197 = vector.load %arg6[%c12, %c0_46] : memref<49x256xf32, #tpu.memory_space<vmem>>, vector<1x256xf32>
    %c12_47 = arith.constant 12 : index
    %198 = memref.load %arg7[%c12_47] : memref<98xf32, #tpu.memory_space<smem>>
    %199 = vector.broadcast %198 : f32 to vector<1x256xf32>
    %200 = arith.mulf %199, %195 : vector<1x256xf32>
    %c61 = arith.constant 61 : index
    %201 = memref.load %arg7[%c61] : memref<98xf32, #tpu.memory_space<smem>>
    %202 = vector.broadcast %201 : f32 to vector<1x256xf32>
    %203 = arith.mulf %202, %196 : vector<1x256xf32>
    %204 = arith.addf %200, %203 : vector<1x256xf32>
    %205 = arith.mulf %204, %197 : vector<1x256xf32>
    %206 = arith.addf %193, %205 : vector<1x256xf32>
    %c29_i32 = arith.constant 29 : i32
    %207 = tpu.dynamic_rotate %36 by %c29_i32 dim 1 : vector<1x512xf32>, i32 -> vector<1x512xf32>
    %208 = vector.extract_strided_slice %207 {offsets = [0, 0], sizes = [1, 256], strides = [1, 1]} : vector<1x512xf32> to vector<1x256xf32>
    %209 = vector.extract_strided_slice %207 {offsets = [0, 256], sizes = [1, 256], strides = [1, 1]} : vector<1x512xf32> to vector<1x256xf32>
    %c13 = arith.constant 13 : index
    %c0_48 = arith.constant 0 : index
    %210 = vector.load %arg6[%c13, %c0_48] : memref<49x256xf32, #tpu.memory_space<vmem>>, vector<1x256xf32>
    %c13_49 = arith.constant 13 : index
    %211 = memref.load %arg7[%c13_49] : memref<98xf32, #tpu.memory_space<smem>>
    %212 = vector.broadcast %211 : f32 to vector<1x256xf32>
    %213 = arith.mulf %212, %208 : vector<1x256xf32>
    %c62 = arith.constant 62 : index
    %214 = memref.load %arg7[%c62] : memref<98xf32, #tpu.memory_space<smem>>
    %215 = vector.broadcast %214 : f32 to vector<1x256xf32>
    %216 = arith.mulf %215, %209 : vector<1x256xf32>
    %217 = arith.addf %213, %216 : vector<1x256xf32>
    %218 = arith.mulf %217, %210 : vector<1x256xf32>
    %219 = arith.addf %206, %218 : vector<1x256xf32>
    %c19_i32 = arith.constant 19 : i32
    %220 = tpu.dynamic_rotate %36 by %c19_i32 dim 1 : vector<1x512xf32>, i32 -> vector<1x512xf32>
    %221 = vector.extract_strided_slice %220 {offsets = [0, 0], sizes = [1, 256], strides = [1, 1]} : vector<1x512xf32> to vector<1x256xf32>
    %222 = vector.extract_strided_slice %220 {offsets = [0, 256], sizes = [1, 256], strides = [1, 1]} : vector<1x512xf32> to vector<1x256xf32>
    %c14 = arith.constant 14 : index
    %c0_50 = arith.constant 0 : index
    %223 = vector.load %arg6[%c14, %c0_50] : memref<49x256xf32, #tpu.memory_space<vmem>>, vector<1x256xf32>
    %c14_51 = arith.constant 14 : index
    %224 = memref.load %arg7[%c14_51] : memref<98xf32, #tpu.memory_space<smem>>
    %225 = vector.broadcast %224 : f32 to vector<1x256xf32>
    %226 = arith.mulf %225, %221 : vector<1x256xf32>
    %c63 = arith.constant 63 : index
    %227 = memref.load %arg7[%c63] : memref<98xf32, #tpu.memory_space<smem>>
    %228 = vector.broadcast %227 : f32 to vector<1x256xf32>
    %229 = arith.mulf %228, %222 : vector<1x256xf32>
    %230 = arith.addf %226, %229 : vector<1x256xf32>
    %231 = arith.mulf %230, %223 : vector<1x256xf32>
    %232 = arith.addf %219, %231 : vector<1x256xf32>
    %c18_i32 = arith.constant 18 : i32
    %233 = tpu.dynamic_rotate %36 by %c18_i32 dim 1 : vector<1x512xf32>, i32 -> vector<1x512xf32>
    %234 = vector.extract_strided_slice %233 {offsets = [0, 0], sizes = [1, 256], strides = [1, 1]} : vector<1x512xf32> to vector<1x256xf32>
    %235 = vector.extract_strided_slice %233 {offsets = [0, 256], sizes = [1, 256], strides = [1, 1]} : vector<1x512xf32> to vector<1x256xf32>
    %c15 = arith.constant 15 : index
    %c0_52 = arith.constant 0 : index
    %236 = vector.load %arg6[%c15, %c0_52] : memref<49x256xf32, #tpu.memory_space<vmem>>, vector<1x256xf32>
    %c15_53 = arith.constant 15 : index
    %237 = memref.load %arg7[%c15_53] : memref<98xf32, #tpu.memory_space<smem>>
    %238 = vector.broadcast %237 : f32 to vector<1x256xf32>
    %239 = arith.mulf %238, %234 : vector<1x256xf32>
    %c64 = arith.constant 64 : index
    %240 = memref.load %arg7[%c64] : memref<98xf32, #tpu.memory_space<smem>>
    %241 = vector.broadcast %240 : f32 to vector<1x256xf32>
    %242 = arith.mulf %241, %235 : vector<1x256xf32>
    %243 = arith.addf %239, %242 : vector<1x256xf32>
    %244 = arith.mulf %243, %236 : vector<1x256xf32>
    %245 = arith.addf %232, %244 : vector<1x256xf32>
    %c17_i32 = arith.constant 17 : i32
    %246 = tpu.dynamic_rotate %36 by %c17_i32 dim 1 : vector<1x512xf32>, i32 -> vector<1x512xf32>
    %247 = vector.extract_strided_slice %246 {offsets = [0, 0], sizes = [1, 256], strides = [1, 1]} : vector<1x512xf32> to vector<1x256xf32>
    %248 = vector.extract_strided_slice %246 {offsets = [0, 256], sizes = [1, 256], strides = [1, 1]} : vector<1x512xf32> to vector<1x256xf32>
    %c16 = arith.constant 16 : index
    %c0_54 = arith.constant 0 : index
    %249 = vector.load %arg6[%c16, %c0_54] : memref<49x256xf32, #tpu.memory_space<vmem>>, vector<1x256xf32>
    %c16_55 = arith.constant 16 : index
    %250 = memref.load %arg7[%c16_55] : memref<98xf32, #tpu.memory_space<smem>>
    %251 = vector.broadcast %250 : f32 to vector<1x256xf32>
    %252 = arith.mulf %251, %247 : vector<1x256xf32>
    %c65 = arith.constant 65 : index
    %253 = memref.load %arg7[%c65] : memref<98xf32, #tpu.memory_space<smem>>
    %254 = vector.broadcast %253 : f32 to vector<1x256xf32>
    %255 = arith.mulf %254, %248 : vector<1x256xf32>
    %256 = arith.addf %252, %255 : vector<1x256xf32>
    %257 = arith.mulf %256, %249 : vector<1x256xf32>
    %258 = arith.addf %245, %257 : vector<1x256xf32>
    %c16_i32 = arith.constant 16 : i32
    %259 = tpu.dynamic_rotate %36 by %c16_i32 dim 1 : vector<1x512xf32>, i32 -> vector<1x512xf32>
    %260 = vector.extract_strided_slice %259 {offsets = [0, 0], sizes = [1, 256], strides = [1, 1]} : vector<1x512xf32> to vector<1x256xf32>
    %261 = vector.extract_strided_slice %259 {offsets = [0, 256], sizes = [1, 256], strides = [1, 1]} : vector<1x512xf32> to vector<1x256xf32>
    %c17 = arith.constant 17 : index
    %c0_56 = arith.constant 0 : index
    %262 = vector.load %arg6[%c17, %c0_56] : memref<49x256xf32, #tpu.memory_space<vmem>>, vector<1x256xf32>
    %c17_57 = arith.constant 17 : index
    %263 = memref.load %arg7[%c17_57] : memref<98xf32, #tpu.memory_space<smem>>
    %264 = vector.broadcast %263 : f32 to vector<1x256xf32>
    %265 = arith.mulf %264, %260 : vector<1x256xf32>
    %c66 = arith.constant 66 : index
    %266 = memref.load %arg7[%c66] : memref<98xf32, #tpu.memory_space<smem>>
    %267 = vector.broadcast %266 : f32 to vector<1x256xf32>
    %268 = arith.mulf %267, %261 : vector<1x256xf32>
    %269 = arith.addf %265, %268 : vector<1x256xf32>
    %270 = arith.mulf %269, %262 : vector<1x256xf32>
    %271 = arith.addf %258, %270 : vector<1x256xf32>
    %c15_i32 = arith.constant 15 : i32
    %272 = tpu.dynamic_rotate %36 by %c15_i32 dim 1 : vector<1x512xf32>, i32 -> vector<1x512xf32>
    %273 = vector.extract_strided_slice %272 {offsets = [0, 0], sizes = [1, 256], strides = [1, 1]} : vector<1x512xf32> to vector<1x256xf32>
    %274 = vector.extract_strided_slice %272 {offsets = [0, 256], sizes = [1, 256], strides = [1, 1]} : vector<1x512xf32> to vector<1x256xf32>
    %c18 = arith.constant 18 : index
    %c0_58 = arith.constant 0 : index
    %275 = vector.load %arg6[%c18, %c0_58] : memref<49x256xf32, #tpu.memory_space<vmem>>, vector<1x256xf32>
    %c18_59 = arith.constant 18 : index
    %276 = memref.load %arg7[%c18_59] : memref<98xf32, #tpu.memory_space<smem>>
    %277 = vector.broadcast %276 : f32 to vector<1x256xf32>
    %278 = arith.mulf %277, %273 : vector<1x256xf32>
    %c67 = arith.constant 67 : index
    %279 = memref.load %arg7[%c67] : memref<98xf32, #tpu.memory_space<smem>>
    %280 = vector.broadcast %279 : f32 to vector<1x256xf32>
    %281 = arith.mulf %280, %274 : vector<1x256xf32>
    %282 = arith.addf %278, %281 : vector<1x256xf32>
    %283 = arith.mulf %282, %275 : vector<1x256xf32>
    %284 = arith.addf %271, %283 : vector<1x256xf32>
    %c14_i32 = arith.constant 14 : i32
    %285 = tpu.dynamic_rotate %36 by %c14_i32 dim 1 : vector<1x512xf32>, i32 -> vector<1x512xf32>
    %286 = vector.extract_strided_slice %285 {offsets = [0, 0], sizes = [1, 256], strides = [1, 1]} : vector<1x512xf32> to vector<1x256xf32>
    %287 = vector.extract_strided_slice %285 {offsets = [0, 256], sizes = [1, 256], strides = [1, 1]} : vector<1x512xf32> to vector<1x256xf32>
    %c19 = arith.constant 19 : index
    %c0_60 = arith.constant 0 : index
    %288 = vector.load %arg6[%c19, %c0_60] : memref<49x256xf32, #tpu.memory_space<vmem>>, vector<1x256xf32>
    %c19_61 = arith.constant 19 : index
    %289 = memref.load %arg7[%c19_61] : memref<98xf32, #tpu.memory_space<smem>>
    %290 = vector.broadcast %289 : f32 to vector<1x256xf32>
    %291 = arith.mulf %290, %286 : vector<1x256xf32>
    %c68 = arith.constant 68 : index
    %292 = memref.load %arg7[%c68] : memref<98xf32, #tpu.memory_space<smem>>
    %293 = vector.broadcast %292 : f32 to vector<1x256xf32>
    %294 = arith.mulf %293, %287 : vector<1x256xf32>
    %295 = arith.addf %291, %294 : vector<1x256xf32>
    %296 = arith.mulf %295, %288 : vector<1x256xf32>
    %297 = arith.addf %284, %296 : vector<1x256xf32>
    %c13_i32 = arith.constant 13 : i32
    %298 = tpu.dynamic_rotate %36 by %c13_i32 dim 1 : vector<1x512xf32>, i32 -> vector<1x512xf32>
    %299 = vector.extract_strided_slice %298 {offsets = [0, 0], sizes = [1, 256], strides = [1, 1]} : vector<1x512xf32> to vector<1x256xf32>
    %300 = vector.extract_strided_slice %298 {offsets = [0, 256], sizes = [1, 256], strides = [1, 1]} : vector<1x512xf32> to vector<1x256xf32>
    %c20 = arith.constant 20 : index
    %c0_62 = arith.constant 0 : index
    %301 = vector.load %arg6[%c20, %c0_62] : memref<49x256xf32, #tpu.memory_space<vmem>>, vector<1x256xf32>
    %c20_63 = arith.constant 20 : index
    %302 = memref.load %arg7[%c20_63] : memref<98xf32, #tpu.memory_space<smem>>
    %303 = vector.broadcast %302 : f32 to vector<1x256xf32>
    %304 = arith.mulf %303, %299 : vector<1x256xf32>
    %c69 = arith.constant 69 : index
    %305 = memref.load %arg7[%c69] : memref<98xf32, #tpu.memory_space<smem>>
    %306 = vector.broadcast %305 : f32 to vector<1x256xf32>
    %307 = arith.mulf %306, %300 : vector<1x256xf32>
    %308 = arith.addf %304, %307 : vector<1x256xf32>
    %309 = arith.mulf %308, %301 : vector<1x256xf32>
    %310 = arith.addf %297, %309 : vector<1x256xf32>
    %c3_i32 = arith.constant 3 : i32
    %311 = tpu.dynamic_rotate %36 by %c3_i32 dim 1 : vector<1x512xf32>, i32 -> vector<1x512xf32>
    %312 = vector.extract_strided_slice %311 {offsets = [0, 0], sizes = [1, 256], strides = [1, 1]} : vector<1x512xf32> to vector<1x256xf32>
    %313 = vector.extract_strided_slice %311 {offsets = [0, 256], sizes = [1, 256], strides = [1, 1]} : vector<1x512xf32> to vector<1x256xf32>
    %c21 = arith.constant 21 : index
    %c0_64 = arith.constant 0 : index
    %314 = vector.load %arg6[%c21, %c0_64] : memref<49x256xf32, #tpu.memory_space<vmem>>, vector<1x256xf32>
    %c21_65 = arith.constant 21 : index
    %315 = memref.load %arg7[%c21_65] : memref<98xf32, #tpu.memory_space<smem>>
    %316 = vector.broadcast %315 : f32 to vector<1x256xf32>
    %317 = arith.mulf %316, %312 : vector<1x256xf32>
    %c70 = arith.constant 70 : index
    %318 = memref.load %arg7[%c70] : memref<98xf32, #tpu.memory_space<smem>>
    %319 = vector.broadcast %318 : f32 to vector<1x256xf32>
    %320 = arith.mulf %319, %313 : vector<1x256xf32>
    %321 = arith.addf %317, %320 : vector<1x256xf32>
    %322 = arith.mulf %321, %314 : vector<1x256xf32>
    %323 = arith.addf %310, %322 : vector<1x256xf32>
    %c2_i32 = arith.constant 2 : i32
    %324 = tpu.dynamic_rotate %36 by %c2_i32 dim 1 : vector<1x512xf32>, i32 -> vector<1x512xf32>
    %325 = vector.extract_strided_slice %324 {offsets = [0, 0], sizes = [1, 256], strides = [1, 1]} : vector<1x512xf32> to vector<1x256xf32>
    %326 = vector.extract_strided_slice %324 {offsets = [0, 256], sizes = [1, 256], strides = [1, 1]} : vector<1x512xf32> to vector<1x256xf32>
    %c22 = arith.constant 22 : index
    %c0_66 = arith.constant 0 : index
    %327 = vector.load %arg6[%c22, %c0_66] : memref<49x256xf32, #tpu.memory_space<vmem>>, vector<1x256xf32>
    %c22_67 = arith.constant 22 : index
    %328 = memref.load %arg7[%c22_67] : memref<98xf32, #tpu.memory_space<smem>>
    %329 = vector.broadcast %328 : f32 to vector<1x256xf32>
    %330 = arith.mulf %329, %325 : vector<1x256xf32>
    %c71 = arith.constant 71 : index
    %331 = memref.load %arg7[%c71] : memref<98xf32, #tpu.memory_space<smem>>
    %332 = vector.broadcast %331 : f32 to vector<1x256xf32>
    %333 = arith.mulf %332, %326 : vector<1x256xf32>
    %334 = arith.addf %330, %333 : vector<1x256xf32>
    %335 = arith.mulf %334, %327 : vector<1x256xf32>
    %336 = arith.addf %323, %335 : vector<1x256xf32>
    %c1_i32 = arith.constant 1 : i32
    %337 = tpu.dynamic_rotate %36 by %c1_i32 dim 1 : vector<1x512xf32>, i32 -> vector<1x512xf32>
    %338 = vector.extract_strided_slice %337 {offsets = [0, 0], sizes = [1, 256], strides = [1, 1]} : vector<1x512xf32> to vector<1x256xf32>
    %339 = vector.extract_strided_slice %337 {offsets = [0, 256], sizes = [1, 256], strides = [1, 1]} : vector<1x512xf32> to vector<1x256xf32>
    %c23 = arith.constant 23 : index
    %c0_68 = arith.constant 0 : index
    %340 = vector.load %arg6[%c23, %c0_68] : memref<49x256xf32, #tpu.memory_space<vmem>>, vector<1x256xf32>
    %c23_69 = arith.constant 23 : index
    %341 = memref.load %arg7[%c23_69] : memref<98xf32, #tpu.memory_space<smem>>
    %342 = vector.broadcast %341 : f32 to vector<1x256xf32>
    %343 = arith.mulf %342, %338 : vector<1x256xf32>
    %c72 = arith.constant 72 : index
    %344 = memref.load %arg7[%c72] : memref<98xf32, #tpu.memory_space<smem>>
    %345 = vector.broadcast %344 : f32 to vector<1x256xf32>
    %346 = arith.mulf %345, %339 : vector<1x256xf32>
    %347 = arith.addf %343, %346 : vector<1x256xf32>
    %348 = arith.mulf %347, %340 : vector<1x256xf32>
    %349 = arith.addf %336, %348 : vector<1x256xf32>
    %350 = vector.extract_strided_slice %36 {offsets = [0, 0], sizes = [1, 256], strides = [1, 1]} : vector<1x512xf32> to vector<1x256xf32>
    %351 = vector.extract_strided_slice %36 {offsets = [0, 256], sizes = [1, 256], strides = [1, 1]} : vector<1x512xf32> to vector<1x256xf32>
    %c24 = arith.constant 24 : index
    %c0_70 = arith.constant 0 : index
    %352 = vector.load %arg6[%c24, %c0_70] : memref<49x256xf32, #tpu.memory_space<vmem>>, vector<1x256xf32>
    %c24_71 = arith.constant 24 : index
    %353 = memref.load %arg7[%c24_71] : memref<98xf32, #tpu.memory_space<smem>>
    %354 = vector.broadcast %353 : f32 to vector<1x256xf32>
    %355 = arith.mulf %354, %350 : vector<1x256xf32>
    %c73 = arith.constant 73 : index
    %356 = memref.load %arg7[%c73] : memref<98xf32, #tpu.memory_space<smem>>
    %357 = vector.broadcast %356 : f32 to vector<1x256xf32>
    %358 = arith.mulf %357, %351 : vector<1x256xf32>
    %359 = arith.addf %355, %358 : vector<1x256xf32>
    %360 = arith.mulf %359, %352 : vector<1x256xf32>
    %361 = arith.addf %349, %360 : vector<1x256xf32>
    %c511_i32 = arith.constant 511 : i32
    %362 = tpu.dynamic_rotate %36 by %c511_i32 dim 1 : vector<1x512xf32>, i32 -> vector<1x512xf32>
    %363 = vector.extract_strided_slice %362 {offsets = [0, 0], sizes = [1, 256], strides = [1, 1]} : vector<1x512xf32> to vector<1x256xf32>
    %364 = vector.extract_strided_slice %362 {offsets = [0, 256], sizes = [1, 256], strides = [1, 1]} : vector<1x512xf32> to vector<1x256xf32>
    %c25 = arith.constant 25 : index
    %c0_72 = arith.constant 0 : index
    %365 = vector.load %arg6[%c25, %c0_72] : memref<49x256xf32, #tpu.memory_space<vmem>>, vector<1x256xf32>
    %c25_73 = arith.constant 25 : index
    %366 = memref.load %arg7[%c25_73] : memref<98xf32, #tpu.memory_space<smem>>
    %367 = vector.broadcast %366 : f32 to vector<1x256xf32>
    %368 = arith.mulf %367, %363 : vector<1x256xf32>
    %c74 = arith.constant 74 : index
    %369 = memref.load %arg7[%c74] : memref<98xf32, #tpu.memory_space<smem>>
    %370 = vector.broadcast %369 : f32 to vector<1x256xf32>
    %371 = arith.mulf %370, %364 : vector<1x256xf32>
    %372 = arith.addf %368, %371 : vector<1x256xf32>
    %373 = arith.mulf %372, %365 : vector<1x256xf32>
    %374 = arith.addf %361, %373 : vector<1x256xf32>
    %c510_i32 = arith.constant 510 : i32
    %375 = tpu.dynamic_rotate %36 by %c510_i32 dim 1 : vector<1x512xf32>, i32 -> vector<1x512xf32>
    %376 = vector.extract_strided_slice %375 {offsets = [0, 0], sizes = [1, 256], strides = [1, 1]} : vector<1x512xf32> to vector<1x256xf32>
    %377 = vector.extract_strided_slice %375 {offsets = [0, 256], sizes = [1, 256], strides = [1, 1]} : vector<1x512xf32> to vector<1x256xf32>
    %c26 = arith.constant 26 : index
    %c0_74 = arith.constant 0 : index
    %378 = vector.load %arg6[%c26, %c0_74] : memref<49x256xf32, #tpu.memory_space<vmem>>, vector<1x256xf32>
    %c26_75 = arith.constant 26 : index
    %379 = memref.load %arg7[%c26_75] : memref<98xf32, #tpu.memory_space<smem>>
    %380 = vector.broadcast %379 : f32 to vector<1x256xf32>
    %381 = arith.mulf %380, %376 : vector<1x256xf32>
    %c75 = arith.constant 75 : index
    %382 = memref.load %arg7[%c75] : memref<98xf32, #tpu.memory_space<smem>>
    %383 = vector.broadcast %382 : f32 to vector<1x256xf32>
    %384 = arith.mulf %383, %377 : vector<1x256xf32>
    %385 = arith.addf %381, %384 : vector<1x256xf32>
    %386 = arith.mulf %385, %378 : vector<1x256xf32>
    %387 = arith.addf %374, %386 : vector<1x256xf32>
    %c509_i32 = arith.constant 509 : i32
    %388 = tpu.dynamic_rotate %36 by %c509_i32 dim 1 : vector<1x512xf32>, i32 -> vector<1x512xf32>
    %389 = vector.extract_strided_slice %388 {offsets = [0, 0], sizes = [1, 256], strides = [1, 1]} : vector<1x512xf32> to vector<1x256xf32>
    %390 = vector.extract_strided_slice %388 {offsets = [0, 256], sizes = [1, 256], strides = [1, 1]} : vector<1x512xf32> to vector<1x256xf32>
    %c27 = arith.constant 27 : index
    %c0_76 = arith.constant 0 : index
    %391 = vector.load %arg6[%c27, %c0_76] : memref<49x256xf32, #tpu.memory_space<vmem>>, vector<1x256xf32>
    %c27_77 = arith.constant 27 : index
    %392 = memref.load %arg7[%c27_77] : memref<98xf32, #tpu.memory_space<smem>>
    %393 = vector.broadcast %392 : f32 to vector<1x256xf32>
    %394 = arith.mulf %393, %389 : vector<1x256xf32>
    %c76 = arith.constant 76 : index
    %395 = memref.load %arg7[%c76] : memref<98xf32, #tpu.memory_space<smem>>
    %396 = vector.broadcast %395 : f32 to vector<1x256xf32>
    %397 = arith.mulf %396, %390 : vector<1x256xf32>
    %398 = arith.addf %394, %397 : vector<1x256xf32>
    %399 = arith.mulf %398, %391 : vector<1x256xf32>
    %400 = arith.addf %387, %399 : vector<1x256xf32>
    %c499_i32 = arith.constant 499 : i32
    %401 = tpu.dynamic_rotate %36 by %c499_i32 dim 1 : vector<1x512xf32>, i32 -> vector<1x512xf32>
    %402 = vector.extract_strided_slice %401 {offsets = [0, 0], sizes = [1, 256], strides = [1, 1]} : vector<1x512xf32> to vector<1x256xf32>
    %403 = vector.extract_strided_slice %401 {offsets = [0, 256], sizes = [1, 256], strides = [1, 1]} : vector<1x512xf32> to vector<1x256xf32>
    %c28 = arith.constant 28 : index
    %c0_78 = arith.constant 0 : index
    %404 = vector.load %arg6[%c28, %c0_78] : memref<49x256xf32, #tpu.memory_space<vmem>>, vector<1x256xf32>
    %c28_79 = arith.constant 28 : index
    %405 = memref.load %arg7[%c28_79] : memref<98xf32, #tpu.memory_space<smem>>
    %406 = vector.broadcast %405 : f32 to vector<1x256xf32>
    %407 = arith.mulf %406, %402 : vector<1x256xf32>
    %c77 = arith.constant 77 : index
    %408 = memref.load %arg7[%c77] : memref<98xf32, #tpu.memory_space<smem>>
    %409 = vector.broadcast %408 : f32 to vector<1x256xf32>
    %410 = arith.mulf %409, %403 : vector<1x256xf32>
    %411 = arith.addf %407, %410 : vector<1x256xf32>
    %412 = arith.mulf %411, %404 : vector<1x256xf32>
    %413 = arith.addf %400, %412 : vector<1x256xf32>
    %c498_i32 = arith.constant 498 : i32
    %414 = tpu.dynamic_rotate %36 by %c498_i32 dim 1 : vector<1x512xf32>, i32 -> vector<1x512xf32>
    %415 = vector.extract_strided_slice %414 {offsets = [0, 0], sizes = [1, 256], strides = [1, 1]} : vector<1x512xf32> to vector<1x256xf32>
    %416 = vector.extract_strided_slice %414 {offsets = [0, 256], sizes = [1, 256], strides = [1, 1]} : vector<1x512xf32> to vector<1x256xf32>
    %c29 = arith.constant 29 : index
    %c0_80 = arith.constant 0 : index
    %417 = vector.load %arg6[%c29, %c0_80] : memref<49x256xf32, #tpu.memory_space<vmem>>, vector<1x256xf32>
    %c29_81 = arith.constant 29 : index
    %418 = memref.load %arg7[%c29_81] : memref<98xf32, #tpu.memory_space<smem>>
    %419 = vector.broadcast %418 : f32 to vector<1x256xf32>
    %420 = arith.mulf %419, %415 : vector<1x256xf32>
    %c78 = arith.constant 78 : index
    %421 = memref.load %arg7[%c78] : memref<98xf32, #tpu.memory_space<smem>>
    %422 = vector.broadcast %421 : f32 to vector<1x256xf32>
    %423 = arith.mulf %422, %416 : vector<1x256xf32>
    %424 = arith.addf %420, %423 : vector<1x256xf32>
    %425 = arith.mulf %424, %417 : vector<1x256xf32>
    %426 = arith.addf %413, %425 : vector<1x256xf32>
    %c497_i32 = arith.constant 497 : i32
    %427 = tpu.dynamic_rotate %36 by %c497_i32 dim 1 : vector<1x512xf32>, i32 -> vector<1x512xf32>
    %428 = vector.extract_strided_slice %427 {offsets = [0, 0], sizes = [1, 256], strides = [1, 1]} : vector<1x512xf32> to vector<1x256xf32>
    %429 = vector.extract_strided_slice %427 {offsets = [0, 256], sizes = [1, 256], strides = [1, 1]} : vector<1x512xf32> to vector<1x256xf32>
    %c30 = arith.constant 30 : index
    %c0_82 = arith.constant 0 : index
    %430 = vector.load %arg6[%c30, %c0_82] : memref<49x256xf32, #tpu.memory_space<vmem>>, vector<1x256xf32>
    %c30_83 = arith.constant 30 : index
    %431 = memref.load %arg7[%c30_83] : memref<98xf32, #tpu.memory_space<smem>>
    %432 = vector.broadcast %431 : f32 to vector<1x256xf32>
    %433 = arith.mulf %432, %428 : vector<1x256xf32>
    %c79 = arith.constant 79 : index
    %434 = memref.load %arg7[%c79] : memref<98xf32, #tpu.memory_space<smem>>
    %435 = vector.broadcast %434 : f32 to vector<1x256xf32>
    %436 = arith.mulf %435, %429 : vector<1x256xf32>
    %437 = arith.addf %433, %436 : vector<1x256xf32>
    %438 = arith.mulf %437, %430 : vector<1x256xf32>
    %439 = arith.addf %426, %438 : vector<1x256xf32>
    %c496_i32 = arith.constant 496 : i32
    %440 = tpu.dynamic_rotate %36 by %c496_i32 dim 1 : vector<1x512xf32>, i32 -> vector<1x512xf32>
    %441 = vector.extract_strided_slice %440 {offsets = [0, 0], sizes = [1, 256], strides = [1, 1]} : vector<1x512xf32> to vector<1x256xf32>
    %442 = vector.extract_strided_slice %440 {offsets = [0, 256], sizes = [1, 256], strides = [1, 1]} : vector<1x512xf32> to vector<1x256xf32>
    %c31 = arith.constant 31 : index
    %c0_84 = arith.constant 0 : index
    %443 = vector.load %arg6[%c31, %c0_84] : memref<49x256xf32, #tpu.memory_space<vmem>>, vector<1x256xf32>
    %c31_85 = arith.constant 31 : index
    %444 = memref.load %arg7[%c31_85] : memref<98xf32, #tpu.memory_space<smem>>
    %445 = vector.broadcast %444 : f32 to vector<1x256xf32>
    %446 = arith.mulf %445, %441 : vector<1x256xf32>
    %c80 = arith.constant 80 : index
    %447 = memref.load %arg7[%c80] : memref<98xf32, #tpu.memory_space<smem>>
    %448 = vector.broadcast %447 : f32 to vector<1x256xf32>
    %449 = arith.mulf %448, %442 : vector<1x256xf32>
    %450 = arith.addf %446, %449 : vector<1x256xf32>
    %451 = arith.mulf %450, %443 : vector<1x256xf32>
    %452 = arith.addf %439, %451 : vector<1x256xf32>
    %c495_i32 = arith.constant 495 : i32
    %453 = tpu.dynamic_rotate %36 by %c495_i32 dim 1 : vector<1x512xf32>, i32 -> vector<1x512xf32>
    %454 = vector.extract_strided_slice %453 {offsets = [0, 0], sizes = [1, 256], strides = [1, 1]} : vector<1x512xf32> to vector<1x256xf32>
    %455 = vector.extract_strided_slice %453 {offsets = [0, 256], sizes = [1, 256], strides = [1, 1]} : vector<1x512xf32> to vector<1x256xf32>
    %c32 = arith.constant 32 : index
    %c0_86 = arith.constant 0 : index
    %456 = vector.load %arg6[%c32, %c0_86] : memref<49x256xf32, #tpu.memory_space<vmem>>, vector<1x256xf32>
    %c32_87 = arith.constant 32 : index
    %457 = memref.load %arg7[%c32_87] : memref<98xf32, #tpu.memory_space<smem>>
    %458 = vector.broadcast %457 : f32 to vector<1x256xf32>
    %459 = arith.mulf %458, %454 : vector<1x256xf32>
    %c81 = arith.constant 81 : index
    %460 = memref.load %arg7[%c81] : memref<98xf32, #tpu.memory_space<smem>>
    %461 = vector.broadcast %460 : f32 to vector<1x256xf32>
    %462 = arith.mulf %461, %455 : vector<1x256xf32>
    %463 = arith.addf %459, %462 : vector<1x256xf32>
    %464 = arith.mulf %463, %456 : vector<1x256xf32>
    %465 = arith.addf %452, %464 : vector<1x256xf32>
    %c494_i32 = arith.constant 494 : i32
    %466 = tpu.dynamic_rotate %36 by %c494_i32 dim 1 : vector<1x512xf32>, i32 -> vector<1x512xf32>
    %467 = vector.extract_strided_slice %466 {offsets = [0, 0], sizes = [1, 256], strides = [1, 1]} : vector<1x512xf32> to vector<1x256xf32>
    %468 = vector.extract_strided_slice %466 {offsets = [0, 256], sizes = [1, 256], strides = [1, 1]} : vector<1x512xf32> to vector<1x256xf32>
    %c33 = arith.constant 33 : index
    %c0_88 = arith.constant 0 : index
    %469 = vector.load %arg6[%c33, %c0_88] : memref<49x256xf32, #tpu.memory_space<vmem>>, vector<1x256xf32>
    %c33_89 = arith.constant 33 : index
    %470 = memref.load %arg7[%c33_89] : memref<98xf32, #tpu.memory_space<smem>>
    %471 = vector.broadcast %470 : f32 to vector<1x256xf32>
    %472 = arith.mulf %471, %467 : vector<1x256xf32>
    %c82 = arith.constant 82 : index
    %473 = memref.load %arg7[%c82] : memref<98xf32, #tpu.memory_space<smem>>
    %474 = vector.broadcast %473 : f32 to vector<1x256xf32>
    %475 = arith.mulf %474, %468 : vector<1x256xf32>
    %476 = arith.addf %472, %475 : vector<1x256xf32>
    %477 = arith.mulf %476, %469 : vector<1x256xf32>
    %478 = arith.addf %465, %477 : vector<1x256xf32>
    %c493_i32 = arith.constant 493 : i32
    %479 = tpu.dynamic_rotate %36 by %c493_i32 dim 1 : vector<1x512xf32>, i32 -> vector<1x512xf32>
    %480 = vector.extract_strided_slice %479 {offsets = [0, 0], sizes = [1, 256], strides = [1, 1]} : vector<1x512xf32> to vector<1x256xf32>
    %481 = vector.extract_strided_slice %479 {offsets = [0, 256], sizes = [1, 256], strides = [1, 1]} : vector<1x512xf32> to vector<1x256xf32>
    %c34 = arith.constant 34 : index
    %c0_90 = arith.constant 0 : index
    %482 = vector.load %arg6[%c34, %c0_90] : memref<49x256xf32, #tpu.memory_space<vmem>>, vector<1x256xf32>
    %c34_91 = arith.constant 34 : index
    %483 = memref.load %arg7[%c34_91] : memref<98xf32, #tpu.memory_space<smem>>
    %484 = vector.broadcast %483 : f32 to vector<1x256xf32>
    %485 = arith.mulf %484, %480 : vector<1x256xf32>
    %c83 = arith.constant 83 : index
    %486 = memref.load %arg7[%c83] : memref<98xf32, #tpu.memory_space<smem>>
    %487 = vector.broadcast %486 : f32 to vector<1x256xf32>
    %488 = arith.mulf %487, %481 : vector<1x256xf32>
    %489 = arith.addf %485, %488 : vector<1x256xf32>
    %490 = arith.mulf %489, %482 : vector<1x256xf32>
    %491 = arith.addf %478, %490 : vector<1x256xf32>
    %c483_i32 = arith.constant 483 : i32
    %492 = tpu.dynamic_rotate %36 by %c483_i32 dim 1 : vector<1x512xf32>, i32 -> vector<1x512xf32>
    %493 = vector.extract_strided_slice %492 {offsets = [0, 0], sizes = [1, 256], strides = [1, 1]} : vector<1x512xf32> to vector<1x256xf32>
    %494 = vector.extract_strided_slice %492 {offsets = [0, 256], sizes = [1, 256], strides = [1, 1]} : vector<1x512xf32> to vector<1x256xf32>
    %c35 = arith.constant 35 : index
    %c0_92 = arith.constant 0 : index
    %495 = vector.load %arg6[%c35, %c0_92] : memref<49x256xf32, #tpu.memory_space<vmem>>, vector<1x256xf32>
    %c35_93 = arith.constant 35 : index
    %496 = memref.load %arg7[%c35_93] : memref<98xf32, #tpu.memory_space<smem>>
    %497 = vector.broadcast %496 : f32 to vector<1x256xf32>
    %498 = arith.mulf %497, %493 : vector<1x256xf32>
    %c84 = arith.constant 84 : index
    %499 = memref.load %arg7[%c84] : memref<98xf32, #tpu.memory_space<smem>>
    %500 = vector.broadcast %499 : f32 to vector<1x256xf32>
    %501 = arith.mulf %500, %494 : vector<1x256xf32>
    %502 = arith.addf %498, %501 : vector<1x256xf32>
    %503 = arith.mulf %502, %495 : vector<1x256xf32>
    %504 = arith.addf %491, %503 : vector<1x256xf32>
    %c482_i32 = arith.constant 482 : i32
    %505 = tpu.dynamic_rotate %36 by %c482_i32 dim 1 : vector<1x512xf32>, i32 -> vector<1x512xf32>
    %506 = vector.extract_strided_slice %505 {offsets = [0, 0], sizes = [1, 256], strides = [1, 1]} : vector<1x512xf32> to vector<1x256xf32>
    %507 = vector.extract_strided_slice %505 {offsets = [0, 256], sizes = [1, 256], strides = [1, 1]} : vector<1x512xf32> to vector<1x256xf32>
    %c36 = arith.constant 36 : index
    %c0_94 = arith.constant 0 : index
    %508 = vector.load %arg6[%c36, %c0_94] : memref<49x256xf32, #tpu.memory_space<vmem>>, vector<1x256xf32>
    %c36_95 = arith.constant 36 : index
    %509 = memref.load %arg7[%c36_95] : memref<98xf32, #tpu.memory_space<smem>>
    %510 = vector.broadcast %509 : f32 to vector<1x256xf32>
    %511 = arith.mulf %510, %506 : vector<1x256xf32>
    %c85 = arith.constant 85 : index
    %512 = memref.load %arg7[%c85] : memref<98xf32, #tpu.memory_space<smem>>
    %513 = vector.broadcast %512 : f32 to vector<1x256xf32>
    %514 = arith.mulf %513, %507 : vector<1x256xf32>
    %515 = arith.addf %511, %514 : vector<1x256xf32>
    %516 = arith.mulf %515, %508 : vector<1x256xf32>
    %517 = arith.addf %504, %516 : vector<1x256xf32>
    %c481_i32 = arith.constant 481 : i32
    %518 = tpu.dynamic_rotate %36 by %c481_i32 dim 1 : vector<1x512xf32>, i32 -> vector<1x512xf32>
    %519 = vector.extract_strided_slice %518 {offsets = [0, 0], sizes = [1, 256], strides = [1, 1]} : vector<1x512xf32> to vector<1x256xf32>
    %520 = vector.extract_strided_slice %518 {offsets = [0, 256], sizes = [1, 256], strides = [1, 1]} : vector<1x512xf32> to vector<1x256xf32>
    %c37 = arith.constant 37 : index
    %c0_96 = arith.constant 0 : index
    %521 = vector.load %arg6[%c37, %c0_96] : memref<49x256xf32, #tpu.memory_space<vmem>>, vector<1x256xf32>
    %c37_97 = arith.constant 37 : index
    %522 = memref.load %arg7[%c37_97] : memref<98xf32, #tpu.memory_space<smem>>
    %523 = vector.broadcast %522 : f32 to vector<1x256xf32>
    %524 = arith.mulf %523, %519 : vector<1x256xf32>
    %c86 = arith.constant 86 : index
    %525 = memref.load %arg7[%c86] : memref<98xf32, #tpu.memory_space<smem>>
    %526 = vector.broadcast %525 : f32 to vector<1x256xf32>
    %527 = arith.mulf %526, %520 : vector<1x256xf32>
    %528 = arith.addf %524, %527 : vector<1x256xf32>
    %529 = arith.mulf %528, %521 : vector<1x256xf32>
    %530 = arith.addf %517, %529 : vector<1x256xf32>
    %c480_i32 = arith.constant 480 : i32
    %531 = tpu.dynamic_rotate %36 by %c480_i32 dim 1 : vector<1x512xf32>, i32 -> vector<1x512xf32>
    %532 = vector.extract_strided_slice %531 {offsets = [0, 0], sizes = [1, 256], strides = [1, 1]} : vector<1x512xf32> to vector<1x256xf32>
    %533 = vector.extract_strided_slice %531 {offsets = [0, 256], sizes = [1, 256], strides = [1, 1]} : vector<1x512xf32> to vector<1x256xf32>
    %c38 = arith.constant 38 : index
    %c0_98 = arith.constant 0 : index
    %534 = vector.load %arg6[%c38, %c0_98] : memref<49x256xf32, #tpu.memory_space<vmem>>, vector<1x256xf32>
    %c38_99 = arith.constant 38 : index
    %535 = memref.load %arg7[%c38_99] : memref<98xf32, #tpu.memory_space<smem>>
    %536 = vector.broadcast %535 : f32 to vector<1x256xf32>
    %537 = arith.mulf %536, %532 : vector<1x256xf32>
    %c87 = arith.constant 87 : index
    %538 = memref.load %arg7[%c87] : memref<98xf32, #tpu.memory_space<smem>>
    %539 = vector.broadcast %538 : f32 to vector<1x256xf32>
    %540 = arith.mulf %539, %533 : vector<1x256xf32>
    %541 = arith.addf %537, %540 : vector<1x256xf32>
    %542 = arith.mulf %541, %534 : vector<1x256xf32>
    %543 = arith.addf %530, %542 : vector<1x256xf32>
    %c479_i32 = arith.constant 479 : i32
    %544 = tpu.dynamic_rotate %36 by %c479_i32 dim 1 : vector<1x512xf32>, i32 -> vector<1x512xf32>
    %545 = vector.extract_strided_slice %544 {offsets = [0, 0], sizes = [1, 256], strides = [1, 1]} : vector<1x512xf32> to vector<1x256xf32>
    %546 = vector.extract_strided_slice %544 {offsets = [0, 256], sizes = [1, 256], strides = [1, 1]} : vector<1x512xf32> to vector<1x256xf32>
    %c39 = arith.constant 39 : index
    %c0_100 = arith.constant 0 : index
    %547 = vector.load %arg6[%c39, %c0_100] : memref<49x256xf32, #tpu.memory_space<vmem>>, vector<1x256xf32>
    %c39_101 = arith.constant 39 : index
    %548 = memref.load %arg7[%c39_101] : memref<98xf32, #tpu.memory_space<smem>>
    %549 = vector.broadcast %548 : f32 to vector<1x256xf32>
    %550 = arith.mulf %549, %545 : vector<1x256xf32>
    %c88 = arith.constant 88 : index
    %551 = memref.load %arg7[%c88] : memref<98xf32, #tpu.memory_space<smem>>
    %552 = vector.broadcast %551 : f32 to vector<1x256xf32>
    %553 = arith.mulf %552, %546 : vector<1x256xf32>
    %554 = arith.addf %550, %553 : vector<1x256xf32>
    %555 = arith.mulf %554, %547 : vector<1x256xf32>
    %556 = arith.addf %543, %555 : vector<1x256xf32>
    %c478_i32 = arith.constant 478 : i32
    %557 = tpu.dynamic_rotate %36 by %c478_i32 dim 1 : vector<1x512xf32>, i32 -> vector<1x512xf32>
    %558 = vector.extract_strided_slice %557 {offsets = [0, 0], sizes = [1, 256], strides = [1, 1]} : vector<1x512xf32> to vector<1x256xf32>
    %559 = vector.extract_strided_slice %557 {offsets = [0, 256], sizes = [1, 256], strides = [1, 1]} : vector<1x512xf32> to vector<1x256xf32>
    %c40 = arith.constant 40 : index
    %c0_102 = arith.constant 0 : index
    %560 = vector.load %arg6[%c40, %c0_102] : memref<49x256xf32, #tpu.memory_space<vmem>>, vector<1x256xf32>
    %c40_103 = arith.constant 40 : index
    %561 = memref.load %arg7[%c40_103] : memref<98xf32, #tpu.memory_space<smem>>
    %562 = vector.broadcast %561 : f32 to vector<1x256xf32>
    %563 = arith.mulf %562, %558 : vector<1x256xf32>
    %c89 = arith.constant 89 : index
    %564 = memref.load %arg7[%c89] : memref<98xf32, #tpu.memory_space<smem>>
    %565 = vector.broadcast %564 : f32 to vector<1x256xf32>
    %566 = arith.mulf %565, %559 : vector<1x256xf32>
    %567 = arith.addf %563, %566 : vector<1x256xf32>
    %568 = arith.mulf %567, %560 : vector<1x256xf32>
    %569 = arith.addf %556, %568 : vector<1x256xf32>
    %c477_i32 = arith.constant 477 : i32
    %570 = tpu.dynamic_rotate %36 by %c477_i32 dim 1 : vector<1x512xf32>, i32 -> vector<1x512xf32>
    %571 = vector.extract_strided_slice %570 {offsets = [0, 0], sizes = [1, 256], strides = [1, 1]} : vector<1x512xf32> to vector<1x256xf32>
    %572 = vector.extract_strided_slice %570 {offsets = [0, 256], sizes = [1, 256], strides = [1, 1]} : vector<1x512xf32> to vector<1x256xf32>
    %c41 = arith.constant 41 : index
    %c0_104 = arith.constant 0 : index
    %573 = vector.load %arg6[%c41, %c0_104] : memref<49x256xf32, #tpu.memory_space<vmem>>, vector<1x256xf32>
    %c41_105 = arith.constant 41 : index
    %574 = memref.load %arg7[%c41_105] : memref<98xf32, #tpu.memory_space<smem>>
    %575 = vector.broadcast %574 : f32 to vector<1x256xf32>
    %576 = arith.mulf %575, %571 : vector<1x256xf32>
    %c90 = arith.constant 90 : index
    %577 = memref.load %arg7[%c90] : memref<98xf32, #tpu.memory_space<smem>>
    %578 = vector.broadcast %577 : f32 to vector<1x256xf32>
    %579 = arith.mulf %578, %572 : vector<1x256xf32>
    %580 = arith.addf %576, %579 : vector<1x256xf32>
    %581 = arith.mulf %580, %573 : vector<1x256xf32>
    %582 = arith.addf %569, %581 : vector<1x256xf32>
    %c467_i32 = arith.constant 467 : i32
    %583 = tpu.dynamic_rotate %36 by %c467_i32 dim 1 : vector<1x512xf32>, i32 -> vector<1x512xf32>
    %584 = vector.extract_strided_slice %583 {offsets = [0, 0], sizes = [1, 256], strides = [1, 1]} : vector<1x512xf32> to vector<1x256xf32>
    %585 = vector.extract_strided_slice %583 {offsets = [0, 256], sizes = [1, 256], strides = [1, 1]} : vector<1x512xf32> to vector<1x256xf32>
    %c42 = arith.constant 42 : index
    %c0_106 = arith.constant 0 : index
    %586 = vector.load %arg6[%c42, %c0_106] : memref<49x256xf32, #tpu.memory_space<vmem>>, vector<1x256xf32>
    %c42_107 = arith.constant 42 : index
    %587 = memref.load %arg7[%c42_107] : memref<98xf32, #tpu.memory_space<smem>>
    %588 = vector.broadcast %587 : f32 to vector<1x256xf32>
    %589 = arith.mulf %588, %584 : vector<1x256xf32>
    %c91 = arith.constant 91 : index
    %590 = memref.load %arg7[%c91] : memref<98xf32, #tpu.memory_space<smem>>
    %591 = vector.broadcast %590 : f32 to vector<1x256xf32>
    %592 = arith.mulf %591, %585 : vector<1x256xf32>
    %593 = arith.addf %589, %592 : vector<1x256xf32>
    %594 = arith.mulf %593, %586 : vector<1x256xf32>
    %595 = arith.addf %582, %594 : vector<1x256xf32>
    %c466_i32 = arith.constant 466 : i32
    %596 = tpu.dynamic_rotate %36 by %c466_i32 dim 1 : vector<1x512xf32>, i32 -> vector<1x512xf32>
    %597 = vector.extract_strided_slice %596 {offsets = [0, 0], sizes = [1, 256], strides = [1, 1]} : vector<1x512xf32> to vector<1x256xf32>
    %598 = vector.extract_strided_slice %596 {offsets = [0, 256], sizes = [1, 256], strides = [1, 1]} : vector<1x512xf32> to vector<1x256xf32>
    %c43 = arith.constant 43 : index
    %c0_108 = arith.constant 0 : index
    %599 = vector.load %arg6[%c43, %c0_108] : memref<49x256xf32, #tpu.memory_space<vmem>>, vector<1x256xf32>
    %c43_109 = arith.constant 43 : index
    %600 = memref.load %arg7[%c43_109] : memref<98xf32, #tpu.memory_space<smem>>
    %601 = vector.broadcast %600 : f32 to vector<1x256xf32>
    %602 = arith.mulf %601, %597 : vector<1x256xf32>
    %c92 = arith.constant 92 : index
    %603 = memref.load %arg7[%c92] : memref<98xf32, #tpu.memory_space<smem>>
    %604 = vector.broadcast %603 : f32 to vector<1x256xf32>
    %605 = arith.mulf %604, %598 : vector<1x256xf32>
    %606 = arith.addf %602, %605 : vector<1x256xf32>
    %607 = arith.mulf %606, %599 : vector<1x256xf32>
    %608 = arith.addf %595, %607 : vector<1x256xf32>
    %c465_i32 = arith.constant 465 : i32
    %609 = tpu.dynamic_rotate %36 by %c465_i32 dim 1 : vector<1x512xf32>, i32 -> vector<1x512xf32>
    %610 = vector.extract_strided_slice %609 {offsets = [0, 0], sizes = [1, 256], strides = [1, 1]} : vector<1x512xf32> to vector<1x256xf32>
    %611 = vector.extract_strided_slice %609 {offsets = [0, 256], sizes = [1, 256], strides = [1, 1]} : vector<1x512xf32> to vector<1x256xf32>
    %c44 = arith.constant 44 : index
    %c0_110 = arith.constant 0 : index
    %612 = vector.load %arg6[%c44, %c0_110] : memref<49x256xf32, #tpu.memory_space<vmem>>, vector<1x256xf32>
    %c44_111 = arith.constant 44 : index
    %613 = memref.load %arg7[%c44_111] : memref<98xf32, #tpu.memory_space<smem>>
    %614 = vector.broadcast %613 : f32 to vector<1x256xf32>
    %615 = arith.mulf %614, %610 : vector<1x256xf32>
    %c93 = arith.constant 93 : index
    %616 = memref.load %arg7[%c93] : memref<98xf32, #tpu.memory_space<smem>>
    %617 = vector.broadcast %616 : f32 to vector<1x256xf32>
    %618 = arith.mulf %617, %611 : vector<1x256xf32>
    %619 = arith.addf %615, %618 : vector<1x256xf32>
    %620 = arith.mulf %619, %612 : vector<1x256xf32>
    %621 = arith.addf %608, %620 : vector<1x256xf32>
    %c464_i32 = arith.constant 464 : i32
    %622 = tpu.dynamic_rotate %36 by %c464_i32 dim 1 : vector<1x512xf32>, i32 -> vector<1x512xf32>
    %623 = vector.extract_strided_slice %622 {offsets = [0, 0], sizes = [1, 256], strides = [1, 1]} : vector<1x512xf32> to vector<1x256xf32>
    %624 = vector.extract_strided_slice %622 {offsets = [0, 256], sizes = [1, 256], strides = [1, 1]} : vector<1x512xf32> to vector<1x256xf32>
    %c45 = arith.constant 45 : index
    %c0_112 = arith.constant 0 : index
    %625 = vector.load %arg6[%c45, %c0_112] : memref<49x256xf32, #tpu.memory_space<vmem>>, vector<1x256xf32>
    %c45_113 = arith.constant 45 : index
    %626 = memref.load %arg7[%c45_113] : memref<98xf32, #tpu.memory_space<smem>>
    %627 = vector.broadcast %626 : f32 to vector<1x256xf32>
    %628 = arith.mulf %627, %623 : vector<1x256xf32>
    %c94 = arith.constant 94 : index
    %629 = memref.load %arg7[%c94] : memref<98xf32, #tpu.memory_space<smem>>
    %630 = vector.broadcast %629 : f32 to vector<1x256xf32>
    %631 = arith.mulf %630, %624 : vector<1x256xf32>
    %632 = arith.addf %628, %631 : vector<1x256xf32>
    %633 = arith.mulf %632, %625 : vector<1x256xf32>
    %634 = arith.addf %621, %633 : vector<1x256xf32>
    %c463_i32 = arith.constant 463 : i32
    %635 = tpu.dynamic_rotate %36 by %c463_i32 dim 1 : vector<1x512xf32>, i32 -> vector<1x512xf32>
    %636 = vector.extract_strided_slice %635 {offsets = [0, 0], sizes = [1, 256], strides = [1, 1]} : vector<1x512xf32> to vector<1x256xf32>
    %637 = vector.extract_strided_slice %635 {offsets = [0, 256], sizes = [1, 256], strides = [1, 1]} : vector<1x512xf32> to vector<1x256xf32>
    %c46 = arith.constant 46 : index
    %c0_114 = arith.constant 0 : index
    %638 = vector.load %arg6[%c46, %c0_114] : memref<49x256xf32, #tpu.memory_space<vmem>>, vector<1x256xf32>
    %c46_115 = arith.constant 46 : index
    %639 = memref.load %arg7[%c46_115] : memref<98xf32, #tpu.memory_space<smem>>
    %640 = vector.broadcast %639 : f32 to vector<1x256xf32>
    %641 = arith.mulf %640, %636 : vector<1x256xf32>
    %c95 = arith.constant 95 : index
    %642 = memref.load %arg7[%c95] : memref<98xf32, #tpu.memory_space<smem>>
    %643 = vector.broadcast %642 : f32 to vector<1x256xf32>
    %644 = arith.mulf %643, %637 : vector<1x256xf32>
    %645 = arith.addf %641, %644 : vector<1x256xf32>
    %646 = arith.mulf %645, %638 : vector<1x256xf32>
    %647 = arith.addf %634, %646 : vector<1x256xf32>
    %c462_i32 = arith.constant 462 : i32
    %648 = tpu.dynamic_rotate %36 by %c462_i32 dim 1 : vector<1x512xf32>, i32 -> vector<1x512xf32>
    %649 = vector.extract_strided_slice %648 {offsets = [0, 0], sizes = [1, 256], strides = [1, 1]} : vector<1x512xf32> to vector<1x256xf32>
    %650 = vector.extract_strided_slice %648 {offsets = [0, 256], sizes = [1, 256], strides = [1, 1]} : vector<1x512xf32> to vector<1x256xf32>
    %c47 = arith.constant 47 : index
    %c0_116 = arith.constant 0 : index
    %651 = vector.load %arg6[%c47, %c0_116] : memref<49x256xf32, #tpu.memory_space<vmem>>, vector<1x256xf32>
    %c47_117 = arith.constant 47 : index
    %652 = memref.load %arg7[%c47_117] : memref<98xf32, #tpu.memory_space<smem>>
    %653 = vector.broadcast %652 : f32 to vector<1x256xf32>
    %654 = arith.mulf %653, %649 : vector<1x256xf32>
    %c96 = arith.constant 96 : index
    %655 = memref.load %arg7[%c96] : memref<98xf32, #tpu.memory_space<smem>>
    %656 = vector.broadcast %655 : f32 to vector<1x256xf32>
    %657 = arith.mulf %656, %650 : vector<1x256xf32>
    %658 = arith.addf %654, %657 : vector<1x256xf32>
    %659 = arith.mulf %658, %651 : vector<1x256xf32>
    %660 = arith.addf %647, %659 : vector<1x256xf32>
    %c461_i32 = arith.constant 461 : i32
    %661 = tpu.dynamic_rotate %36 by %c461_i32 dim 1 : vector<1x512xf32>, i32 -> vector<1x512xf32>
    %662 = vector.extract_strided_slice %661 {offsets = [0, 0], sizes = [1, 256], strides = [1, 1]} : vector<1x512xf32> to vector<1x256xf32>
    %663 = vector.extract_strided_slice %661 {offsets = [0, 256], sizes = [1, 256], strides = [1, 1]} : vector<1x512xf32> to vector<1x256xf32>
    %c48 = arith.constant 48 : index
    %c0_118 = arith.constant 0 : index
    %664 = vector.load %arg6[%c48, %c0_118] : memref<49x256xf32, #tpu.memory_space<vmem>>, vector<1x256xf32>
    %c48_119 = arith.constant 48 : index
    %665 = memref.load %arg7[%c48_119] : memref<98xf32, #tpu.memory_space<smem>>
    %666 = vector.broadcast %665 : f32 to vector<1x256xf32>
    %667 = arith.mulf %666, %662 : vector<1x256xf32>
    %c97 = arith.constant 97 : index
    %668 = memref.load %arg7[%c97] : memref<98xf32, #tpu.memory_space<smem>>
    %669 = vector.broadcast %668 : f32 to vector<1x256xf32>
    %670 = arith.mulf %669, %663 : vector<1x256xf32>
    %671 = arith.addf %667, %670 : vector<1x256xf32>
    %672 = arith.mulf %671, %664 : vector<1x256xf32>
    %673 = arith.addf %660, %672 : vector<1x256xf32>
    %c0_120 = arith.constant 0 : index
    %c0_121 = arith.constant 0 : index
    %c0_122 = arith.constant 0 : index
    %674 = vector.load %arg8[%c0_120, %c0_121, %c0_122] : memref<1x32x1xf32, #tpu.memory_space<vmem>>, vector<1x32x1xf32>
    %675 = vector.shape_cast %674 : vector<1x32x1xf32> to vector<32x1xf32>
    %676 = vector.shape_cast %27 : vector<32x1xf32> to vector<1x32x1xf32>
    tpu.vector_store %arg8[%c0_120, %c0_121, %c0_122], %676 {strides = array<i32>} : memref<1x32x1xf32, #tpu.memory_space<vmem>>, vector<1x32x1xf32>,
    %c0_123 = arith.constant 0 : index
    %c0_124 = arith.constant 0 : index
    %c0_125 = arith.constant 0 : index
    %677 = vector.load %arg9[%c0_123, %c0_124, %c0_125] : memref<1x1x256xf32, #tpu.memory_space<vmem>>, vector<1x1x256xf32>
    %678 = vector.shape_cast %677 : vector<1x1x256xf32> to vector<1x256xf32>
    %679 = vector.shape_cast %673 : vector<1x256xf32> to vector<1x1x256xf32>
    tpu.vector_store %arg9[%c0_123, %c0_124, %c0_125], %679 {strides = array<i32>} : memref<1x1x256xf32, #tpu.memory_space<vmem>>, vector<1x1x256xf32>,
    return
  }
  func.func @transform_0(%arg0: i32) -> (i32, i32, i32) {
    %c0_i32 = arith.constant 0 : i32
    %c0_i32_0 = arith.constant 0 : i32
    %c0_i32_1 = arith.constant 0 : i32
    return %arg0, %c0_i32, %c0_i32_0 : i32, i32, i32
  }
  func.func @transform_1(%arg0: i32) -> (i32, i32) {
    %c0_i32 = arith.constant 0 : i32
    %c0_i32_0 = arith.constant 0 : i32
    %c0_i32_1 = arith.constant 0 : i32
    return %c0_i32, %c0_i32_0 : i32, i32
  }
  func.func @transform_2(%arg0: i32) -> (i32, i32) {
    %c0_i32 = arith.constant 0 : i32
    %c0_i32_0 = arith.constant 0 : i32
    %c0_i32_1 = arith.constant 0 : i32
    return %c0_i32, %c0_i32_0 : i32, i32
  }
  func.func @transform_3(%arg0: i32) -> (i32, i32) {
    %c0_i32 = arith.constant 0 : i32
    %c0_i32_0 = arith.constant 0 : i32
    %c0_i32_1 = arith.constant 0 : i32
    return %c0_i32, %c0_i32_0 : i32, i32
  }
  func.func @transform_4(%arg0: i32) -> (i32, i32) {
    %c0_i32 = arith.constant 0 : i32
    %c0_i32_0 = arith.constant 0 : i32
    %c0_i32_1 = arith.constant 0 : i32
    return %c0_i32, %c0_i32_0 : i32, i32
  }
  func.func @transform_5(%arg0: i32) -> (i32, i32) {
    %c0_i32 = arith.constant 0 : i32
    %c0_i32_0 = arith.constant 0 : i32
    %c0_i32_1 = arith.constant 0 : i32
    return %c0_i32, %c0_i32_0 : i32, i32
  }
  func.func @transform_6(%arg0: i32) -> i32 {
    %c0_i32 = arith.constant 0 : i32
    %c0_i32_0 = arith.constant 0 : i32
    return %c0_i32 : i32
  }
  func.func @transform_7(%arg0: i32) -> (i32, i32, i32) {
    %c0_i32 = arith.constant 0 : i32
    %c0_i32_0 = arith.constant 0 : i32
    %c0_i32_1 = arith.constant 0 : i32
    return %arg0, %c0_i32, %c0_i32_0 : i32, i32, i32
  }
  func.func @transform_8(%arg0: i32) -> (i32, i32, i32) {
    %c0_i32 = arith.constant 0 : i32
    %c0_i32_0 = arith.constant 0 : i32
    %c0_i32_1 = arith.constant 0 : i32
    return %arg0, %c0_i32, %c0_i32_0 : i32, i32, i32
  }
}

module attributes {stable_mosaic.version = 11 : i64} {
  func.func @_cbam_stage2_kernel(%arg0: i32, %arg1: memref<2xf32, #tpu.memory_space<smem>>, %arg2: memref<1x32x256xf32, #tpu.memory_space<vmem>>, %arg3: memref<1x32x1xf32, #tpu.memory_space<vmem>>, %arg4: memref<1x1x256xf32, #tpu.memory_space<vmem>>, %arg5: memref<1x32x256xf32, #tpu.memory_space<vmem>>) attributes {dimension_semantics = [#tpu.dimension_semantics<parallel>], iteration_bounds = array<i64: 2>, scalar_prefetch = 0 : i64, scratch_operands = 0 : i64, tpu.core_type = #tpu.core_type<tc>, window_params = [{transform_indices = @transform_0, window_bounds = array<i64: 2>}, {transform_indices = @transform_1, window_bounds = array<i64: 1, 32, 256>}, {transform_indices = @transform_2, window_bounds = array<i64: 1, 32, 1>}, {transform_indices = @transform_3, window_bounds = array<i64: 1, 1, 256>}, {transform_indices = @transform_4, window_bounds = array<i64: 1, 32, 256>}]} {
    %c0 = arith.constant 0 : index
    %0 = memref.load %arg1[%c0] : memref<2xf32, #tpu.memory_space<smem>>
    %c1 = arith.constant 1 : index
    %1 = memref.load %arg1[%c1] : memref<2xf32, #tpu.memory_space<smem>>
    %c0_0 = arith.constant 0 : index
    %c0_1 = arith.constant 0 : index
    %c0_2 = arith.constant 0 : index
    %2 = vector.load %arg4[%c0_0, %c0_1, %c0_2] : memref<1x1x256xf32, #tpu.memory_space<vmem>>, vector<1x1x256xf32>
    %3 = vector.shape_cast %2 : vector<1x1x256xf32> to vector<1x256xf32>
    %4 = vector.broadcast %0 : f32 to vector<1x256xf32>
    %5 = arith.mulf %3, %4 : vector<1x256xf32>
    %6 = vector.broadcast %1 : f32 to vector<1x256xf32>
    %7 = arith.addf %5, %6 : vector<1x256xf32>
    %cst = arith.constant 0.000000e+00 : f32
    %8 = vector.broadcast %cst : f32 to vector<1x256xf32>
    %9 = arith.maximumf %7, %8 : vector<1x256xf32>
    %10 = arith.negf %9 : vector<1x256xf32>
    %11 = math.exp %10 : vector<1x256xf32>
    %cst_3 = arith.constant 1.000000e+00 : f32
    %12 = vector.broadcast %cst_3 : f32 to vector<1x256xf32>
    %13 = arith.addf %12, %11 : vector<1x256xf32>
    %14 = arith.divf %12, %13 : vector<1x256xf32>
    %c0_4 = arith.constant 0 : index
    %c0_5 = arith.constant 0 : index
    %c0_6 = arith.constant 0 : index
    %15 = vector.load %arg2[%c0_4, %c0_5, %c0_6] : memref<1x32x256xf32, #tpu.memory_space<vmem>>, vector<1x32x256xf32>
    %16 = vector.shape_cast %15 : vector<1x32x256xf32> to vector<32x256xf32>
    %c0_7 = arith.constant 0 : index
    %c0_8 = arith.constant 0 : index
    %c0_9 = arith.constant 0 : index
    %17 = vector.load %arg3[%c0_7, %c0_8, %c0_9] : memref<1x32x1xf32, #tpu.memory_space<vmem>>, vector<1x32x1xf32>
    %18 = vector.shape_cast %17 : vector<1x32x1xf32> to vector<32x1xf32>
    %19 = vector.broadcast %18 : vector<32x1xf32> to vector<32x256xf32>
    %20 = arith.mulf %16, %19 : vector<32x256xf32>
    %21 = vector.broadcast %14 : vector<1x256xf32> to vector<32x256xf32>
    %22 = arith.mulf %20, %21 : vector<32x256xf32>
    %c0_10 = arith.constant 0 : index
    %c0_11 = arith.constant 0 : index
    %c0_12 = arith.constant 0 : index
    %23 = vector.load %arg5[%c0_10, %c0_11, %c0_12] : memref<1x32x256xf32, #tpu.memory_space<vmem>>, vector<1x32x256xf32>
    %24 = vector.shape_cast %23 : vector<1x32x256xf32> to vector<32x256xf32>
    %25 = vector.shape_cast %22 : vector<32x256xf32> to vector<1x32x256xf32>
    tpu.vector_store %arg5[%c0_10, %c0_11, %c0_12], %25 {strides = array<i32>} : memref<1x32x256xf32, #tpu.memory_space<vmem>>, vector<1x32x256xf32>,
    return
  }
  func.func @transform_0(%arg0: i32) -> i32 {
    %c0_i32 = arith.constant 0 : i32
    %c0_i32_0 = arith.constant 0 : i32
    return %c0_i32 : i32
  }
  func.func @transform_1(%arg0: i32) -> (i32, i32, i32) {
    %c0_i32 = arith.constant 0 : i32
    %c0_i32_0 = arith.constant 0 : i32
    %c0_i32_1 = arith.constant 0 : i32
    return %arg0, %c0_i32, %c0_i32_0 : i32, i32, i32
  }
  func.func @transform_2(%arg0: i32) -> (i32, i32, i32) {
    %c0_i32 = arith.constant 0 : i32
    %c0_i32_0 = arith.constant 0 : i32
    %c0_i32_1 = arith.constant 0 : i32
    return %arg0, %c0_i32, %c0_i32_0 : i32, i32, i32
  }
  func.func @transform_3(%arg0: i32) -> (i32, i32, i32) {
    %c0_i32 = arith.constant 0 : i32
    %c0_i32_0 = arith.constant 0 : i32
    %c0_i32_1 = arith.constant 0 : i32
    return %arg0, %c0_i32, %c0_i32_0 : i32, i32, i32
  }
  func.func @transform_4(%arg0: i32) -> (i32, i32, i32) {
    %c0_i32 = arith.constant 0 : i32
    %c0_i32_0 = arith.constant 0 : i32
    %c0_i32_1 = arith.constant 0 : i32
    return %arg0, %c0_i32, %c0_i32_0 : i32, i32, i32
  }
}

</mosaic_0001>

<bundles_post_ra>
// kernel: cbam_pallas.3
= control target key start
LH: loop header
LB: loop body
LE: loop exit
PB: predicated region body
PF: predicated region fallthrough
CT: control target
= control target key end

     0   :  { %9 = vsyncpa [#allocation3], 0  ;;  %s522_s15 = smov 0   ;;  %s564_s0 = inlined_call_operand.vmem [shape: f32[2], index: 0, kind: input, shape index: {}]   ;;  %s565_s1 = inlined_call_operand.vmem [shape: f32[2,32,256], index: 1, kind: input, shape index: {}]   ;;  %s566_s2 = inlined_call_operand.vmem [shape: f32[2,32,1], index: 2, kind: input, shape index: {}]   ;;  %s567_s3 = inlined_call_operand.vmem [shape: f32[2,1,256], index: 3, kind: input, shape index: {}]   ;;  %s568_s4 = inlined_call_operand.vmem [shape: f32[2,32,256], index: 4, kind: output, shape index: {}]  }
   0x1 LB: > { %s421_s16 = sadd.s32 4294967295, %s493_s15   ;;  %p423_p0 = scmp.ge.s32.totalorder %s493_s15, 1  ;;  %s493_s15 = sphi %s522_s15, %s15_s15  }
   0x2   : > { %p145_p1 = scmp.lt.s32.totalorder %s493_s15, 3  ;;  %s158_s19 = sshll.u32 %s564_s0, 4  ;;  %s159_s19 = int_to_ptr.vmem [resolvable:$true] %s158_s19 }
   0x3   : > { %p450_p3 = scmp.eq.s32.totalorder %s421_s16, 0  ;;  %s468_s21 = scalar_lea.vmem %s159_s19, 16 }
   0x4   : > { %p533_p2 = pnand %p423_p0, %p145_p1  ;;  %p469_p6 = scmp.ne.s32.totalorder %s159_s19, %s468_s21 }
   0x5   : > { %p476_p10 = scmp.lt.s32.totalorder %s159_s19, %s159_s19  ;;  %p477_p11 = scmp.lt.s32.totalorder %s468_s21, %s468_s21 }
   0x6   : > { %p446_p4 = pneg %p533_p2 }
   0x7   : > { %p478_p12 = por %p477_p11, %p476_p10 }
   0x8   : > { %p447_p5 = pnand %p450_p3, %p446_p4 }
   0xa   : > { %p470_p7 = pneg %p447_p5 }
   0xc   : > { %p471_p8 = pnand %p470_p7, %p469_p6 }
   0xe   : > { %p472_p9 = pneg %p471_p8 }
  0x10   : > { %p479_p13 = pnand %p478_p12, %p472_p9 }
  0x12   : > { %482 = shalt.err (!%p479_p13)
}
  0x13   : > { %s495_s22 = smov [#allocation2]   ;;  %194 = sbr.rel (%p533_p2) target bundleno = 167 (0xa7), region = 36 }
  0x14   : > { %449 = dma.vmem_to_smem (!%p447_p5), %s159_s19, 16, %s495_s22, [#allocation3]  }
  0x18   : > { %488 = dma.done.wait (%p450_p3), [#allocation3], 16  }
  0x19   : > { %490 = vsyncadd (%p450_p3), [#allocation3], 4294967280 }
  0x1a   : > { %200 = sfence }
  0x1b   : > { %p230_p0 = scmp.lt.s32.totalorder %s421_s16, 1  ;;  %v496_v0 = vmov 0   ;;  %s249_s27 = sld [smem:[#allocation2]]  ;;  %v304_v14 = vlaneseq }
  0x1c   : > { %463 = vset.pattern.permute.xlu1 %v496_v0  ;;  %462 = vset.pattern.permute.xlu0 %v496_v0  ;;  %s435_s29 = sld [smem:[#allocation2 + $0x1]] }
  0x1d   : > { %s571_s16 = smov (!%p230_p0, %s421_s16), 1  ;;  %v305_v15 = vshrl.u32 %v304_v14, 7 }
  0x1e   : > { %s440_s23 = sshll.u32 %s571_s16, 5  ;;  %s432_s28 = sshll.u32 %s571_s16, 1 }
  0x1f   : > { %s239_s26 = scalar_lea.vmem %s566_s2, %s440_s23  ;;  %s243_s6 = scalar_lea.vmem %s567_s3, %s432_s28  ;;  %v306_v16 = vsub.s32 0, %v305_v15  ;;  %v310_v17 = vsub.s32 1, %v305_v15 }
  0x20   : > { %v273_v1 = vld [vmem:[%s239_s26 + $0x10] sm:$0xff]  ;;  %v271_v2 = vld [vmem:[%s239_s26] sm:$0xff]  ;;  %v274_v3 = vld [vmem:[%s239_s26 + $0x18] sm:$0xff]  ;;  %s439_s7 = sshll.u32 %s571_s16, 6 }
  0x21   : > { %287 = vperm.xlu1 %463, %v273_v1   ;;  %277 = vperm.xlu0 %462, %v271_v2   ;;  %v272_v4 = vld [vmem:[%s239_s26 + $0x8] sm:$0xff]  ;;  %v251_v5 = vld [vmem:[%s243_s6] sm:$0x3]  ;;  %v252_v6 = vstv %s249_s27  ;;  %s234_s10 = scalar_lea.vmem %s565_s1, %s439_s7  ;;  %s248_s13 = scalar_lea.vmem %s568_s4, %s439_s7 }
  0x22   : > { %v253_v7 = vmul.f32 %v252_v6, %v251_v5  ;;  %v254_v8 = vstv %s435_s29  ;;  %v267_v19 = vld [vmem:[%s234_s10 + $0x20] sm:$0xff]  ;;  %v268_v20 = vld [vmem:[%s234_s10 + $0x28] sm:$0xff]  ;;  %v269_v31 = vld [vmem:[%s234_s10 + $0x30] sm:$0xff] }
  0x23   : > { %v263_v21 = vld [vmem:[%s234_s10] sm:$0xff]  ;;  %v264_v22 = vld [vmem:[%s234_s10 + $0x8] sm:$0xff]  ;;  %v270_v32 = vld [vmem:[%s234_s10 + $0x38] sm:$0xff] }
  0x24   : > { %v255_v9 = vadd.f32 %v254_v8, %v253_v7  ;;  %v265_v33 = vld [vmem:[%s234_s10 + $0x10] sm:$0xff]  ;;  %v266_v34 = vld [vmem:[%s234_s10 + $0x18] sm:$0xff] }
  0x25   : > { %292 = vperm.xlu1 %463, %v274_v3   ;;  %282 = vperm.xlu0 %462, %v272_v4  }
  0x26   : > { %v256_v10 = vmax.f32 %v255_v9, 0.0 }
  0x28   : > { %v436_v11 = vmul.f32 -1.442695, %v256_v10 }
  0x2a   : > { %464 = vpow2.f32 %v436_v11 }
  0x37   : > { %v465_v12 = vpop.eup %464 }
  0x38   : > { %v260_v13 = vadd.f32 1.0, %v465_v12 }
  0x3a   : > { %466 = vrcp.f32 %v260_v13 }
  0x47   : > { %v467_v18 = vpop.eup %466 }
  0x48   : > { %v307_v23 = vrot.slane %v467_v18, %v306_v16  ;;  %v311_v24 = vrot.slane %v467_v18, %v310_v17 }
  0x9c   : > { %v288_v25 = vpop.permute.xlu1 %287  ;;  %v278_v26 = vpop.permute.xlu0 %277 }
  0x9d   : > { %v299_v27 = vmul.f32 %v288_v25, %v267_v19  ;;  %v300_v28 = vmul.f32 %v288_v25, %v268_v20  ;;  %v295_v29 = vmul.f32 %v278_v26, %v263_v21  ;;  %v296_v30 = vmul.f32 %v278_v26, %v264_v22 }
  0x9f   : > { %v318_v35 = vmul.f32 %v307_v23, %v299_v27  ;;  %v319_v36 = vmul.f32 %v311_v24, %v300_v28  ;;  %v314_v37 = vmul.f32 %v307_v23, %v295_v29  ;;  %v315_v38 = vmul.f32 %v311_v24, %v296_v30 }
  0xa0   : > { %v293_v39 = vpop.permute.xlu1 %292  ;;  %v283_v40 = vpop.permute.xlu0 %282 }
  0xa1   : > { %326 = vst [vmem:[%s248_s13 + $0x20] sm:$0xff] %v318_v35  ;;  %327 = vst [vmem:[%s248_s13 + $0x28] sm:$0xff] %v319_v36  ;;  %v301_v41 = vmul.f32 %v293_v39, %v269_v31  ;;  %v302_v42 = vmul.f32 %v293_v39, %v270_v32  ;;  %v297_v43 = vmul.f32 %v283_v40, %v265_v33 }
  0xa2   : > { %322 = vst [vmem:[%s248_s13] sm:$0xff] %v314_v37  ;;  %323 = vst [vmem:[%s248_s13 + $0x8] sm:$0xff] %v315_v38  ;;  %v298_v44 = vmul.f32 %v283_v40, %v266_v34 }
  0xa3   : > { %v320_v45 = vmul.f32 %v307_v23, %v301_v41  ;;  %v321_v46 = vmul.f32 %v311_v24, %v302_v42  ;;  %v316_v47 = vmul.f32 %v307_v23, %v297_v43 }
  0xa4   : > { %v317_v48 = vmul.f32 %v311_v24, %v298_v44 }
  0xa5   : > { %328 = vst [vmem:[%s248_s13 + $0x30] sm:$0xff] %v320_v45  ;;  %329 = vst [vmem:[%s248_s13 + $0x38] sm:$0xff] %v321_v46 }
  0xa6   : > { %324 = vst [vmem:[%s248_s13 + $0x10] sm:$0xff] %v316_v47  ;;  %325 = vst [vmem:[%s248_s13 + $0x18] sm:$0xff] %v317_v48 }
  0xa7 PF: > { %s15_s15 = sadd.s32 1, %s493_s15  }
  0xa8   : > { %p12_p1 = scmp.ge.s32.totalorder %s15_s15, 4  }
  0xaa   :  { %14 = sbr.rel (!%p12_p1) target bundleno = 1 (0x1), region = 77 }
  0xaf   :  { %351 = vsyncpa [#allocation3], 1 }
  0xb0   :  { %353 = vsyncpa [#allocation3 + $0x1], 1 }

// kernel: cbam_pallas.2
= control target key start
LH: loop header
LB: loop body
LE: loop exit
PB: predicated region body
PF: predicated region fallthrough
CT: control target
= control target key end

     0   :  { %s6093_s0 = inlined_call_operand.vmem [shape: f32[2,32,256], index: 0, kind: input, shape index: {}]   ;;  %s6094_s1 = inlined_call_operand.vmem [shape: f32[2,32], index: 1, kind: input, shape index: {}]   ;;  %s6095_s2 = inlined_call_operand.vmem [shape: f32[2,1], index: 2, kind: input, shape index: {}]   ;;  %s6096_s3 = inlined_call_operand.vmem [shape: f32[32,2], index: 3, kind: input, shape index: {}]   ;;  %s6097_s4 = inlined_call_operand.vmem [shape: f32[32,1], index: 4, kind: input, shape index: {}]   ;;  %s6098_s5 = inlined_call_operand.vmem [shape: f32[49,256], index: 5, kind: input, shape index: {}]   ;;  %s6099_s6 = inlined_call_operand.vmem [shape: f32[98], index: 6, kind: input, shape index: {}]   ;;  %s6100_s7 = inlined_call_operand.vmem [shape: f32[2,32,1], index: 7, kind: output, shape index: {0}]   ;;  %s6101_s8 = inlined_call_operand.vmem [shape: f32[2,1,256], index: 8, kind: output, shape index: {1}]  }
   0x1   :  { %6391 = sst [smem:[#allocation147_spill]] %s6093_s0 }
   0x2   :  { %6392 = sst [smem:[#allocation148_spill]] %s6094_s1 }
   0x3   :  { %6393 = sst [smem:[#allocation149_spill]] %s6095_s2 }
   0x4   :  { %6394 = sst [smem:[#allocation150_spill]] %s6096_s3 }
   0x5   :  { %6395 = sst [smem:[#allocation151_spill]] %s6097_s4 }
   0x6   :  { %6396 = sst [smem:[#allocation152_spill]] %s6098_s5 }
   0x7   :  { %6397 = sst [smem:[#allocation153_spill]] %s6099_s6 }
   0x8   :  { %6398 = sst [smem:[#allocation154_spill]] %s6100_s7 }
   0x9   :  { %6399 = sst [smem:[#allocation155_spill]] %s6101_s8 }
   0xa   :  { %14 = vsyncpa [#allocation3], 0  ;;  %s3153_s27 = smov 0  }
   0xb LB: > { %6400 = sst [smem:[#allocation5_spill]] %s3053_s27  ;;  %s2739_s28 = sadd.s32 4294967295, %s3053_s27   ;;  %s3053_s27 = sphi %s3153_s27, %s20_s27  }
   0xc   : > { %p2741_p0 = scmp.ge.s32.totalorder %s3053_s27, 1  ;;  %p229_p1 = scmp.lt.s32.totalorder %s3053_s27, 3 }
   0xd   : > { %s6401_s6 = sld [smem:[#allocation153_spill]]  ;;  %p2947_p3 = scmp.eq.s32.totalorder %s2739_s28, 0 }
   0xe   : > { %p3164_p2 = pnand %p2741_p0, %p229_p1 }
  0x10   : > { %p2943_p4 = pneg %p3164_p2 }
  0x12   : > { %p2944_p5 = pnand %p2947_p3, %p2943_p4 }
  0x13   : > { %s257_s9 = sshll.u32 %s6401_s6, 4  ;;  %s258_s9 = int_to_ptr.vmem [resolvable:$true] %s257_s9 }
  0x14   : > { %s3028_s11 = scalar_lea.vmem %s258_s9, 16  ;;  %p3030_p7 = pneg %p2944_p5 }
  0x15   : > { %p3029_p6 = scmp.ne.s32.totalorder %s258_s9, %s3028_s11  ;;  %p3036_p10 = scmp.lt.s32.totalorder %s258_s9, %s258_s9 }
  0x16   : > { %p3037_p11 = scmp.lt.s32.totalorder %s3028_s11, %s3028_s11 }
  0x17   : > { %p3031_p8 = pnand %p3030_p7, %p3029_p6 }
  0x18   : > { %p3038_p12 = por %p3037_p11, %p3036_p10 }
  0x19   : > { %p3032_p9 = pneg %p3031_p8 }
  0x1b   : > { %p3039_p13 = pnand %p3038_p12, %p3032_p9 }
  0x1d   : > { %3042 = shalt.err (!%p3039_p13)
}
  0x1e   : > { %s3055_s12 = smov [#allocation2]   ;;  %278 = sbr.rel (%p3164_p2) target bundleno = 1366 (0x556), region = 48 }
  0x1f   : > { %2946 = dma.vmem_to_smem (!%p2944_p5), %s258_s9, 16, %s3055_s12, [#allocation3]  }
  0x23   : > { %3048 = dma.done.wait (%p2947_p3), [#allocation3], 16  }
  0x24   : > { %3050 = vsyncadd (%p2947_p3), [#allocation3], 4294967280 }
  0x25   : > { %284 = sfence }
  0x26   : > { %p317_p0 = scmp.lt.s32.totalorder %s2739_s28, 1  ;;  %s6404_s0 = sld [smem:[#allocation147_spill]]  ;;  %v3056_v16 = vmov 0.0   ;;  %vm3057_vm0 = vmmov 0   ;;  %v3058_v17 = vmov 0   ;;  %vm367_vm1 = vcmask 7168  }
  0x27   : > { %2920 = vmatprep.subr.mxu0 %v3056_v16  ;;  %2928 = vmatprep.mubr.msk.f32.mxu0 %vm3057_vm0, %v3056_v16  ;;  %s6405_s2 = sld [smem:[#allocation149_spill]]  ;;  %vm379_vm2 = vcmask 261120   ;;  %vm482_vm3 = vcmask 15360   ;;  %vm495_vm4 = vcmask 1041408   ;;  %s3059_s21 = smov 51  }
  0x28   : > { %s7162_s28 = smov (!%p317_p0, %s2739_s28), 1  ;;  %3010 = vset.pattern.permute.xlu0 %v3058_v17  ;;  %3011 = vset.pattern.permute.xlu1 %v3058_v17  ;;  %s6406_s1 = sld [smem:[#allocation148_spill]] }
  0x29   : > { %6403 = sst [smem:[#allocation6_spill]] %s7162_s28  ;;  %s2908_s13 = sshll.u32 %s7162_s28, 6 }
  0x2a   : > { %s6407_s3 = sld [smem:[#allocation150_spill]]  ;;  %s2909_s17 = sshll.u32 %s7162_s28, 5 }
  0x2b   : > { %s6408_s4 = sld [smem:[#allocation151_spill]]  ;;  %s3060_s22 = smov 50  }
  0x2c   : > { %s321_s16 = scalar_lea.vmem %s6404_s0, %s2908_s13  ;;  %s6409_s7 = sld [smem:[#allocation154_spill]] }
  0x2d   : > { %v3181_v0 = vld [vmem:[%s321_s16 + $0x30] sm:$0xff]  ;;  %v3183_v1 = vld [vmem:[%s321_s16 + $0x38] sm:$0xff]  ;;  %v3185_v2 = vld [vmem:[%s321_s16 + $0x20] sm:$0xff]  ;;  %s3061_s23 = smov 49   ;;  %s3062_s24 = smov 48  }
  0x2e   : > { %v364_v3 = vmax.f32 %v3181_v0, %v3183_v1  ;;  %v348_v4 = vadd.f32 %v3183_v1, %v3181_v0  ;;  %v3191_v5 = vld [vmem:[%s321_s16 + $0x28] sm:$0xff]  ;;  %v3193_v6 = vld [vmem:[%s321_s16 + $0x10] sm:$0xff]  ;;  %v3195_v7 = vld [vmem:[%s321_s16 + $0x18] sm:$0xff]  ;;  %s3063_s25 = smov 47   ;;  %s3064_s26 = smov 46  }
  0x2f   : > { %v345_v8 = vadd.f32 %v3191_v5, %v3185_v2  ;;  %v342_v9 = vadd.f32 %v3195_v7, %v3193_v6  ;;  %v3201_v10 = vld [vmem:[%s321_s16] sm:$0xff]  ;;  %v3203_v11 = vld [vmem:[%s321_s16 + $0x8] sm:$0xff]  ;;  %v361_v12 = vmax.f32 %v3185_v2, %v3191_v5  ;;  %v358_v14 = vmax.f32 %v3193_v6, %v3195_v7  ;;  %s3065_s29 = smov 45   ;;  %s3066_s30 = smov 35  }
  0x30   : > { %365 = vmax.xlane.f32.xlu1 %v364_v3  ;;  %349 = vadd.xlane.f32.xlu0 %v348_v4  ;;  %v339_v13 = vadd.f32 %v3203_v11, %v3201_v10  ;;  %v355_v15 = vmax.f32 %v3201_v10, %v3203_v11  ;;  %v373_v18 = vld [vmem:[%s6405_s2] sm:$0x3]  ;;  %v455_v46 = vld [vmem:[%s6407_s3 + $0x8] sm:$0xff]  ;;  %v456_v47 = vld [vmem:[%s6407_s3 + $0x10] sm:$0xff]  ;;  %s3067_s9 = smov 34   ;;  %s3068_s10 = smov 33  }
  0x31   : > { %v372_v34 = vld [vmem:[%s6406_s1] sm:$0x3]  ;;  %v459_v38 = vld [vmem:[%s6408_s4 + $0x8] sm:$0xff]  ;;  %v460_v39 = vld [vmem:[%s6408_s4 + $0x10] sm:$0xff]  ;;  %s3069_s11 = smov 32   ;;  %s3070_s12 = smov 31  }
  0x32   : > { %v454_v36 = vld [vmem:[%s6407_s3] sm:$0xff]  ;;  %v461_v40 = vld [vmem:[%s6408_s4 + $0x18] sm:$0xff]  ;;  %s326_s20 = scalar_lea.vmem %s6409_s7, %s2909_s17  ;;  %s3071_s13 = smov 30  }
  0x33   : > { %2933 = vmatprep.mubr.msk.f32.mxu1 %vm482_vm3, %v454_v36  ;;  %v458_v37 = vld [vmem:[%s6408_s4] sm:$0xff]  ;;  %v457_v48 = vld [vmem:[%s6407_s3 + $0x18] sm:$0xff]  ;;  %s3072_s14 = smov 29   ;;  %s3073_s15 = smov 19  }
  0x34   : > { %346 = vadd.xlane.f32.xlu0 %v345_v8  ;;  %343 = vadd.xlane.f32.xlu1 %v342_v9  ;;  %s3074_s16 = smov 18   ;;  %s6102_s17 = smov 17  }
  0x35   : > { %s6104_s18 = smov 16   ;;  %s6106_s19 = smov 15  }
  0x36   : > { %s3745_s0 = sld [smem:[#allocation2 + $0xf]]  ;;  %s6487_s2 = smov 13  }
  0x37   : > { %s3747_s1 = sld [smem:[#allocation2 + $0x10]]  ;;  %s6493_s7 = smov 3  }
  0x38   : > { %362 = vmax.xlane.f32.xlu0 %v361_v12  ;;  %340 = vadd.xlane.f32.xlu1 %v339_v13  ;;  %s3753_s3 = sld [smem:[#allocation2 + $0x11]] }
  0x39   : > { %s3761_s4 = sld [smem:[#allocation2 + $0x13]] }
  0x3a   : > { %s3763_s6 = sld [smem:[#allocation2 + $0x14]] }
  0x3b   : > { %s3771_s27 = sld [smem:[#allocation2 + $0x16]] }
  0x3c   : > { %359 = vmax.xlane.f32.xlu0 %v358_v14  ;;  %356 = vmax.xlane.f32.xlu1 %v355_v15  ;;  %6485 = sst [smem:[#allocation78_spill]] %s3745_s0 }
  0x3d   : > { %6486 = sst [smem:[#allocation79_spill]] %s3747_s1 }
  0x3e   : > { %6488 = sst [smem:[#allocation80_spill]] %s3753_s3 }
  0x3f   : > { %s3777_s8 = sld [smem:[#allocation2 + $0x17]] }
  0x40   : > { %6492 = sst [smem:[#allocation84_spill]] %s3763_s6  ;;  %s6500_s6 = smov 2  }
  0x41   : > { %6494 = sst [smem:[#allocation85_spill]] %s3771_s27 }
  0x42   : > { %s3782_s28 = sld [smem:[#allocation2 + $0x19]] }
  0x43   : > { %s3791_s27 = sld [smem:[#allocation2 + $0x1b]] }
  0x44   : > { %s6509_s5 = sld [smem:[#allocation152_spill]] }
  0x45   : > { %6497 = sst [smem:[#allocation88_spill]] %s3777_s8 }
  0x46   : > { %s3798_s8 = sld [smem:[#allocation2 + $0x1c]] }
  0x47   : > { %s3910_s0 = sld [smem:[#allocation2 + $0x2a]] }
  0x48   : > { %6499 = sst [smem:[#allocation90_spill]] %s3782_s28 }
  0x49   : > { %6502 = sst [smem:[#allocation92_spill]] %s3791_s27 }
  0x4a   : > { %s3820_s27 = sld [smem:[#allocation2 + $0x1e]] }
  0x4b   : > { %s3916_s1 = sld [smem:[#allocation2 + $0x2b]] }
  0x4c   : > { %6505 = sst [smem:[#allocation95_spill]] %s3798_s8 }
  0x4d   : > { %464 = vperm.xlu1 %3011, %v458_v37   ;;  %s3834_s8 = sld [smem:[#allocation2 + $0x21]] }
  0x4e   : > { %6537 = sst [smem:[#allocation116_spill]] %s3910_s0 }
  0x4f   : > { %s3974_s3 = sld [smem:[#allocation2 + $0x2f]] }
  0x50   : > { %6510 = sst [smem:[#allocation97_spill]] %s3820_s27 }
  0x51   : > { %469 = vperm.xlu1 %3011, %v459_v38   ;;  %6540 = sst [smem:[#allocation117_spill]] %s3916_s1 }
  0x52   : > { %376 = vperm.xlu0 %3010, %v373_v18   ;;  %s3959_s27 = sld [smem:[#allocation2 + $0x2e]] }
  0x53   : > { %6515 = sst [smem:[#allocation102_spill]] %s3834_s8 }
  0x54   : > { %s3848_s8 = sld [smem:[#allocation2 + $0x23]] }
  0x55   : > { %474 = vperm.xlu1 %3011, %v460_v39   ;;  %6551 = sst [smem:[#allocation123_spill]] %s3974_s3 }
  0x56   : > { %s6580_s0 = sld [smem:[#allocation78_spill]] }
  0x58   : > { %6548 = sst [smem:[#allocation122_spill]] %s3959_s27 }
  0x59   : > { %479 = vperm.xlu1 %3011, %v461_v40   ;;  %s4126_s27 = sld [smem:[#allocation2 + $0x36]] }
  0x5a   : > { %6518 = sst [smem:[#allocation104_spill]] %s3848_s8 }
  0x5b   : > { %s3866_s8 = sld [smem:[#allocation2 + $0x25]] }
  0x61   : > { %6524 = sst [smem:[#allocation110_spill]] %s3866_s8 }
  0x62   : > { %s3883_s8 = sld [smem:[#allocation2 + $0x27]] }
  0x68   : > { %6527 = sst [smem:[#allocation112_spill]] %s3883_s8  ;;  %s6604_s8 = smov 110  }
  0xb9   : > { %v366_v19 = vpop.xlane.xlu1 %365  ;;  %v350_v20 = vpop.xlane.xlu0 %349 }
  0xba   : > { %v354_v21 = vmul.f32 0.00390625, %v350_v20 }
  0xbc   : > { %v371_v22 = vsel %vm367_vm1, %v354_v21, %v366_v19 }
  0xbd   : > { %2921 = vmatpush3.msra.mxu0 %v371_v22  ;;  %v347_v23 = vpop.xlane.xlu0 %346  ;;  %v344_v24 = vpop.xlane.xlu1 %343 }
  0xbe   : > { %2922 = vmatprep.subr.mxu0 %v3056_v16  ;;  %v353_v25 = vmul.f32 0.00390625, %v347_v23  ;;  %v352_v29 = vmul.f32 0.00390625, %v344_v24 }
  0xc1   : > { %v363_v26 = vpop.xlane.xlu0 %362  ;;  %v341_v27 = vpop.xlane.xlu1 %340 }
  0xc2   : > { %v370_v28 = vsel %vm367_vm1, %v353_v25, %v363_v26  ;;  %v351_v30 = vmul.f32 0.00390625, %v341_v27 }
  0xc3   : > { %2923 = vmatpush3.msra.mxu0 %v370_v28 }
  0xc4   : > { %2924 = vmatprep.subr.mxu0 %v3056_v16 }
  0xc5   : > { %v360_v31 = vpop.xlane.xlu0 %359  ;;  %v357_v32 = vpop.xlane.xlu1 %356 }
  0xc6   : > { %v369_v33 = vsel %vm367_vm1, %v352_v29, %v360_v31  ;;  %v368_v35 = vsel %vm367_vm1, %v351_v30, %v357_v32 }
  0xc7   : > { %2925 = vmatpush3.msra.mxu0 %v369_v33 }
  0xc8   : > { %2926 = vmatprep.subr.mxu0 %v3056_v16 }
  0xc9   : > { %2927 = vmatpush3.msra.mxu0 %v368_v35  ;;  %v465_v49 = vpop.permute.xlu1 %464 }
  0xca   : > { %2929 = vmatmul.mubr.msk.f32.vlgmr.msra.gmra.mxu0 %vm379_vm2, %v372_v34 }
  0xcd   : > { %v377_v41 = vpop.permute.xlu0 %376  ;;  %v470_v50 = vpop.permute.xlu1 %469 }
  0xd1   : > { %v475_v51 = vpop.permute.xlu1 %474 }
  0xd5   : > { %v480_v57 = vpop.permute.xlu1 %479 }
 0x18a   : > { %v449_v42 = vpop.f32.mrf.mxu0 }
 0x18b   : > { %v450_v43 = vadd.f32 %v449_v42, %v377_v41 }
 0x18c   : > { %v2930_v44 = vpop.f32.mrf.mxu0 }
 0x18d   : > { %v453_v45 = vmax.f32 %v450_v43, 0.0 }
 0x18f   : > { %2931 = vmatprep.subr.msk.mxu1 %vm495_vm4, %v453_v45 }
 0x190   : > { %2932 = vmatpush3.msk.msra.mxu1 %vm495_vm4, %v453_v45 }
 0x191   : > { %2934 = vmatmul.mubr.msk.f32.vlgmr.msra.gmra.mxu1 %vm482_vm3, %v455_v46 }
 0x192   : > { %2936 = vmatprep.mubr.msk.f32.mxu1 %vm482_vm3, %v456_v47 }
 0x195   : > { %2937 = vmatmul.mubr.msk.f32.gmra.mxu1 %vm482_vm3, %v457_v48 }
 0x251   : > { %v2935_v52 = vpop.f32.mrf.mxu1 }
 0x252   : > { %v571_v53 = vadd.f32 %v2935_v52, %v470_v50 }
 0x253   : > { %v565_v54 = vpop.f32.mrf.mxu1 }
 0x254   : > { %v566_v55 = vadd.f32 %v565_v54, %v465_v49  ;;  %v587_v56 = vsel %vm482_vm3, %v571_v53, 0.0 }
 0x255   : > { %v2938_v58 = vpop.f32.mrf.mxu1  ;;  %588 = vadd.xlane.f32.xlu0 %v587_v56 }
 0x256   : > { %v581_v59 = vadd.f32 %v2938_v58, %v480_v57  ;;  %v584_v60 = vsel %vm482_vm3, %v566_v55, 0.0 }
 0x257   : > { %v575_v61 = vpop.f32.mrf.mxu1  ;;  %585 = vadd.xlane.f32.xlu1 %v584_v60 }
 0x258   : > { %v576_v62 = vadd.f32 %v575_v61, %v475_v51  ;;  %v593_v63 = vsel %vm482_vm3, %v581_v59, 0.0 }
 0x25a   : > { %v590_v3 = vsel %vm482_vm3, %v576_v62, 0.0 }
 0x25b   : > { %594 = vadd.xlane.f32.xlu1 %v593_v63 }
 0x25f   : > { %591 = vadd.xlane.f32.xlu1 %v590_v3 }
 0x2de   : > { %v589_v4 = vpop.xlane.xlu0 %588 }
 0x2df   : > { %v2758_v8 = vmul.f32 -1.442695, %v589_v4 }
 0x2e0   : > { %v586_v9 = vpop.xlane.xlu1 %585 }
 0x2e1   : > { %3012 = vpow2.f32 %v2758_v8  ;;  %v2757_v12 = vmul.f32 -1.442695, %v586_v9 }
 0x2e3   : > { %3014 = vpow2.f32 %v2757_v12 }
 0x2e4   : > { %v595_v13 = vpop.xlane.xlu1 %594 }
 0x2e5   : > { %v2760_v14 = vmul.f32 -1.442695, %v595_v13 }
 0x2e7   : > { %3016 = vpow2.f32 %v2760_v14 }
 0x2e8   : > { %v592_v15 = vpop.xlane.xlu1 %591 }
 0x2e9   : > { %v2759_v16 = vmul.f32 -1.442695, %v592_v15 }
 0x2eb   : > { %3018 = vpow2.f32 %v2759_v16 }
 0x2ee   : > { %v3013_v17 = vpop.eup %3012 }
 0x2ef   : > { %v609_v18 = vadd.f32 1.0, %v3013_v17 }
 0x2f0   : > { %v3015_v19 = vpop.eup %3014 }
 0x2f1   : > { %3020 = vrcp.f32 %v609_v18  ;;  %v608_v20 = vadd.f32 1.0, %v3015_v19 }
 0x2f3   : > { %3022 = vrcp.f32 %v608_v20 }
 0x2f4   : > { %v3017_v21 = vpop.eup %3016 }
 0x2f5   : > { %v611_v22 = vadd.f32 1.0, %v3017_v21 }
 0x2f7   : > { %3024 = vrcp.f32 %v611_v22 }
 0x2f8   : > { %v3019_v23 = vpop.eup %3018 }
 0x2f9   : > { %v610_v24 = vadd.f32 1.0, %v3019_v23 }
 0x2fb   : > { %3026 = vrcp.f32 %v610_v24 }
 0x2fe   : > { %v3021_v25 = vpop.eup %3020 }
 0x2ff   : > { %2615 = vst.msk [vmem:[%s326_s20 + $0x8] sm:$0xff] %vm367_vm1, %v3021_v25  ;;  %v622_v27 = vmul.f32 %v3021_v25, %v3193_v6  ;;  %v623_v28 = vmul.f32 %v3021_v25, %v3195_v7 }
 0x300   : > { %v3023_v26 = vpop.eup %3022 }
 0x301   : > { %v620_v29 = vmul.f32 %v3023_v26, %v3201_v10  ;;  %v621_v30 = vmul.f32 %v3023_v26, %v3203_v11  ;;  %2614 = vst.msk [vmem:[%s326_s20] sm:$0xff] %vm367_vm1, %v3023_v26 }
 0x303   : > { %v646_v31 = vadd.f32 %v622_v27, %v620_v29  ;;  %v655_v32 = vadd.f32 %v623_v28, %v621_v30 }
 0x304   : > { %v3025_v33 = vpop.eup %3024 }
 0x305   : > { %2617 = vst.msk [vmem:[%s326_s20 + $0x18] sm:$0xff] %vm367_vm1, %v3025_v33  ;;  %v626_v34 = vmul.f32 %v3025_v33, %v3181_v0  ;;  %v627_v35 = vmul.f32 %v3025_v33, %v3183_v1 }
 0x307   : > { %v629_v10 = vmax.f32 %v622_v27, %v626_v34  ;;  %v638_v11 = vmax.f32 %v623_v28, %v627_v35 }
 0x308   : > { %v3027_v36 = vpop.eup %3026 }
 0x309   : > { %v624_v6 = vmul.f32 %v3027_v36, %v3185_v2  ;;  %v625_v7 = vmul.f32 %v3027_v36, %v3191_v5  ;;  %2616 = vst.msk [vmem:[%s326_s20 + $0x10] sm:$0xff] %vm367_vm1, %v3027_v36  ;;  %s6108_s20 = smov 14  }
 0x30b   : > { %v628_v37 = vmax.f32 %v620_v29, %v624_v6  ;;  %v637_v38 = vmax.f32 %v621_v30, %v625_v7  ;;  %v647_v39 = vadd.f32 %v646_v31, %v624_v6  ;;  %v656_v40 = vadd.f32 %v655_v32, %v625_v7 }
 0x30d   : > { %v630_v41 = vmax.f32 %v628_v37, %v629_v10  ;;  %v639_v42 = vmax.f32 %v637_v38, %v638_v11  ;;  %v3271_v43 = vadd.f32 %v647_v39, %v626_v34  ;;  %v3273_v0 = vadd.f32 %v656_v40, %v627_v35 }
 0x30f   : > { %v631_v1 = vrot.slane %v630_v41, 4  ;;  %v640_v44 = vrot.slane %v639_v42, 4  ;;  %v649_v23 = vrot.slane %v3271_v43, 4  ;;  %v658_v27 = vrot.slane %v3273_v0, 4 }
 0x311   : > { %v632_v45 = vmax.f32 %v630_v41, %v631_v1  ;;  %v641_v2 = vmax.f32 %v639_v42, %v640_v44  ;;  %v650_v26 = vadd.f32 %v649_v23, %v3271_v43  ;;  %v659_v31 = vadd.f32 %v658_v27, %v3273_v0 }
 0x313   : > { %v633_v46 = vrot.slane %v632_v45, 2  ;;  %v642_v5 = vrot.slane %v641_v2, 2  ;;  %v651_v30 = vrot.slane %v650_v26, 2  ;;  %v660_v35 = vrot.slane %v659_v31, 2 }
 0x315   : > { %v634_v47 = vmax.f32 %v632_v45, %v633_v46  ;;  %v643_v48 = vmax.f32 %v641_v2, %v642_v5  ;;  %v652_v34 = vadd.f32 %v651_v30, %v650_v26  ;;  %v661_v10 = vadd.f32 %v660_v35, %v659_v31 }
 0x317   : > { %v635_v49 = vrot.slane %v634_v47, 1  ;;  %v644_v50 = vrot.slane %v643_v48, 1  ;;  %v653_v7 = vrot.slane %v652_v34, 1  ;;  %v662_v39 = vrot.slane %v661_v10, 1 }
 0x319   : > { %v3275_v51 = vmax.f32 %v634_v47, %v635_v49  ;;  %v3277_v52 = vmax.f32 %v643_v48, %v644_v50  ;;  %v654_v38 = vadd.f32 %v653_v7, %v652_v34  ;;  %v663_v42 = vadd.f32 %v662_v39, %v661_v10 }
 0x31b   : > { %668 = vrot.lane.b32.xlu0 %v3277_v52, %s3059_s21  ;;  %666 = vrot.lane.b32.xlu1 %v3275_v51, %s3059_s21  ;;  %v3551_v43 = vmul.f32 0.03125, %v654_v38  ;;  %v3561_v44 = vmul.f32 0.03125, %v663_v42 }
 0x31f   : > { %707 = vrot.lane.b32.xlu0 %v3275_v51, %s3060_s22  ;;  %709 = vrot.lane.b32.xlu1 %v3277_v52, %s3060_s22 }
 0x323   : > { %747 = vrot.lane.b32.xlu0 %v3275_v51, %s3061_s23  ;;  %749 = vrot.lane.b32.xlu1 %v3277_v52, %s3061_s23 }
 0x327   : > { %787 = vrot.lane.b32.xlu0 %v3275_v51, %s3062_s24  ;;  %789 = vrot.lane.b32.xlu1 %v3277_v52, %s3062_s24 }
 0x32b   : > { %827 = vrot.lane.b32.xlu0 %v3275_v51, %s3063_s25  ;;  %829 = vrot.lane.b32.xlu1 %v3277_v52, %s3063_s25 }
 0x32f   : > { %867 = vrot.lane.b32.xlu0 %v3275_v51, %s3064_s26  ;;  %869 = vrot.lane.b32.xlu1 %v3277_v52, %s3064_s26 }
 0x333   : > { %907 = vrot.lane.b32.xlu0 %v3275_v51, %s3065_s29  ;;  %909 = vrot.lane.b32.xlu1 %v3277_v52, %s3065_s29 }
 0x337   : > { %947 = vrot.lane.b32.xlu0 %v3275_v51, %s3066_s30  ;;  %949 = vrot.lane.b32.xlu1 %v3277_v52, %s3066_s30 }
 0x33b   : > { %987 = vrot.lane.b32.xlu0 %v3275_v51, %s3067_s9  ;;  %989 = vrot.lane.b32.xlu1 %v3277_v52, %s3067_s9 }
 0x33f   : > { %1027 = vrot.lane.b32.xlu0 %v3275_v51, %s3068_s10  ;;  %1029 = vrot.lane.b32.xlu1 %v3277_v52, %s3068_s10 }
 0x343   : > { %1067 = vrot.lane.b32.xlu0 %v3275_v51, %s3069_s11  ;;  %1069 = vrot.lane.b32.xlu1 %v3277_v52, %s3069_s11 }
 0x347   : > { %1107 = vrot.lane.b32.xlu0 %v3275_v51, %s3070_s12  ;;  %1109 = vrot.lane.b32.xlu1 %v3277_v52, %s3070_s12 }
 0x34b   : > { %1147 = vrot.lane.b32.xlu0 %v3275_v51, %s3071_s13  ;;  %1149 = vrot.lane.b32.xlu1 %v3277_v52, %s3071_s13 }
 0x34f   : > { %1187 = vrot.lane.b32.xlu0 %v3275_v51, %s3072_s14  ;;  %1189 = vrot.lane.b32.xlu1 %v3277_v52, %s3072_s14 }
 0x353   : > { %1227 = vrot.lane.b32.xlu0 %v3275_v51, %s3073_s15  ;;  %1229 = vrot.lane.b32.xlu1 %v3277_v52, %s3073_s15 }
 0x357   : > { %1267 = vrot.lane.b32.xlu0 %v3275_v51, %s3074_s16  ;;  %1269 = vrot.lane.b32.xlu1 %v3277_v52, %s3074_s16 }
 0x35b   : > { %1307 = vrot.lane.b32.xlu0 %v3275_v51, %s6102_s17  ;;  %1309 = vrot.lane.b32.xlu1 %v3277_v52, %s6102_s17  ;;  %s6110_s17 = smov 13  }
 0x35f   : > { %1347 = vrot.lane.b32.xlu0 %v3275_v51, %s6104_s18  ;;  %1349 = vrot.lane.b32.xlu1 %v3277_v52, %s6104_s18  ;;  %s6112_s18 = smov 3  }
 0x363   : > { %1387 = vrot.lane.b32.xlu0 %v3275_v51, %s6106_s19  ;;  %1389 = vrot.lane.b32.xlu1 %v3277_v52, %s6106_s19  ;;  %s6114_s19 = smov 2  }
 0x367   : > { %1427 = vrot.lane.b32.xlu0 %v3275_v51, %s6108_s20  ;;  %1429 = vrot.lane.b32.xlu1 %v3277_v52, %s6108_s20  ;;  %s6116_s20 = smov 1  }
 0x36b   : > { %1467 = vrot.lane.b32.xlu0 %v3275_v51, %s6110_s17  ;;  %1469 = vrot.lane.b32.xlu1 %v3277_v52, %s6110_s17  ;;  %s6118_s17 = smov 127  }
 0x36f   : > { %1507 = vrot.lane.b32.xlu0 %v3275_v51, %s6112_s18  ;;  %1509 = vrot.lane.b32.xlu1 %v3277_v52, %s6112_s18  ;;  %s6120_s18 = smov 126  }
 0x373   : > { %1547 = vrot.lane.b32.xlu0 %v3275_v51, %s6114_s19  ;;  %1549 = vrot.lane.b32.xlu1 %v3277_v52, %s6114_s19  ;;  %s6180_s19 = smov 125  }
 0x377   : > { %1587 = vrot.lane.b32.xlu0 %v3275_v51, %s6116_s20  ;;  %1589 = vrot.lane.b32.xlu1 %v3277_v52, %s6116_s20  ;;  %s6122_s20 = smov 115  }
 0x37b   : > { %1654 = vrot.lane.b32.xlu0 %v3275_v51, %s6118_s17  ;;  %1656 = vrot.lane.b32.xlu1 %v3277_v52, %s6118_s17  ;;  %s6124_s17 = smov 114  }
 0x37f   : > { %1694 = vrot.lane.b32.xlu0 %v3275_v51, %s6120_s18  ;;  %1696 = vrot.lane.b32.xlu1 %v3277_v52, %s6120_s18  ;;  %s6126_s18 = smov 113  }
 0x383   : > { %1734 = vrot.lane.b32.xlu0 %v3275_v51, %s6180_s19  ;;  %1736 = vrot.lane.b32.xlu1 %v3277_v52, %s6180_s19  ;;  %s3737_s19 = sld [smem:[#allocation2 + $0xd]] }
 0x387   : > { %1774 = vrot.lane.b32.xlu0 %v3275_v51, %s6122_s20  ;;  %1776 = vrot.lane.b32.xlu1 %v3277_v52, %s6122_s20  ;;  %s6128_s20 = smov 112  }
 0x38b   : > { %1814 = vrot.lane.b32.xlu0 %v3275_v51, %s6124_s17  ;;  %1816 = vrot.lane.b32.xlu1 %v3277_v52, %s6124_s17  ;;  %s6130_s17 = smov 111  }
 0x38d   : > { %v3395_v53 = vpop.permute.xlu0 %668  ;;  %v3397_v54 = vpop.permute.xlu1 %666 }
 0x38f   : > { %1854 = vrot.lane.b32.xlu0 %v3275_v51, %s6126_s18  ;;  %1856 = vrot.lane.b32.xlu1 %v3277_v52, %s6126_s18  ;;  %s6132_s18 = smov 110  }
 0x391   : > { %v3403_v55 = vpop.permute.xlu0 %707  ;;  %v3405_v56 = vpop.permute.xlu1 %709 }
 0x393   : > { %1894 = vrot.lane.b32.xlu0 %v3275_v51, %s6128_s20  ;;  %1896 = vrot.lane.b32.xlu1 %v3277_v52, %s6128_s20  ;;  %s6134_s20 = smov 109  }
 0x395   : > { %v3411_v57 = vpop.permute.xlu0 %747  ;;  %v3413_v58 = vpop.permute.xlu1 %749 }
 0x397   : > { %1934 = vrot.lane.b32.xlu0 %v3275_v51, %s6130_s17  ;;  %1936 = vrot.lane.b32.xlu1 %v3277_v52, %s6130_s17  ;;  %s6136_s17 = smov 99  }
 0x399   : > { %v3419_v59 = vpop.permute.xlu0 %787  ;;  %v3421_v60 = vpop.permute.xlu1 %789 }
 0x39b   : > { %1974 = vrot.lane.b32.xlu0 %v3275_v51, %s6132_s18  ;;  %1976 = vrot.lane.b32.xlu1 %v3277_v52, %s6132_s18  ;;  %s6138_s18 = smov 98  }
 0x39d   : > { %v3427_v61 = vpop.permute.xlu0 %827  ;;  %v3429_v62 = vpop.permute.xlu1 %829 }
 0x39e   : > { %6410 = vst [vmem:[#allocation7_spill] sm:$0xff] %v3427_v61 }
 0x39f   : > { %2014 = vrot.lane.b32.xlu0 %v3275_v51, %s6134_s20  ;;  %2016 = vrot.lane.b32.xlu1 %v3277_v52, %s6134_s20  ;;  %s6140_s20 = smov 97  }
 0x3a1   : > { %v3435_v63 = vpop.permute.xlu0 %867  ;;  %v3437_v3 = vpop.permute.xlu1 %869 }
 0x3a3   : > { %2054 = vrot.lane.b32.xlu0 %v3275_v51, %s6136_s17  ;;  %2056 = vrot.lane.b32.xlu1 %v3277_v52, %s6136_s17  ;;  %s6142_s17 = smov 96  }
 0x3a5   : > { %v3443_v4 = vpop.permute.xlu0 %907  ;;  %v3445_v8 = vpop.permute.xlu1 %909 }
 0x3a7   : > { %2094 = vrot.lane.b32.xlu0 %v3275_v51, %s6138_s18  ;;  %2096 = vrot.lane.b32.xlu1 %v3277_v52, %s6138_s18  ;;  %s6144_s18 = smov 95  }
 0x3a9   : > { %v3451_v9 = vpop.permute.xlu0 %947  ;;  %v3453_v12 = vpop.permute.xlu1 %949 }
 0x3aa   : > { %6411 = vst [vmem:[#allocation8_spill] sm:$0xff] %v3451_v9 }
 0x3ab   : > { %2134 = vrot.lane.b32.xlu0 %v3275_v51, %s6140_s20  ;;  %2136 = vrot.lane.b32.xlu1 %v3277_v52, %s6140_s20  ;;  %s6146_s20 = smov 94  }
 0x3ad   : > { %v3459_v13 = vpop.permute.xlu0 %987  ;;  %v3461_v14 = vpop.permute.xlu1 %989 }
 0x3ae   : > { %6412 = vst [vmem:[#allocation9_spill] sm:$0xff] %v3459_v13  ;;  %6413 = vst [vmem:[#allocation10_spill] sm:$0xff] %v3461_v14 }
 0x3af   : > { %2174 = vrot.lane.b32.xlu0 %v3275_v51, %s6142_s17  ;;  %2176 = vrot.lane.b32.xlu1 %v3277_v52, %s6142_s17  ;;  %s6178_s17 = smov 93  }
 0x3b1   : > { %v3467_v15 = vpop.permute.xlu0 %1027  ;;  %v3469_v16 = vpop.permute.xlu1 %1029 }
 0x3b2   : > { %6414 = vst [vmem:[#allocation11_spill] sm:$0xff] %v3467_v15  ;;  %6415 = vst [vmem:[#allocation12_spill] sm:$0xff] %v3469_v16 }
 0x3b3   : > { %2214 = vrot.lane.b32.xlu0 %v3275_v51, %s6144_s18  ;;  %2216 = vrot.lane.b32.xlu1 %v3277_v52, %s6144_s18  ;;  %s6148_s18 = smov 83  }
 0x3b5   : > { %v3475_v17 = vpop.permute.xlu0 %1067  ;;  %v3477_v18 = vpop.permute.xlu1 %1069 }
 0x3b6   : > { %6416 = vst [vmem:[#allocation13_spill] sm:$0xff] %v3475_v17  ;;  %6417 = vst [vmem:[#allocation14_spill] sm:$0xff] %v3477_v18 }
 0x3b7   : > { %2254 = vrot.lane.b32.xlu0 %v3275_v51, %s6146_s20  ;;  %2256 = vrot.lane.b32.xlu1 %v3277_v52, %s6146_s20  ;;  %s6150_s20 = smov 82  }
 0x3b9   : > { %v3483_v19 = vpop.permute.xlu0 %1107  ;;  %v3485_v20 = vpop.permute.xlu1 %1109 }
 0x3ba   : > { %6418 = vst [vmem:[#allocation15_spill] sm:$0xff] %v3483_v19  ;;  %6419 = vst [vmem:[#allocation16_spill] sm:$0xff] %v3485_v20 }
 0x3bb   : > { %2294 = vrot.lane.b32.xlu0 %v3275_v51, %s6178_s17  ;;  %2296 = vrot.lane.b32.xlu1 %v3277_v52, %s6178_s17  ;;  %s6481_s17 = smov 14  }
 0x3bd   : > { %v3491_v21 = vpop.permute.xlu0 %1147  ;;  %v3493_v22 = vpop.permute.xlu1 %1149 }
 0x3bf   : > { %2334 = vrot.lane.b32.xlu0 %v3275_v51, %s6148_s18  ;;  %2336 = vrot.lane.b32.xlu1 %v3277_v52, %s6148_s18  ;;  %s6152_s18 = smov 81  }
 0x3c1   : > { %v3500_v24 = vpop.permute.xlu0 %1187  ;;  %v3502_v25 = vpop.permute.xlu1 %1189 }
 0x3c2   : > { %6420 = vst [vmem:[#allocation17_spill] sm:$0xff] %v3500_v24 }
 0x3c3   : > { %2374 = vrot.lane.b32.xlu0 %v3275_v51, %s6150_s20  ;;  %2376 = vrot.lane.b32.xlu1 %v3277_v52, %s6150_s20  ;;  %s6154_s20 = smov 80  }
 0x3c5   : > { %v3510_v28 = vpop.permute.xlu0 %1227  ;;  %v3512_v29 = vpop.permute.xlu1 %1229 }
 0x3c6   : > { %6421 = vst [vmem:[#allocation18_spill] sm:$0xff] %v3510_v28  ;;  %6422 = vst [vmem:[#allocation19_spill] sm:$0xff] %v3512_v29 }
 0x3c7   : > { %2414 = vrot.lane.b32.xlu0 %v3275_v51, %s6152_s18  ;;  %2416 = vrot.lane.b32.xlu1 %v3277_v52, %s6152_s18  ;;  %s6156_s18 = smov 79  }
 0x3c9   : > { %v3519_v32 = vpop.permute.xlu0 %1267  ;;  %v3521_v33 = vpop.permute.xlu1 %1269 }
 0x3ca   : > { %6423 = vst [vmem:[#allocation20_spill] sm:$0xff] %v3519_v32  ;;  %6424 = vst [vmem:[#allocation21_spill] sm:$0xff] %v3521_v33 }
 0x3cb   : > { %2454 = vrot.lane.b32.xlu0 %v3275_v51, %s6154_s20  ;;  %2456 = vrot.lane.b32.xlu1 %v3277_v52, %s6154_s20  ;;  %s6176_s20 = smov 78  }
 0x3cd   : > { %v3527_v36 = vpop.permute.xlu0 %1307  ;;  %v3529_v6 = vpop.permute.xlu1 %1309 }
 0x3ce   : > { %6425 = vst [vmem:[#allocation22_spill] sm:$0xff] %v3527_v36  ;;  %6426 = vst [vmem:[#allocation23_spill] sm:$0xff] %v3529_v6 }
 0x3cf   : > { %2494 = vrot.lane.b32.xlu0 %v3275_v51, %s6156_s18  ;;  %2496 = vrot.lane.b32.xlu1 %v3277_v52, %s6156_s18  ;;  %s6174_s18 = smov 77  }
 0x3d1   : > { %v3535_v11 = vpop.permute.xlu0 %1347  ;;  %v3537_v37 = vpop.permute.xlu1 %1349 }
 0x3d2   : > { %6427 = vst [vmem:[#allocation24_spill] sm:$0xff] %v3535_v11  ;;  %6428 = vst [vmem:[#allocation25_spill] sm:$0xff] %v3537_v37 }
 0x3d3   : > { %2534 = vrot.lane.b32.xlu0 %v3275_v51, %s6176_s20  ;;  %2536 = vrot.lane.b32.xlu1 %v3277_v52, %s6176_s20  ;;  %s3731_s20 = sld [smem:[#allocation2 + $0xc]] }
 0x3d5   : > { %v3543_v40 = vpop.permute.xlu0 %1387  ;;  %v3545_v41 = vpop.permute.xlu1 %1389 }
 0x3d6   : > { %6429 = vst [vmem:[#allocation26_spill] sm:$0xff] %v3543_v40  ;;  %6430 = vst [vmem:[#allocation27_spill] sm:$0xff] %v3545_v41 }
 0x3d7   : > { %2574 = vrot.lane.b32.xlu0 %v3275_v51, %s6174_s18  ;;  %2576 = vrot.lane.b32.xlu1 %v3277_v52, %s6174_s18  ;;  %s3729_s18 = sld [smem:[#allocation2 + $0xb]] }
 0x3d9   : > { %v3553_v0 = vpop.permute.xlu0 %1427  ;;  %v3555_v1 = vpop.permute.xlu1 %1429  ;;  %6480 = sst [smem:[#allocation74_spill]] %s3731_s20 }
 0x3da   : > { %6431 = vst [vmem:[#allocation28_spill] sm:$0xff] %v3553_v0  ;;  %6432 = vst [vmem:[#allocation29_spill] sm:$0xff] %v3555_v1 }
 0x3db   : > { %711 = vrot.lane.b32.xlu0 %v3551_v43, %s3060_s22  ;;  %670 = vrot.lane.b32.xlu1 %v3551_v43, %s3059_s21 }
 0x3dd   : > { %v3563_v45 = vpop.permute.xlu0 %1467  ;;  %v3565_v2 = vpop.permute.xlu1 %1469  ;;  %6479 = sst [smem:[#allocation73_spill]] %s3729_s18  ;;  %s6535_s18 = smov 125  }
 0x3de   : > { %6433 = vst [vmem:[#allocation30_spill] sm:$0xff] %v3563_v45  ;;  %6434 = vst [vmem:[#allocation31_spill] sm:$0xff] %v3565_v2 }
 0x3df   : > { %751 = vrot.lane.b32.xlu0 %v3551_v43, %s3061_s23  ;;  %672 = vrot.lane.b32.xlu1 %v3561_v44, %s3059_s21  ;;  %s3675_s21 = sld [smem:[#allocation2 + $0x18]] }
 0x3e1   : > { %v3571_v46 = vpop.permute.xlu0 %1507  ;;  %v3573_v5 = vpop.permute.xlu1 %1509 }
 0x3e2   : > { %6435 = vst [vmem:[#allocation32_spill] sm:$0xff] %v3571_v46  ;;  %6436 = vst [vmem:[#allocation33_spill] sm:$0xff] %v3573_v5 }
 0x3e3   : > { %791 = vrot.lane.b32.xlu0 %v3551_v43, %s3062_s24  ;;  %713 = vrot.lane.b32.xlu1 %v3561_v44, %s3060_s22  ;;  %s3681_s22 = sld [smem:[#allocation2 + $0x49]] }
 0x3e5   : > { %v3579_v47 = vpop.permute.xlu0 %1547  ;;  %v3581_v48 = vpop.permute.xlu1 %1549 }
 0x3e6   : > { %6437 = vst [vmem:[#allocation34_spill] sm:$0xff] %v3579_v47  ;;  %6438 = vst [vmem:[#allocation35_spill] sm:$0xff] %v3581_v48 }
 0x3e7   : > { %831 = vrot.lane.b32.xlu0 %v3551_v43, %s3063_s25  ;;  %753 = vrot.lane.b32.xlu1 %v3561_v44, %s3061_s23  ;;  %s3683_s23 = sld [smem:[#allocation2]] }
 0x3e9   : > { %v3587_v49 = vpop.permute.xlu0 %1587  ;;  %v3589_v50 = vpop.permute.xlu1 %1589 }
 0x3ea   : > { %6439 = vst [vmem:[#allocation36_spill] sm:$0xff] %v3587_v49  ;;  %6440 = vst [vmem:[#allocation37_spill] sm:$0xff] %v3589_v50 }
 0x3eb   : > { %871 = vrot.lane.b32.xlu0 %v3551_v43, %s3064_s26  ;;  %793 = vrot.lane.b32.xlu1 %v3561_v44, %s3062_s24  ;;  %s6463_s24 = smov 17  }
 0x3ed   : > { %v3595_v23 = vpop.permute.xlu0 %1654  ;;  %v3597_v26 = vpop.permute.xlu1 %1656 }
 0x3ee   : > { %6441 = vst [vmem:[#allocation38_spill] sm:$0xff] %v3595_v23  ;;  %6442 = vst [vmem:[#allocation39_spill] sm:$0xff] %v3597_v26 }
 0x3ef   : > { %911 = vrot.lane.b32.xlu0 %v3551_v43, %s3065_s29  ;;  %833 = vrot.lane.b32.xlu1 %v3561_v44, %s3063_s25  ;;  %s3689_s25 = sld [smem:[#allocation2 + $0x1]] }
 0x3f1   : > { %v3603_v27 = vpop.permute.xlu0 %1694  ;;  %v3605_v30 = vpop.permute.xlu1 %1696 }
 0x3f2   : > { %6443 = vst [vmem:[#allocation40_spill] sm:$0xff] %v3603_v27  ;;  %6444 = vst [vmem:[#allocation41_spill] sm:$0xff] %v3605_v30  ;;  %v6507_v30 = vlaneseq }
 0x3f3   : > { %951 = vrot.lane.b32.xlu0 %v3551_v43, %s3066_s30  ;;  %873 = vrot.lane.b32.xlu1 %v3561_v44, %s3064_s26  ;;  %s3691_s26 = sld [smem:[#allocation2 + $0x2]] }
 0x3f4   : > { %v3811_v23 = vand.u32 127, %v6507_v30 }
 0x3f5   : > { %v3611_v31 = vpop.permute.xlu0 %1734  ;;  %v3613_v34 = vpop.permute.xlu1 %1736 }
 0x3f6   : > { %6445 = vst [vmem:[#allocation42_spill] sm:$0xff] %v3611_v31  ;;  %6446 = vst [vmem:[#allocation43_spill] sm:$0xff] %v3613_v34  ;;  %vm6249_vm5 = vcmp.lt.s32.totalorder %v3811_v23, 51  ;;  %vm6244_vm6 = vcmp.lt.s32.totalorder %v3811_v23, 50  ;;  %vm6250_vm7 = vcmp.lt.s32.totalorder %v3811_v23, 49  ;;  %vm795_vm8 = vcmp.lt.s32.totalorder %v3811_v23, 48 }
 0x3f7   : > { %991 = vrot.lane.b32.xlu0 %v3551_v43, %s3067_s9  ;;  %913 = vrot.lane.b32.xlu1 %v3561_v44, %s3065_s29  ;;  %s3697_s29 = sld [smem:[#allocation2 + $0x3]]  ;;  %vm835_vm9 = vcmp.lt.s32.totalorder %v3811_v23, 47  ;;  %vm875_vm10 = vcmp.lt.s32.totalorder %v3811_v23, 46  ;;  %vm915_vm11 = vcmp.lt.s32.totalorder %v3811_v23, 45  ;;  %vm6266_vm12 = vcmp.lt.s32.totalorder %v3811_v23, 35 }
 0x3f8   : > { %vm995_vm13 = vcmp.lt.s32.totalorder %v3811_v23, 34  ;;  %vm6276_vm14 = vcmp.lt.s32.totalorder %v3811_v23, 33  ;;  %vm1075_vm15 = vcmp.lt.s32.totalorder %v3811_v23, 32  ;;  %vm6286_vm0 = vcmp.lt.s32.totalorder %v3811_v23, 31 }
 0x3f9   : > { %v3619_v35 = vpop.permute.xlu0 %1774  ;;  %v3621_v7 = vpop.permute.xlu1 %1776  ;;  %vm1155_vm1 = vcmp.lt.s32.totalorder %v3811_v23, 30  ;;  %vm1195_vm2 = vcmp.lt.s32.totalorder %v3811_v23, 29  ;;  %vm1235_vm3 = vcmp.lt.s32.totalorder %v3811_v23, 19  ;;  %vm1275_vm4 = vcmp.lt.s32.totalorder %v3811_v23, 18 }
 0x3fa   : > { %6447 = vst [vmem:[#allocation44_spill] sm:$0xff] %v3619_v35  ;;  %6448 = vst [vmem:[#allocation45_spill] sm:$0xff] %v3621_v7  ;;  %v1630_v7 = vstv %s3675_s21  ;;  %s6516_s21 = smov 127  }
 0x3fb   : > { %1031 = vrot.lane.b32.xlu0 %v3551_v43, %s3068_s10  ;;  %953 = vrot.lane.b32.xlu1 %v3561_v44, %s3066_s30  ;;  %s3699_s30 = sld [smem:[#allocation2 + $0x4]] }
 0x3fd   : > { %v3627_v10 = vpop.permute.xlu0 %1814  ;;  %v3629_v38 = vpop.permute.xlu1 %1816  ;;  %6466 = sst [smem:[#allocation62_spill]] %s3697_s29 }
 0x3fe   : > { %6449 = vst [vmem:[#allocation46_spill] sm:$0xff] %v3627_v10  ;;  %6450 = vst [vmem:[#allocation47_spill] sm:$0xff] %v3629_v38 }
 0x3ff   : > { %1071 = vrot.lane.b32.xlu0 %v3551_v43, %s3069_s11  ;;  %993 = vrot.lane.b32.xlu1 %v3561_v44, %s3067_s9  ;;  %s6468_s9 = smov 16  }
 0x401   : > { %v3635_v39 = vpop.permute.xlu0 %1854  ;;  %v3637_v42 = vpop.permute.xlu1 %1856  ;;  %6467 = sst [smem:[#allocation63_spill]] %s3699_s30  ;;  %s6525_s30 = smov 126  }
 0x402   : > { %6451 = vst [vmem:[#allocation48_spill] sm:$0xff] %v3635_v39  ;;  %6452 = vst [vmem:[#allocation49_spill] sm:$0xff] %v3637_v42 }
 0x403   : > { %1111 = vrot.lane.b32.xlu0 %v3551_v43, %s3070_s12  ;;  %1033 = vrot.lane.b32.xlu1 %v3561_v44, %s3068_s10  ;;  %s3705_s10 = sld [smem:[#allocation2 + $0x5]] }
 0x405   : > { %v3643_v35 = vpop.permute.xlu0 %1894  ;;  %v3645_v10 = vpop.permute.xlu1 %1896 }
 0x406   : > { %6453 = vst [vmem:[#allocation50_spill] sm:$0xff] %v3643_v35  ;;  %6454 = vst [vmem:[#allocation51_spill] sm:$0xff] %v3645_v10 }
 0x407   : > { %1151 = vrot.lane.b32.xlu0 %v3551_v43, %s3071_s13  ;;  %1073 = vrot.lane.b32.xlu1 %v3561_v44, %s3069_s11  ;;  %s3707_s11 = sld [smem:[#allocation2 + $0x6]] }
 0x409   : > { %v3651_v38 = vpop.permute.xlu0 %1934  ;;  %v3653_v39 = vpop.permute.xlu1 %1936  ;;  %6469 = sst [smem:[#allocation64_spill]] %s3705_s10 }
 0x40a   : > { %6455 = vst [vmem:[#allocation52_spill] sm:$0xff] %v3651_v38  ;;  %6456 = vst [vmem:[#allocation53_spill] sm:$0xff] %v3653_v39  ;;  %v1634_v39 = vstv %s3681_s22  ;;  %s6508_s22 = smov 1   ;;  %s3876_s10 = sld [smem:[#allocation2 + $0x26]] }
 0x40b   : > { %1191 = vrot.lane.b32.xlu0 %v3551_v43, %s3072_s14  ;;  %1113 = vrot.lane.b32.xlu1 %v3561_v44, %s3070_s12  ;;  %s3713_s12 = sld [smem:[#allocation2 + $0x7]]  ;;  %v1635_v34 = vmul.f32 %v1634_v39, %v3551_v43  ;;  %v1636_v27 = vmul.f32 %v1634_v39, %v3561_v44  ;;  %v1632_v39 = vmul.f32 %v1630_v7, %v3277_v52 }
 0x40c   : > { %s6558_s28 = sld [smem:[#allocation64_spill]] }
 0x40d   : > { %v3659_v42 = vpop.permute.xlu0 %1974  ;;  %v3661_v35 = vpop.permute.xlu1 %1976  ;;  %v1638_v26 = vadd.f32 %v1636_v27, %v1632_v39 }
 0x40e   : > { %6457 = vst [vmem:[#allocation54_spill] sm:$0xff] %v3659_v42  ;;  %6458 = vst [vmem:[#allocation55_spill] sm:$0xff] %v3661_v35 }
 0x40f   : > { %1231 = vrot.lane.b32.xlu0 %v3551_v43, %s3073_s15  ;;  %1153 = vrot.lane.b32.xlu1 %v3561_v44, %s3071_s13  ;;  %s3715_s13 = sld [smem:[#allocation2 + $0x8]] }
 0x410   : > { %6526 = sst [smem:[#allocation111_spill]] %s3876_s10  ;;  %s6574_s10 = smov 113  }
 0x411   : > { %v3667_v10 = vpop.permute.xlu0 %2014  ;;  %v3669_v38 = vpop.permute.xlu1 %2016  ;;  %6472 = sst [smem:[#allocation67_spill]] %s3713_s12 }
 0x412   : > { %6459 = vst [vmem:[#allocation56_spill] sm:$0xff] %v3667_v10  ;;  %6460 = vst [vmem:[#allocation57_spill] sm:$0xff] %v3669_v38 }
 0x413   : > { %1271 = vrot.lane.b32.xlu0 %v3551_v43, %s3074_s16  ;;  %1193 = vrot.lane.b32.xlu1 %v3561_v44, %s3072_s14  ;;  %s6474_s14 = smov 15  }
 0x415   : > { %v3677_v42 = vpop.permute.xlu0 %2054  ;;  %v3679_v35 = vpop.permute.xlu1 %2056  ;;  %6473 = sst [smem:[#allocation68_spill]] %s3715_s13 }
 0x416   : > { %6461 = vst [vmem:[#allocation58_spill] sm:$0xff] %v3677_v42  ;;  %6462 = vst [vmem:[#allocation59_spill] sm:$0xff] %v3679_v35  ;;  %s3894_s13 = sld [smem:[#allocation2 + $0x28]] }
 0x417   : > { %1311 = vrot.lane.b32.xlu0 %v3551_v43, %s6463_s24  ;;  %1233 = vrot.lane.b32.xlu1 %v3561_v44, %s3073_s15  ;;  %s3721_s15 = sld [smem:[#allocation2 + $0x9]] }
 0x418   : > { %s6563_s12 = sld [smem:[#allocation68_spill]] }
 0x419   : > { %v3693_v10 = vpop.permute.xlu0 %2094  ;;  %v3695_v38 = vpop.permute.xlu1 %2096 }
 0x41a   : > { %6464 = vst [vmem:[#allocation60_spill] sm:$0xff] %v3693_v10  ;;  %6465 = vst [vmem:[#allocation61_spill] sm:$0xff] %v3695_v38 }
 0x41b   : > { %1351 = vrot.lane.b32.xlu0 %v3551_v43, %s6468_s9  ;;  %1273 = vrot.lane.b32.xlu1 %v3561_v44, %s3074_s16  ;;  %s3723_s16 = sld [smem:[#allocation2 + $0xa]] }
 0x41d   : > { %v3709_v42 = vpop.permute.xlu0 %2134  ;;  %v3711_v35 = vpop.permute.xlu1 %2136  ;;  %6475 = sst [smem:[#allocation69_spill]] %s3721_s15 }
 0x41e   : > { %6470 = vst [vmem:[#allocation65_spill] sm:$0xff] %v3709_v42  ;;  %6471 = vst [vmem:[#allocation66_spill] sm:$0xff] %v3711_v35  ;;  %s3900_s15 = sld [smem:[#allocation2 + $0x29]] }
 0x41f   : > { %1391 = vrot.lane.b32.xlu0 %v3551_v43, %s6474_s14  ;;  %1313 = vrot.lane.b32.xlu1 %v3561_v44, %s6463_s24  ;;  %s3739_s24 = sld [smem:[#allocation2 + $0xe]] }
 0x421   : > { %6476 = sst [smem:[#allocation70_spill]] %s3723_s16  ;;  %v3725_v10 = vpop.permute.xlu0 %2174  ;;  %v3727_v38 = vpop.permute.xlu1 %2176 }
 0x422   : > { %6477 = vst [vmem:[#allocation71_spill] sm:$0xff] %v3725_v10  ;;  %6478 = vst [vmem:[#allocation72_spill] sm:$0xff] %v3727_v38  ;;  %s3945_s16 = sld [smem:[#allocation2 + $0x2d]] }
 0x423   : > { %1431 = vrot.lane.b32.xlu0 %v3551_v43, %s6481_s17  ;;  %1353 = vrot.lane.b32.xlu1 %v3561_v44, %s6468_s9  ;;  %s3755_s9 = sld [smem:[#allocation2 + $0x12]] }
 0x424   : > { %6534 = sst [smem:[#allocation115_spill]] %s3900_s15  ;;  %s6597_s15 = smov 111  }
 0x425   : > { %6482 = sst [smem:[#allocation75_spill]] %s3739_s24  ;;  %v3741_v42 = vpop.permute.xlu0 %2214  ;;  %v3743_v35 = vpop.permute.xlu1 %2216  ;;  %s6546_s24 = smov 115  }
 0x426   : > { %6483 = vst [vmem:[#allocation76_spill] sm:$0xff] %v3741_v42  ;;  %6484 = vst [vmem:[#allocation77_spill] sm:$0xff] %v3743_v35  ;;  %v6199_v42 = vlaneseq  ;;  %s6578_s1 = sld [smem:[#allocation75_spill]] }
 0x427   : > { %1471 = vrot.lane.b32.xlu0 %v3551_v43, %s6487_s2  ;;  %1393 = vrot.lane.b32.xlu1 %v3561_v44, %s6474_s14  ;;  %s3769_s14 = sld [smem:[#allocation2 + $0x15]] }
 0x428   : > { %v3780_v35 = vshrl.u32 %v6199_v42, 7  ;;  %6545 = sst [smem:[#allocation121_spill]] %s3945_s16  ;;  %s6583_s16 = smov 112  }
 0x429   : > { %6489 = sst [smem:[#allocation81_spill]] %s3755_s9  ;;  %v3757_v10 = vpop.permute.xlu0 %2254  ;;  %v3759_v38 = vpop.permute.xlu1 %2256 }
 0x42a   : > { %6490 = vst [vmem:[#allocation82_spill] sm:$0xff] %v3757_v10  ;;  %6491 = vst [vmem:[#allocation83_spill] sm:$0xff] %v3759_v38  ;;  %v3801_v42 = vsub.s32 0, %v3780_v35  ;;  %v3804_v31 = vsub.s32 1, %v3780_v35  ;;  %s4000_s9 = sld [smem:[#allocation2 + $0x32]] }
 0x42b   : > { %1511 = vrot.lane.b32.xlu0 %v3551_v43, %s6493_s7  ;;  %1433 = vrot.lane.b32.xlu1 %v3561_v44, %s6481_s17  ;;  %6498 = vst [vmem:[#allocation89_spill] sm:$0xff] %v3780_v35  ;;  %s3788_s17 = sld [smem:[#allocation2 + $0x1a]]  ;;  %v2831_v35 = vld [vmem:[%s6509_s5 + $0x30] ss:$8 sm:$0x3] }
 0x42c   : > { %v1643_v49 = vrot.slane %v2831_v35, %v3801_v42  ;;  %v1647_v50 = vrot.slane %v2831_v35, %v3804_v31  ;;  %s3842_s5 = sld [smem:[#allocation2 + $0x22]] }
 0x42d   : > { %v3773_v10 = vpop.permute.xlu0 %2294  ;;  %v3775_v38 = vpop.permute.xlu1 %2296 }
 0x42e   : > { %6495 = vst [vmem:[#allocation86_spill] sm:$0xff] %v3773_v10  ;;  %6496 = vst [vmem:[#allocation87_spill] sm:$0xff] %v3775_v38  ;;  %v3862_v27 = vmul.f32 %v1647_v50, %v1638_v26  ;;  %v838_v50 = vsel %vm835_vm9, %v3427_v61, %v3429_v62 }
 0x42f   : > { %1551 = vrot.lane.b32.xlu0 %v3551_v43, %s6500_s6  ;;  %1473 = vrot.lane.b32.xlu1 %v3561_v44, %s6487_s2  ;;  %s3808_s2 = sld [smem:[#allocation2 + $0x1d]] }
 0x430   : > { %6522 = vst [vmem:[#allocation108_spill] sm:$0xff] %v3862_v27  ;;  %v758_v27 = vsel %vm6250_vm7, %v3411_v57, %v3413_v58  ;;  %vm6314_vm7 = vcmp.lt.s32.totalorder %v3811_v23, 15 }
 0x431   : > { %6501 = sst [smem:[#allocation91_spill]] %s3788_s17  ;;  %v3793_v10 = vpop.permute.xlu0 %2334  ;;  %v3795_v38 = vpop.permute.xlu1 %2336 }
 0x432   : > { %6503 = vst [vmem:[#allocation93_spill] sm:$0xff] %v3793_v10  ;;  %6504 = vst [vmem:[#allocation94_spill] sm:$0xff] %v3795_v38  ;;  %v1631_v10 = vmul.f32 %v1630_v7, %v3275_v51  ;;  %6517 = sst [smem:[#allocation103_spill]] %s3842_s5  ;;  %v679_v7 = vsel %vm6249_vm5, %v3397_v54, %v3395_v53  ;;  %v718_v51 = vsel %vm6244_vm6, %v3403_v55, %v3405_v56  ;;  %vm6298_vm6 = vcmp.lt.s32.totalorder %v3811_v23, 17  ;;  %s6561_s5 = smov 114  }
 0x433   : > { %1591 = vrot.lane.b32.xlu0 %v3551_v43, %s6508_s22  ;;  %1513 = vrot.lane.b32.xlu1 %v3561_v44, %s6493_s7  ;;  %s3830_s7 = sld [smem:[#allocation2 + $0x20]]  ;;  %vm6319_vm5 = vcmp.lt.s32.totalorder %v3811_v23, 16 }
 0x434   : > { %v1637_v47 = vadd.f32 %v1635_v34, %v1631_v10  ;;  %s6560_s17 = sld [smem:[#allocation67_spill]] }
 0x435   : > { %6506 = sst [smem:[#allocation96_spill]] %s3808_s2  ;;  %v3826_v30 = vpop.permute.xlu0 %2374  ;;  %v3828_v38 = vpop.permute.xlu1 %2376 }
 0x436   : > { %s3824_s2 = sld [smem:[#allocation2 + $0x1f]]  ;;  %6512 = vst [vmem:[#allocation99_spill] sm:$0xff] %v3826_v30  ;;  %6513 = vst [vmem:[#allocation100_spill] sm:$0xff] %v3828_v38  ;;  %v3864_v52 = vmul.f32 %v1643_v49, %v1637_v47  ;;  %v798_v47 = vsel %vm795_vm8, %v3419_v59, %v3421_v60  ;;  %v6549_v49 = vstv %s3683_s23  ;;  %v6554_v38 = vstv %s3691_s26 }
 0x437   : > { %1658 = vrot.lane.b32.xlu0 %v3551_v43, %s6516_s21  ;;  %1553 = vrot.lane.b32.xlu1 %v3561_v44, %s6500_s6  ;;  %s3858_s6 = sld [smem:[#allocation2 + $0x24]]  ;;  %v3986_v61 = vmul.f32 %v6554_v38, %v758_v27  ;;  %v6559_v38 = vstv %s3697_s29 }
 0x438   : > { %6523 = vst [vmem:[#allocation109_spill] sm:$0xff] %v3864_v52  ;;  %v4004_v27 = vmul.f32 %v6559_v38, %v798_v47  ;;  %s6564_s29 = sld [smem:[#allocation69_spill]] }
 0x439   : > { %6514 = sst [smem:[#allocation101_spill]] %s3830_s7  ;;  %v3852_v34 = vpop.permute.xlu0 %2414  ;;  %v3854_v35 = vpop.permute.xlu1 %2416 }
 0x43a   : > { %6519 = vst [vmem:[#allocation105_spill] sm:$0xff] %v3852_v34  ;;  %6520 = vst [vmem:[#allocation106_spill] sm:$0xff] %v3854_v35  ;;  %v1038_v35 = vsel %vm6276_vm14, %v3467_v15, %v3469_v16  ;;  %v6565_v15 = vstv %s6558_s28  ;;  %vm6323_vm14 = vcmp.lt.s32.totalorder %v3811_v23, 13  ;;  %s6567_s7 = sld [smem:[#allocation73_spill]] }
 0x43b   : > { %1698 = vrot.lane.b32.xlu0 %v3551_v43, %s6525_s30  ;;  %1593 = vrot.lane.b32.xlu1 %v3561_v44, %s6508_s22  ;;  %s6530_s22 = sld [smem:[#allocation84_spill]] }
 0x43c   : > { %6511 = sst [smem:[#allocation98_spill]] %s3824_s2 }
 0x43d   : > { %6521 = sst [smem:[#allocation107_spill]] %s3858_s6  ;;  %v3886_v10 = vpop.permute.xlu0 %2454  ;;  %v3888_v26 = vpop.permute.xlu1 %2456 }
 0x43e   : > { %6528 = vst [vmem:[#allocation113_spill] sm:$0xff] %v3886_v10  ;;  %6529 = vst [vmem:[#allocation114_spill] sm:$0xff] %v3888_v26  ;;  %6532 = sst [smem:[#allocation84_spill]] %s3894_s13  ;;  %v6550_v26 = vstv %s3689_s25 }
 0x43f   : > { %1738 = vrot.lane.b32.xlu0 %v3551_v43, %s6535_s18  ;;  %1660 = vrot.lane.b32.xlu1 %v3561_v44, %s6516_s21  ;;  %s3935_s21 = sld [smem:[#allocation2 + $0x2c]]  ;;  %v3971_v34 = vmul.f32 %v6550_v26, %v718_v51  ;;  %v918_v26 = vsel %vm915_vm11, %v3443_v4, %v3445_v8 }
 0x440   : > { %s3990_s2 = sld [smem:[#allocation2 + $0x30]] }
 0x441   : > { %v3929_v52 = vpop.permute.xlu0 %2494  ;;  %v3931_v39 = vpop.permute.xlu1 %2496  ;;  %s4020_s6 = sld [smem:[#allocation2 + $0x31]] }
 0x442   : > { %6541 = vst [vmem:[#allocation118_spill] sm:$0xff] %v3929_v52  ;;  %6542 = vst [vmem:[#allocation119_spill] sm:$0xff] %v3931_v39  ;;  %v3967_v39 = vmul.f32 %v6549_v49, %v679_v7  ;;  %v878_v52 = vsel %vm875_vm10, %v3435_v63, %v3437_v3  ;;  %v958_v49 = vsel %vm6266_vm12, %v3451_v9, %v3453_v12  ;;  %vm6324_vm12 = vcmp.lt.s32.totalorder %v3811_v23, 14  ;;  %s4075_s13 = sld [smem:[#allocation2 + $0x34]] }
 0x443   : > { %1778 = vrot.lane.b32.xlu0 %v3551_v43, %s6546_s24  ;;  %1700 = vrot.lane.b32.xlu1 %v3561_v44, %s6525_s30  ;;  %s6555_s30 = sld [smem:[#allocation63_spill]]  ;;  %v998_v7 = vsel %vm995_vm13, %v3459_v13, %v3461_v14  ;;  %v4039_v16 = vmul.f32 %v6565_v15, %v878_v52  ;;  %v1158_v52 = vsel %vm1155_vm1, %v3491_v21, %v3493_v22  ;;  %v6573_v14 = vstv %s6564_s29 }
 0x444   : > { %v727_v15 = vstv %s4000_s9  ;;  %v6588_v13 = vstv %s6580_s0  ;;  %s4232_s9 = sld [smem:[#allocation2 + $0x38]] }
 0x445   : > { %6543 = sst [smem:[#allocation120_spill]] %s3935_s21  ;;  %v3980_v10 = vpop.permute.xlu0 %2534  ;;  %v3982_v30 = vpop.permute.xlu1 %2536 }
 0x446   : > { %6552 = vst [vmem:[#allocation124_spill] sm:$0xff] %v3980_v10  ;;  %6553 = vst [vmem:[#allocation125_spill] sm:$0xff] %v3982_v30  ;;  %6557 = sst [smem:[#allocation126_spill]] %s3990_s2  ;;  %v1078_v10 = vsel %vm1075_vm15, %v3475_v17, %v3477_v18  ;;  %v1118_v30 = vsel %vm6286_vm0, %v3483_v19, %v3485_v20  ;;  %v6570_v17 = vstv %s3707_s11  ;;  %v6571_v19 = vstv %s6560_s17 }
 0x447   : > { %1818 = vrot.lane.b32.xlu0 %v3551_v43, %s6561_s5  ;;  %1740 = vrot.lane.b32.xlu1 %v3561_v44, %s6535_s18  ;;  %s4035_s18 = sld [smem:[#allocation2 + $0x33]]  ;;  %v4049_v18 = vmul.f32 %v6570_v17, %v918_v26  ;;  %v4053_v20 = vmul.f32 %v6571_v19, %v958_v49  ;;  %vm1515_vm0 = vcmp.lt.s32.totalorder %v3811_v23, 3  ;;  %v1198_v49 = vsel %vm1195_vm2, %v3500_v24, %v3502_v25 }
 0x448   : > { %s6581_s21 = sld [smem:[#allocation79_spill]] }
 0x449   : > { %v6562_v47 = vstv %s6555_s30  ;;  %s6566_s30 = sld [smem:[#allocation70_spill]]  ;;  %v4045_v51 = vpop.permute.xlu1 %2576 }
 0x44a   : > { %v4024_v38 = vmul.f32 %v6562_v47, %v838_v50  ;;  %v4043_v47 = vpop.permute.xlu0 %2574  ;;  %6569 = vst [vmem:[#allocation128_spill] sm:$0xff] %v4045_v51  ;;  %v6572_v50 = vstv %s6563_s12  ;;  %v4067_v51 = vmul.f32 %v6573_v14, %v1038_v35  ;;  %v6577_v35 = vstv %s3731_s20  ;;  %s6582_s20 = sld [smem:[#allocation152_spill]]  ;;  %s6636_s12 = smov 97  }
 0x44b   : > { %6568 = vst [vmem:[#allocation127_spill] sm:$0xff] %v4043_v47  ;;  %v4063_v47 = vmul.f32 %v6572_v50, %v998_v7  ;;  %1858 = vrot.lane.b32.xlu0 %v3551_v43, %s6574_s10  ;;  %1780 = vrot.lane.b32.xlu1 %v3561_v44, %s6546_s24  ;;  %v6576_v7 = vstv %s6567_s7  ;;  %v1238_v50 = vsel %vm1235_vm3, %v3510_v28, %v3512_v29  ;;  %s4099_s24 = sld [smem:[#allocation2 + $0x35]] }
 0x44c   : > { %v4083_v14 = vmul.f32 %v6576_v7, %v1118_v30  ;;  %v1278_v30 = vsel %vm1275_vm4, %v3519_v32, %v3521_v33  ;;  %v4108_v9 = vmul.f32 %v6577_v35, %v1158_v52  ;;  %s6584_s7 = sld [smem:[#allocation80_spill]]  ;;  %v687_v33 = vstv %s4020_s6 }
 0x44d   : > { %v671_v26 = vpop.permute.xlu1 %670  ;;  %v767_v28 = vstv %s4035_s18  ;;  %s6613_s18 = sld [smem:[#allocation62_spill]] }
 0x44e   : > { %v712_v7 = vpop.permute.xlu0 %711  ;;  %6579 = vst [vmem:[#allocation129_spill] sm:$0xff] %v4108_v9  ;;  %v6590_v29 = vstv %s6581_s21  ;;  %s6614_s29 = sld [smem:[#allocation85_spill]] }
 0x44f   : > { %v6575_v17 = vstv %s6566_s30  ;;  %1898 = vrot.lane.b32.xlu0 %v3551_v43, %s6583_s16  ;;  %s6585_s30 = sld [smem:[#allocation81_spill]]  ;;  %1820 = vrot.lane.b32.xlu1 %v3561_v44, %s6561_s5 }
 0x450   : > { %v4079_v19 = vmul.f32 %v6575_v17, %v1078_v10  ;;  %v1318_v17 = vsel %vm6298_vm6, %v3527_v36, %v3529_v6  ;;  %v1358_v10 = vsel %vm6319_vm5, %v3535_v11, %v3537_v37  ;;  %v1398_v6 = vsel %vm6314_vm7, %v3543_v40, %v3545_v41  ;;  %v4124_v52 = vld [vmem:[%s6582_s20] ss:$8 sm:$0x3]  ;;  %v4138_v40 = vld [vmem:[%s6582_s20 + $0x1] ss:$8 sm:$0x3] }
 0x451   : > { %vm1555_vm6 = vcmp.lt.s32.totalorder %v3811_v23, 2  ;;  %v6586_v41 = vstv %s3737_s19  ;;  %v6587_v11 = vstv %s6578_s1  ;;  %v4150_v36 = vmul.f32 %v6588_v13, %v1278_v30  ;;  %v673_v13 = vpop.permute.xlu1 %672  ;;  %s4165_s5 = sld [smem:[#allocation2 + $0x37]] }
 0x452   : > { %v4142_v37 = vmul.f32 %v6586_v41, %v1198_v49  ;;  %v4146_v35 = vmul.f32 %v6587_v11, %v1238_v50  ;;  %vm6589_vm7 = vcmp.lt.s32.totalorder %v3811_v23, 51  ;;  %v4159_v24 = vmul.f32 %v6590_v29, %v1318_v17  ;;  %v752_v9 = vpop.permute.xlu0 %751  ;;  %s4459_s6 = sld [smem:[#allocation2 + $0x3d]] }
 0x453   : > { %v678_v32 = vsel %vm6589_vm7, %v3395_v53, %v671_v26  ;;  %v696_v41 = vrot.slane %v4124_v52, %v3801_v42  ;;  %v700_v11 = vrot.slane %v4124_v52, %v3804_v31  ;;  %v6591_v49 = vstv %s6584_s7  ;;  %vm6595_vm5 = vmmov %vm6589_vm7  ;;  %1938 = vrot.lane.b32.xlu0 %v3551_v43, %s6597_s15  ;;  %1860 = vrot.lane.b32.xlu1 %v3561_v44, %s6574_s10  ;;  %s6621_s10 = sld [smem:[#allocation63_spill]] }
 0x454   : > { %v4169_v50 = vmul.f32 %v6591_v49, %v1358_v10  ;;  %v1438_v29 = vsel %vm6324_vm12, %v3553_v0, %v3555_v1  ;;  %v677_v17 = vsel %vm6589_vm7, %v671_v26, %v673_v13  ;;  %v680_v52 = vsel %vm6595_vm5, %v673_v13, %v3397_v54 }
 0x455   : > { %v6593_v53 = vstv %s6585_s30  ;;  %v736_v10 = vrot.slane %v4138_v40, %v3801_v42  ;;  %v688_v49 = vmul.f32 %v687_v33, %v678_v32  ;;  %v740_v54 = vrot.slane %v4138_v40, %v3804_v31  ;;  %v714_v1 = vpop.permute.xlu1 %713 }
 0x456   : > { %6592 = vst [vmem:[#allocation130_spill] sm:$0xff] %v4169_v50  ;;  %v4173_v30 = vmul.f32 %v6593_v53, %v1398_v6  ;;  %v4189_v6 = vld [vmem:[%s6582_s20 + $0x2] ss:$8 sm:$0x3]  ;;  %v6596_v53 = vstv %s3683_s23  ;;  %v1478_v13 = vsel %vm6323_vm14, %v3563_v45, %v3565_v2  ;;  %vm6598_vm5 = vcmp.lt.s32.totalorder %v3811_v23, 50  ;;  %v792_v26 = vpop.permute.xlu0 %791  ;;  %s6617_s23 = smov 99  }
 0x457   : > { %v717_v32 = vsel %vm6598_vm5, %v3405_v56, %v712_v7  ;;  %vm1595_vm7 = vcmp.lt.s32.totalorder %v3811_v23, 1  ;;  %v776_v40 = vrot.slane %v4189_v6, %v3801_v42  ;;  %v780_v0 = vrot.slane %v4189_v6, %v3804_v31  ;;  %v4216_v2 = vld [vmem:[%s6582_s20 + $0x3] ss:$8 sm:$0x3]  ;;  %vm6601_vm14 = vmmov %vm6598_vm5  ;;  %1978 = vrot.lane.b32.xlu0 %v3551_v43, %s6604_s8  ;;  %1900 = vrot.lane.b32.xlu1 %v3561_v44, %s6583_s16  ;;  %s6612_s16 = smov 109  }
 0x458   : > { %6594 = vst [vmem:[#allocation131_spill] sm:$0xff] %v4173_v30  ;;  %v684_v30 = vmul.f32 %v6596_v53, %v680_v52  ;;  %v689_v52 = vmul.f32 %v687_v33, %v677_v17  ;;  %v6599_v56 = vstv %s3761_s4  ;;  %v716_v17 = vsel %vm6598_vm5, %v712_v7, %v714_v1 }
 0x459   : > { %v4220_v33 = vmul.f32 %v6599_v56, %v1438_v29  ;;  %v719_v6 = vsel %vm6601_vm14, %v714_v1, %v3403_v55  ;;  %v728_v53 = vmul.f32 %v727_v15, %v717_v32  ;;  %vm6602_vm12 = vcmp.lt.s32.totalorder %v3811_v23, 49 }
 0x45a   : > { %v690_v50 = vadd.f32 %v688_v49, %v684_v30  ;;  %v1518_v30 = vsel %vm1515_vm0, %v3571_v46, %v3573_v5  ;;  %v757_v29 = vsel %vm6602_vm12, %v3413_v58, %v752_v9  ;;  %v6603_v56 = vstv %s3689_s25  ;;  %v754_v49 = vpop.permute.xlu1 %753  ;;  %s4318_s25 = sld [smem:[#allocation2 + $0x3a]] }
 0x45b   : > { %6600 = vst [vmem:[#allocation132_spill] sm:$0xff] %v4220_v33  ;;  %v724_v33 = vmul.f32 %v6603_v56, %v719_v6  ;;  %v6605_v7 = vstv %s6530_s22  ;;  %v691_v55 = vadd.f32 %v689_v52, %v3967_v39  ;;  %v729_v1 = vmul.f32 %v727_v15, %v716_v17  ;;  %v6607_v6 = vld [vmem:[#allocation34_spill] sm:$0xff]  ;;  %v4260_v15 = vld [vmem:[%s6582_s20 + $0x4] ss:$8 sm:$0x3]  ;;  %2018 = vrot.lane.b32.xlu0 %v3551_v43, %s6612_s16 }
 0x45c   : > { %v4243_v5 = vmul.f32 %v6605_v7, %v1478_v13  ;;  %v816_v32 = vrot.slane %v4216_v2, %v3801_v42  ;;  %v1558_v56 = vsel %vm1555_vm6, %v6607_v6, %v3581_v48  ;;  %v832_v7 = vpop.permute.xlu0 %831  ;;  %v6608_v52 = vstv %s3769_s14  ;;  %1940 = vrot.lane.b32.xlu1 %v3561_v44, %s6597_s15  ;;  %s4409_s15 = sld [smem:[#allocation2 + $0x3c]] }
 0x45d   : > { %v730_v13 = vadd.f32 %v728_v53, %v724_v33  ;;  %v4264_v17 = vmul.f32 %v6608_v52, %v1518_v30  ;;  %vm1662_vm12 = vcmp.lt.s32.totalorder %v3811_v23, 127  ;;  %v768_v58 = vmul.f32 %v767_v28, %v757_v29 }
 0x45e   : > { %6606 = vst [vmem:[#allocation133_spill] sm:$0xff] %v4243_v5  ;;  %v731_v5 = vadd.f32 %v729_v1, %v3971_v34  ;;  %vm6609_vm14 = vcmp.lt.s32.totalorder %v3811_v23, 49  ;;  %v703_v33 = vmul.f32 %v696_v41, %v690_v50  ;;  %v6611_v6 = vstv %s3691_s26  ;;  %s4284_s26 = sld [smem:[#allocation2 + $0x39]] }
 0x45f   : > { %v756_v48 = vsel %vm6609_vm14, %v752_v9, %v754_v49  ;;  %vm6610_vm5 = vmmov %vm6609_vm14  ;;  %v743_v39 = vmul.f32 %v736_v10, %v730_v13  ;;  %v704_v30 = vmul.f32 %v700_v11, %v691_v55  ;;  %v797_v34 = vsel %vm795_vm8, %v3421_v60, %v792_v26  ;;  %v794_v11 = vpop.permute.xlu1 %793  ;;  %2058 = vrot.lane.b32.xlu0 %v3551_v43, %s6617_s23 }
 0x460   : > { %v759_v53 = vsel %vm6610_vm5, %v754_v49, %v3411_v57  ;;  %v769_v45 = vmul.f32 %v767_v28, %v756_v48  ;;  %v744_v29 = vmul.f32 %v740_v54, %v731_v5  ;;  %v856_v57 = vrot.slane %v4260_v15, %v3801_v42  ;;  %v872_v41 = vpop.permute.xlu0 %871  ;;  %1980 = vrot.lane.b32.xlu1 %v3561_v44, %s6604_s8  ;;  %s6628_s8 = smov 98  }
 0x461   : > { %v764_v46 = vmul.f32 %v6611_v6, %v759_v53  ;;  %v745_v9 = vadd.f32 %v743_v39, %v703_v33  ;;  %v860_v60 = vrot.slane %v4260_v15, %v3804_v31  ;;  %v796_v50 = vsel %vm795_vm8, %v792_v26, %v794_v11  ;;  %v6618_v26 = vld [vmem:[#allocation37_spill] sm:$0xff]  ;;  %v6619_v6 = vld [vmem:[#allocation36_spill] sm:$0xff] }
 0x462   : > { %v771_v48 = vadd.f32 %v769_v45, %v3986_v61  ;;  %v746_v5 = vadd.f32 %v744_v29, %v704_v30  ;;  %v799_v10 = vsel %vm795_vm8, %v794_v11, %v3419_v59  ;;  %v967_v54 = vstv %s4232_s9  ;;  %v4298_v61 = vld [vmem:[%s6582_s20 + $0x5] ss:$8 sm:$0x3]  ;;  %s6658_s9 = sld [smem:[#allocation92_spill]] }
 0x463   : > { %v770_v28 = vadd.f32 %v768_v58, %v764_v46  ;;  %vm6338_vm14 = vcmp.lt.s32.totalorder %v3811_v23, 126  ;;  %v6615_v45 = vstv %s4075_s13  ;;  %v6616_v1 = vstv %s6613_s18  ;;  %s6623_s13 = sld [smem:[#allocation88_spill]]  ;;  %2098 = vrot.lane.b32.xlu0 %v3551_v43, %s6628_s8 }
 0x464   : > { %v808_v46 = vmul.f32 %v6615_v45, %v797_v34  ;;  %v784_v55 = vmul.f32 %v780_v0, %v771_v48  ;;  %v804_v58 = vmul.f32 %v6616_v1, %v799_v10  ;;  %v1598_v59 = vsel %vm1595_vm7, %v6619_v6, %v6618_v26  ;;  %v912_v30 = vpop.permute.xlu0 %911  ;;  %v834_v34 = vpop.permute.xlu1 %833  ;;  %v6624_v48 = vld [vmem:[#allocation7_spill] sm:$0xff]  ;;  %2020 = vrot.lane.b32.xlu1 %v3561_v44, %s6612_s16  ;;  %s6634_s16 = sld [smem:[#allocation90_spill]] }
 0x465   : > { %v783_v49 = vmul.f32 %v776_v40, %v770_v28  ;;  %v837_v13 = vsel %vm835_vm9, %v3429_v62, %v832_v7  ;;  %v6620_v39 = vmov %v6615_v45  ;;  %v6622_v0 = vstv %s6614_s29  ;;  %s6678_s18 = sld [smem:[#allocation95_spill]] }
 0x466   : > { %v809_v15 = vmul.f32 %v6620_v39, %v796_v50  ;;  %v4322_v40 = vmul.f32 %v6622_v0, %v1558_v56  ;;  %v786_v53 = vadd.f32 %v784_v55, %v746_v5  ;;  %v810_v33 = vadd.f32 %v808_v46, %v804_v58  ;;  %v6632_v39 = vld [vmem:[#allocation38_spill] sm:$0xff]  ;;  %s4878_s29 = sld [smem:[#allocation2 + $0x4e]] }
 0x467   : > { %v785_v52 = vadd.f32 %v783_v49, %v745_v9  ;;  %v896_v62 = vrot.slane %v4298_v61, %v3801_v42  ;;  %v836_v28 = vsel %vm835_vm9, %v832_v7, %v834_v34  ;;  %v839_v56 = vsel %vm835_vm9, %v834_v34, %v6624_v48  ;;  %2138 = vrot.lane.b32.xlu0 %v3551_v43, %s6636_s12 }
 0x468   : > { %v811_v29 = vadd.f32 %v809_v15, %v4004_v27  ;;  %v900_v9 = vrot.slane %v4298_v61, %v3804_v31  ;;  %v6625_v11 = vstv %s4099_s24  ;;  %v823_v50 = vmul.f32 %v816_v32, %v810_v33  ;;  %v4345_v27 = vld [vmem:[%s6582_s20 + $0x6] ss:$8 sm:$0x3]  ;;  %v952_v33 = vpop.permute.xlu0 %951  ;;  %v874_v34 = vpop.permute.xlu1 %873  ;;  %s4366_s24 = sld [smem:[#allocation2 + $0x3b]]  ;;  %2060 = vrot.lane.b32.xlu1 %v3561_v44, %s6617_s23  ;;  %s6644_s23 = smov 96  }
 0x469   : > { %v848_v5 = vmul.f32 %v6625_v11, %v837_v13  ;;  %v6626_v10 = vstv %s6621_s10  ;;  %v6627_v46 = vmov %v6625_v11  ;;  %v877_v7 = vsel %vm875_vm10, %v3437_v3, %v872_v41  ;;  %v6631_v13 = vld [vmem:[#allocation39_spill] sm:$0xff]  ;;  %s6646_s10 = sld [smem:[#allocation91_spill]] }
 0x46a   : > { %v844_v45 = vmul.f32 %v6626_v10, %v839_v56  ;;  %v849_v49 = vmul.f32 %v6627_v46, %v836_v28  ;;  %v6629_v61 = vrot.slane %v4216_v2, %v3804_v31  ;;  %v1007_v55 = vstv %s4284_s26  ;;  %s6668_s26 = sld [smem:[#allocation69_spill]] }
 0x46b   : > { %v6630_v1 = vstv %s6623_s13  ;;  %v1665_v15 = vsel %vm1662_vm12, %v6632_v39, %v6631_v13  ;;  %vm6334_vm8 = vcmp.lt.s32.totalorder %v3811_v23, 125  ;;  %v825_v3 = vadd.f32 %v823_v50, %v785_v52  ;;  %2178 = vrot.lane.b32.xlu0 %v3551_v43, %s6644_s23  ;;  %s6768_s13 = sld [smem:[#allocation115_spill]] }
 0x46c   : > { %v824_v32 = vmul.f32 %v6629_v61, %v811_v29  ;;  %v4358_v58 = vmul.f32 %v6630_v1, %v1598_v59  ;;  %v850_v2 = vadd.f32 %v848_v5, %v844_v45  ;;  %v851_v0 = vadd.f32 %v849_v49, %v4024_v38  ;;  %v992_v49 = vpop.permute.xlu0 %991  ;;  %v6639_v1 = vld [vmem:[#allocation41_spill] sm:$0xff]  ;;  %2100 = vrot.lane.b32.xlu1 %v3561_v44, %s6628_s8  ;;  %s6653_s8 = smov 95  }
 0x46d   : > { %v876_v29 = vsel %vm875_vm10, %v872_v41, %v874_v34  ;;  %v879_v28 = vsel %vm875_vm10, %v874_v34, %v3435_v63  ;;  %v936_v52 = vrot.slane %v4345_v27, %v3801_v42  ;;  %v6633_v48 = vstv %s4126_s27  ;;  %s4489_s27 = sld [smem:[#allocation2 + $0x3e]] }
 0x46e   : > { %v826_v59 = vadd.f32 %v824_v32, %v786_v53  ;;  %v888_v56 = vmul.f32 %v6633_v48, %v877_v7  ;;  %v863_v11 = vmul.f32 %v856_v57, %v850_v2  ;;  %v864_v38 = vmul.f32 %v860_v60, %v851_v0  ;;  %v914_v7 = vpop.permute.xlu1 %913  ;;  %v6640_v2 = vld [vmem:[#allocation40_spill] sm:$0xff] }
 0x46f   : > { %v6635_v5 = vstv %s6558_s28  ;;  %v917_v41 = vsel %vm915_vm11, %v3445_v8, %v912_v30  ;;  %v6637_v53 = vmov %v6633_v48  ;;  %v940_v63 = vrot.slane %v4345_v27, %v3804_v31  ;;  %v2780_v8 = vld [vmem:[%s6582_s20 + $0x7] ss:$8 sm:$0x3]  ;;  %2218 = vrot.lane.b32.xlu0 %v3551_v43, %s6653_s8  ;;  %s6661_s28 = smov 94  }
 0x470   : > { %v884_v50 = vmul.f32 %v6635_v5, %v879_v28  ;;  %v889_v10 = vmul.f32 %v6637_v53, %v876_v29  ;;  %v1047_v57 = vstv %s4318_s25  ;;  %vm6332_vm9 = vcmp.lt.s32.totalorder %v3811_v23, 115  ;;  %2140 = vrot.lane.b32.xlu1 %v3561_v44, %s6636_s12  ;;  %s6681_s25 = sld [smem:[#allocation96_spill]] }
 0x471   : > { %v865_v60 = vadd.f32 %v863_v11, %v825_v3  ;;  %v866_v45 = vadd.f32 %v864_v38, %v826_v59  ;;  %v6638_v61 = vstv %s6634_s16  ;;  %v1705_v27 = vsel %vm6338_vm14, %v6640_v2, %v6639_v1  ;;  %s4682_s12 = sld [smem:[#allocation2 + $0x45]] }
 0x472   : > { %v890_v46 = vadd.f32 %v888_v56, %v884_v50  ;;  %v4397_v32 = vmul.f32 %v6638_v61, %v1665_v15  ;;  %v891_v0 = vadd.f32 %v889_v10, %v4039_v16  ;;  %v916_v3 = vsel %vm915_vm11, %v912_v30, %v914_v7  ;;  %s6752_s16 = sld [smem:[#allocation111_spill]] }
 0x473   : > { %v919_v34 = vsel %vm915_vm11, %v914_v7, %v3443_v4  ;;  %v6641_v59 = vstv %s4165_s5  ;;  %v6642_v28 = vstv %s3707_s11  ;;  %vm6645_vm10 = vcmp.lt.s32.totalorder %v3811_v23, 35  ;;  %v6648_v7 = vld [vmem:[#allocation8_spill] sm:$0xff]  ;;  %2258 = vrot.lane.b32.xlu0 %v3551_v43, %s6661_s28  ;;  %s6673_s5 = smov 93   ;;  %s6693_s11 = smov 82  }
 0x474   : > { %v928_v29 = vmul.f32 %v6641_v59, %v917_v41  ;;  %v903_v15 = vmul.f32 %v896_v62, %v890_v46  ;;  %v924_v48 = vmul.f32 %v6642_v28, %v919_v34  ;;  %v6643_v56 = vmov %v6641_v59  ;;  %v1032_v41 = vpop.permute.xlu0 %1031  ;;  %vm6647_vm5 = vmmov %vm6645_vm10  ;;  %2180 = vrot.lane.b32.xlu1 %v3561_v44, %s6644_s23  ;;  %s4639_s23 = sld [smem:[#allocation2 + $0x42]] }
 0x475   : > { %v929_v11 = vmul.f32 %v6643_v56, %v916_v3  ;;  %v957_v16 = vsel %vm6645_vm10, %v3453_v12, %v952_v33  ;;  %v904_v30 = vmul.f32 %v900_v9, %v891_v0  ;;  %v976_v4 = vrot.slane %v2780_v8, %v3801_v42  ;;  %v954_v12 = vpop.permute.xlu1 %953  ;;  %v2783_v9 = vld [vmem:[%s6582_s20 + $0x10] ss:$8 sm:$0x3]  ;;  %vm6649_vm10 = vmmov %vm6647_vm5 }
 0x476   : > { %v980_v62 = vrot.slane %v2780_v8, %v3804_v31  ;;  %vm6329_vm11 = vcmp.lt.s32.totalorder %v3811_v23, 114  ;;  %v905_v38 = vadd.f32 %v903_v15, %v865_v60  ;;  %v930_v5 = vadd.f32 %v928_v29, %v924_v48  ;;  %v6655_v29 = vld [vmem:[#allocation42_spill] sm:$0xff] }
 0x477   : > { %v931_v50 = vadd.f32 %v929_v11, %v4049_v18  ;;  %v1087_v53 = vstv %s4366_s24  ;;  %v906_v10 = vadd.f32 %v904_v30, %v866_v45  ;;  %v956_v46 = vsel %vm6647_vm5, %v952_v33, %v954_v12  ;;  %v6654_v45 = vld [vmem:[#allocation43_spill] sm:$0xff]  ;;  %v6656_v15 = vld [vmem:[#allocation10_spill] sm:$0xff]  ;;  %2298 = vrot.lane.b32.xlu0 %v3551_v43, %s6673_s5  ;;  %s4551_s24 = sld [smem:[#allocation2 + $0x3f]] }
 0x478   : > { %v959_v8 = vsel %vm6649_vm10, %v954_v12, %v6648_v7  ;;  %v6650_v60 = vstv %s6646_s10  ;;  %v968_v18 = vmul.f32 %v967_v54, %v957_v16  ;;  %v943_v0 = vmul.f32 %v936_v52, %v930_v5  ;;  %v1072_v11 = vpop.permute.xlu0 %1071  ;;  %2220 = vrot.lane.b32.xlu1 %v3561_v44, %s6653_s8  ;;  %s6682_s8 = smov 83   ;;  %s6757_s10 = sld [smem:[#allocation112_spill]] }
 0x479   : > { %v4439_v61 = vmul.f32 %v6650_v60, %v1705_v27  ;;  %v944_v3 = vmul.f32 %v940_v63, %v931_v50  ;;  %v6652_v34 = vstv %s6560_s17  ;;  %v1745_v33 = vsel %vm6334_vm8, %v6655_v29, %v6654_v45  ;;  %s6657_s17 = sld [smem:[#allocation68_spill]]  ;;  %v994_v30 = vpop.permute.xlu1 %993  ;;  %v6659_v50 = vld [vmem:[#allocation9_spill] sm:$0xff] }
 0x47a   : > { %v964_v59 = vmul.f32 %v6652_v34, %v959_v8  ;;  %v997_v27 = vsel %vm995_vm13, %v6656_v15, %v992_v49  ;;  %v969_v28 = vmul.f32 %v967_v54, %v956_v46  ;;  %v1016_v52 = vrot.slane %v2783_v9, %v3801_v42 }
 0x47b   : > { %6651 = vst [vmem:[#allocation37_spill] sm:$0xff] %v4439_v61  ;;  %v945_v63 = vadd.f32 %v943_v0, %v905_v38  ;;  %v946_v48 = vadd.f32 %v944_v3, %v906_v10  ;;  %v1020_v16 = vrot.slane %v2783_v9, %v3804_v31  ;;  %v996_v54 = vsel %vm995_vm13, %v992_v49, %v994_v30  ;;  %v2786_v38 = vld [vmem:[%s6582_s20 + $0x11] ss:$8 sm:$0x3]  ;;  %v6663_v49 = vld [vmem:[#allocation44_spill] sm:$0xff] }
 0x47c   : > { %v970_v56 = vadd.f32 %v968_v18, %v964_v59  ;;  %v971_v5 = vadd.f32 %v969_v28, %v4053_v20  ;;  %v999_v12 = vsel %vm995_vm13, %v994_v30, %v6659_v50  ;;  %v1127_v46 = vstv %s4409_s15  ;;  %v6662_v20 = vld [vmem:[#allocation45_spill] sm:$0xff]  ;;  %v6664_v0 = vld [vmem:[#allocation12_spill] sm:$0xff]  ;;  %v1112_v28 = vpop.permute.xlu0 %1111  ;;  %2338 = vrot.lane.b32.xlu0 %v3551_v43, %s6682_s8  ;;  %2260 = vrot.lane.b32.xlu1 %v3561_v44, %s6661_s28  ;;  %s6697_s15 = sld [smem:[#allocation97_spill]]  ;;  %s6730_s28 = smov 78  }
 0x47d   : > { %v1008_v10 = vmul.f32 %v1007_v55, %v997_v27  ;;  %v1009_v60 = vmul.f32 %v1007_v55, %v996_v54  ;;  %v1785_v18 = vsel %vm6332_vm9, %v6663_v49, %v6662_v20  ;;  %vm6665_vm13 = vcmp.lt.s32.totalorder %v3811_v23, 33  ;;  %v6670_v54 = vld [vmem:[#allocation11_spill] sm:$0xff] }
 0x47e   : > { %v983_v7 = vmul.f32 %v976_v4, %v970_v56  ;;  %v1037_v3 = vsel %vm6665_vm13, %v6664_v0, %v1032_v41  ;;  %v984_v34 = vmul.f32 %v980_v62, %v971_v5  ;;  %v6666_v55 = vstv %s6658_s9  ;;  %v1034_v56 = vpop.permute.xlu1 %1033  ;;  %vm6669_vm10 = vmmov %vm6665_vm13  ;;  %s6741_s9 = sld [smem:[#allocation107_spill]] }
 0x47f   : > { %v6660_v9 = vstv %s6657_s17  ;;  %v4493_v4 = vmul.f32 %v6666_v55, %v1745_v33  ;;  %vm6330_vm5 = vcmp.lt.s32.totalorder %v3811_v23, 113  ;;  %v1011_v27 = vadd.f32 %v1009_v60, %v4063_v47  ;;  %vm6671_vm13 = vmmov %vm6669_vm10  ;;  %v2789_v47 = vld [vmem:[%s6582_s20 + $0x12] ss:$8 sm:$0x3]  ;;  %s6677_s17 = sld [smem:[#allocation70_spill]] }
 0x480   : > { %v1004_v8 = vmul.f32 %v6660_v9, %v999_v12  ;;  %v985_v59 = vadd.f32 %v983_v7, %v945_v63  ;;  %v1056_v62 = vrot.slane %v2786_v38, %v3801_v42  ;;  %v986_v30 = vadd.f32 %v984_v34, %v946_v48  ;;  %v6674_v48 = vld [vmem:[#allocation47_spill] sm:$0xff]  ;;  %v1152_v55 = vpop.permute.xlu0 %1151  ;;  %2378 = vrot.lane.b32.xlu0 %v3551_v43, %s6693_s11 }
 0x481   : > { %6667 = vst [vmem:[#allocation36_spill] sm:$0xff] %v4493_v4  ;;  %v1060_v5 = vrot.slane %v2786_v38, %v3804_v31  ;;  %v1036_v33 = vsel %vm6669_vm10, %v1032_v41, %v1034_v56  ;;  %v1039_v50 = vsel %vm6671_vm13, %v1034_v56, %v6670_v54  ;;  %v1048_v63 = vmul.f32 %v1047_v57, %v1037_v3  ;;  %v6675_v38 = vld [vmem:[#allocation46_spill] sm:$0xff]  ;;  %v6679_v54 = vld [vmem:[#allocation13_spill] sm:$0xff] }
 0x482   : > { %v1010_v15 = vadd.f32 %v1008_v10, %v1004_v8  ;;  %v1024_v10 = vmul.f32 %v1020_v16, %v1011_v27  ;;  %v6672_v7 = vstv %s6668_s26  ;;  %v1825_v41 = vsel %vm6329_vm11, %v6675_v38, %v6674_v48  ;;  %v6676_v8 = vld [vmem:[#allocation14_spill] sm:$0xff]  ;;  %v1074_v27 = vpop.permute.xlu1 %1073  ;;  %s6687_s26 = sld [smem:[#allocation73_spill]]  ;;  %2300 = vrot.lane.b32.xlu1 %v3561_v44, %s6673_s5  ;;  %s6699_s5 = smov 81  }
 0x483   : > { %v1044_v9 = vmul.f32 %v6672_v7, %v1039_v50  ;;  %v1077_v60 = vsel %vm1075_vm15, %v6676_v8, %v1072_v11  ;;  %v1049_v0 = vmul.f32 %v1047_v57, %v1036_v33  ;;  %vm6331_vm10 = vcmp.lt.s32.totalorder %v3811_v23, 112  ;;  %v5017_v48 = vld [vmem:[%s6582_s20 + $0x37] ss:$8 sm:$0x3] }
 0x484   : > { %v1023_v12 = vmul.f32 %v1016_v52, %v1010_v15  ;;  %v1167_v52 = vstv %s4459_s6  ;;  %v1026_v3 = vadd.f32 %v1024_v10, %v986_v30  ;;  %v1096_v15 = vrot.slane %v2789_v47, %v3801_v42  ;;  %2418 = vrot.lane.b32.xlu0 %v3551_v43, %s6699_s5  ;;  %s6714_s6 = smov 79   ;;  %6805 = vst [vmem:[#allocation136_spill] sm:$0xff] %v5017_v48 }
 0x485   : > { %v1050_v34 = vadd.f32 %v1048_v63, %v1044_v9  ;;  %v1051_v56 = vadd.f32 %v1049_v0, %v4067_v51  ;;  %v1100_v57 = vrot.slane %v2789_v47, %v3804_v31  ;;  %v1076_v33 = vsel %vm1075_vm15, %v1072_v11, %v1074_v27  ;;  %v2792_v51 = vld [vmem:[%s6582_s20 + $0x13] ss:$8 sm:$0x3]  ;;  %v6683_v11 = vld [vmem:[#allocation16_spill] sm:$0xff] }
 0x486   : > { %v1025_v16 = vadd.f32 %v1023_v12, %v985_v59  ;;  %v1079_v59 = vsel %vm1075_vm15, %v1074_v27, %v6679_v54  ;;  %v1088_v30 = vmul.f32 %v1087_v53, %v1077_v60  ;;  %v6680_v63 = vstv %s6677_s17  ;;  %s6696_s17 = sld [smem:[#allocation74_spill]]  ;;  %2340 = vrot.lane.b32.xlu1 %v3561_v44, %s6682_s8 }
 0x487   : > { %v1063_v50 = vmul.f32 %v1056_v62, %v1050_v34  ;;  %v1084_v12 = vmul.f32 %v6680_v63, %v1079_v59  ;;  %v1089_v10 = vmul.f32 %v1087_v53, %v1076_v33  ;;  %vm6684_vm13 = vcmp.lt.s32.totalorder %v3811_v23, 31  ;;  %v1192_v34 = vpop.permute.xlu0 %1191  ;;  %v6690_v59 = vld [vmem:[#allocation15_spill] sm:$0xff]  ;;  %s4627_s8 = sld [smem:[#allocation2 + $0x41]] }
 0x488   : > { %v1117_v47 = vsel %vm6684_vm13, %v6683_v11, %v1112_v28  ;;  %v1064_v7 = vmul.f32 %v1060_v5, %v1051_v56  ;;  %v1207_v62 = vstv %s4489_s27  ;;  %v6685_v53 = vstv %s6678_s18  ;;  %v1114_v5 = vpop.permute.xlu1 %1113  ;;  %vm6691_vm11 = vmmov %vm6684_vm13  ;;  %s6711_s27 = sld [smem:[#allocation98_spill]] }
 0x489   : > { %v4555_v9 = vmul.f32 %v6685_v53, %v1785_v18  ;;  %vm6333_vm15 = vcmp.lt.s32.totalorder %v3811_v23, 111  ;;  %v1065_v8 = vadd.f32 %v1063_v50, %v1025_v16  ;;  %v1090_v60 = vadd.f32 %v1088_v30, %v1084_v12  ;;  %s6724_s18 = sld [smem:[#allocation103_spill]] }
 0x48a   : > { %v1091_v0 = vadd.f32 %v1089_v10, %v4079_v19  ;;  %v6688_v27 = vstv %s6681_s25  ;;  %v1066_v33 = vadd.f32 %v1064_v7, %v1026_v3  ;;  %v1136_v54 = vrot.slane %v2792_v51, %v3801_v42  ;;  %v2795_v19 = vld [vmem:[%s6582_s20 + $0x14] ss:$8 sm:$0x3]  ;;  %v6695_v10 = vld [vmem:[#allocation48_spill] sm:$0xff]  ;;  %2380 = vrot.lane.b32.xlu1 %v3561_v44, %s6693_s11  ;;  %s4675_s11 = sld [smem:[#allocation2 + $0x44]] }
 0x48b   : > { %6686 = vst [vmem:[#allocation7_spill] sm:$0xff] %v4555_v9  ;;  %v4561_v56 = vmul.f32 %v6688_v27, %v1825_v41  ;;  %v1116_v18 = vsel %vm6684_vm13, %v1112_v28, %v1114_v5  ;;  %v1119_v63 = vsel %vm6691_vm11, %v1114_v5, %v6690_v59  ;;  %v1128_v16 = vmul.f32 %v1127_v46, %v1117_v47  ;;  %v6694_v3 = vld [vmem:[#allocation49_spill] sm:$0xff]  ;;  %s4733_s25 = sld [smem:[#allocation2 + $0x48]] }
 0x48c   : > { %v1103_v30 = vmul.f32 %v1096_v15, %v1090_v60  ;;  %v1104_v50 = vmul.f32 %v1100_v57, %v1091_v0  ;;  %v6692_v41 = vstv %s6687_s26  ;;  %v1865_v28 = vsel %vm6330_vm5, %v6695_v10, %v6694_v3  ;;  %v1232_v60 = vpop.permute.xlu0 %1231  ;;  %v1154_v5 = vpop.permute.xlu1 %1153  ;;  %s4614_s26 = sld [smem:[#allocation2 + $0x40]] }
 0x48d   : > { %6689 = vst [vmem:[#allocation39_spill] sm:$0xff] %v4561_v56  ;;  %v1124_v12 = vmul.f32 %v6692_v41, %v1119_v63  ;;  %v1157_v11 = vsel %vm1155_vm1, %v3493_v22, %v1152_v55  ;;  %v1140_v7 = vrot.slane %v2792_v51, %v3804_v31  ;;  %v1129_v47 = vmul.f32 %v1127_v46, %v1116_v18  ;;  %v5028_v56 = vld [vmem:[%s6582_s20 + $0x40] ss:$8 sm:$0x3] }
 0x48e   : > { %vm6336_vm11 = vcmp.lt.s32.totalorder %v3811_v23, 110  ;;  %v1105_v15 = vadd.f32 %v1103_v30, %v1065_v8  ;;  %v1106_v57 = vadd.f32 %v1104_v50, %v1066_v33  ;;  %v1176_v0 = vrot.slane %v2795_v19, %v3801_v42  ;;  %v6703_v30 = vld [vmem:[#allocation50_spill] sm:$0xff]  ;;  %2420 = vrot.lane.b32.xlu1 %v3561_v44, %s6699_s5  ;;  %s6722_s5 = sld [smem:[#allocation102_spill]]  ;;  %6806 = vst [vmem:[#allocation137_spill] sm:$0xff] %v5028_v56 }
 0x48f   : > { %v1130_v53 = vadd.f32 %v1128_v16, %v1124_v12  ;;  %vm6335_vm13 = vcmp.lt.s32.totalorder %v3811_v23, 109  ;;  %v1131_v22 = vadd.f32 %v1129_v47, %v4083_v14  ;;  %v1180_v46 = vrot.slane %v2795_v19, %v3804_v31  ;;  %v2798_v14 = vld [vmem:[%s6582_s20 + $0x15] ss:$8 sm:$0x3]  ;;  %v6702_v16 = vld [vmem:[#allocation51_spill] sm:$0xff] }
 0x490   : > { %v1156_v51 = vsel %vm1155_vm1, %v1152_v55, %v1154_v5  ;;  %v1159_v8 = vsel %vm1155_vm1, %v1154_v5, %v3491_v21  ;;  %v1168_v27 = vmul.f32 %v1167_v52, %v1157_v11  ;;  %v6698_v18 = vstv %s6696_s17  ;;  %v6704_v11 = vld [vmem:[#allocation129_spill] sm:$0xff]  ;;  %v1194_v47 = vpop.permute.xlu1 %1193  ;;  %s6707_s17 = smov 80  }
 0x491   : > { %v1143_v33 = vmul.f32 %v1136_v54, %v1130_v53  ;;  %v1164_v59 = vmul.f32 %v6698_v18, %v1159_v8  ;;  %v1169_v63 = vmul.f32 %v1167_v52, %v1156_v51  ;;  %vm6337_vm5 = vcmp.lt.s32.totalorder %v3811_v23, 99  ;;  %v2801_v51 = vld [vmem:[%s6582_s20 + $0x16] ss:$8 sm:$0x3]  ;;  %2458 = vrot.lane.b32.xlu0 %v3551_v43, %s6707_s17  ;;  %6731 = sst [smem:[#allocation75_spill]] %s4733_s25 }
 0x492   : > { %v1197_v55 = vsel %vm1195_vm2, %v3502_v25, %v1192_v34  ;;  %v1144_v19 = vmul.f32 %v1140_v7, %v1131_v22  ;;  %v1247_v21 = vstv %s4551_s24  ;;  %v6700_v52 = vstv %s6697_s15  ;;  %v4625_v7 = vpop.permute.xlu0 %1271  ;;  %v6705_v22 = vld [vmem:[#allocation17_spill] sm:$0xff]  ;;  %s4720_s24 = sld [smem:[#allocation2 + $0x47]]  ;;  %2460 = vrot.lane.b32.xlu1 %v3561_v44, %s6707_s17 }
 0x493   : > { %v4618_v54 = vmul.f32 %v6700_v52, %v1865_v28  ;;  %v1905_v50 = vsel %vm6331_vm10, %v6703_v30, %v6702_v16  ;;  %v1145_v41 = vadd.f32 %v1143_v33, %v1105_v15  ;;  %v1170_v12 = vadd.f32 %v1168_v27, %v1164_v59  ;;  %v6709_v59 = vld [vmem:[#allocation52_spill] sm:$0xff]  ;;  %s4789_s17 = sld [smem:[#allocation2 + $0x4a]]  ;;  %v4940_v16 = vld [vmem:[%s6582_s20 + $0x33] ss:$8 sm:$0x3] }
 0x494   : > { %v1171_v25 = vadd.f32 %v1169_v63, %v6704_v11  ;;  %vm6339_vm1 = vcmp.lt.s32.totalorder %v3811_v23, 98  ;;  %v1146_v28 = vadd.f32 %v1144_v19, %v1106_v57  ;;  %v1216_v53 = vrot.slane %v2798_v14, %v3801_v42  ;;  %v6710_v19 = vld [vmem:[#allocation19_spill] sm:$0xff]  ;;  %s4807_s15 = sld [smem:[#allocation2 + $0x4b]]  ;;  %6784 = vst [vmem:[#allocation15_spill] sm:$0xff] %v4940_v16  ;;  %v6791_v30 = vld [vmem:[#allocation119_spill] sm:$0xff] }
 0x495   : > { %6701 = vst [vmem:[#allocation38_spill] sm:$0xff] %v4618_v54  ;;  %v1196_v5 = vsel %vm1195_vm2, %v1192_v34, %v1194_v47  ;;  %v1199_v15 = vsel %vm1195_vm2, %v1194_v47, %v6705_v22  ;;  %vm6340_vm10 = vcmp.lt.s32.totalorder %v3811_v23, 97  ;;  %v1208_v57 = vmul.f32 %v1207_v62, %v1197_v55  ;;  %v6708_v34 = vld [vmem:[#allocation53_spill] sm:$0xff]  ;;  %v1234_v22 = vpop.permute.xlu1 %1233  ;;  %2498 = vrot.lane.b32.xlu0 %v3551_v43, %s6714_s6  ;;  %s5085_s25 = sld [smem:[#allocation2 + $0x58]] }
 0x496   : > { %v1183_v8 = vmul.f32 %v1176_v0, %v1170_v12  ;;  %v1184_v27 = vmul.f32 %v1180_v46, %v1171_v25  ;;  %v6706_v33 = vstv %s3737_s19  ;;  %v1945_v63 = vsel %vm6333_vm15, %v6709_v59, %v6708_v34  ;;  %s4661_s19 = sld [smem:[#allocation2 + $0x43]]  ;;  %v4664_v25 = vpop.permute.xlu0 %1311  ;;  %2500 = vrot.lane.b32.xlu1 %v3561_v44, %s6714_s6  ;;  %v4952_v59 = vld [vmem:[%s6582_s20 + $0x34] ss:$8 sm:$0x3] }
 0x497   : > { %v1204_v18 = vmul.f32 %v6706_v33, %v1199_v15  ;;  %vm2182_vm2 = vcmp.lt.s32.totalorder %v3811_v23, 96  ;;  %v1237_v52 = vsel %vm1235_vm3, %v6710_v19, %v1232_v60  ;;  %v1220_v55 = vrot.slane %v2798_v14, %v3804_v31  ;;  %v6712_v15 = vld [vmem:[#allocation18_spill] sm:$0xff]  ;;  %s6763_s6 = sld [smem:[#allocation84_spill]]  ;;  %6785 = vst [vmem:[#allocation129_spill] sm:$0xff] %v4952_v59 }
 0x498   : > { %v1209_v0 = vmul.f32 %v1207_v62, %v1196_v5  ;;  %vm2222_vm9 = vcmp.lt.s32.totalorder %v3811_v23, 95  ;;  %v1185_v46 = vadd.f32 %v1183_v8, %v1145_v41  ;;  %v1186_v12 = vadd.f32 %v1184_v27, %v1146_v28  ;;  %6725 = sst [smem:[#allocation67_spill]] %s4720_s24  ;;  %v5048_v59 = vld [vmem:[%s6582_s20 + $0x41] ss:$8 sm:$0x3] }
 0x499   : > { %v1210_v11 = vadd.f32 %v1208_v57, %v1204_v18  ;;  %v1256_v47 = vrot.slane %v2801_v51, %v3801_v42  ;;  %vm2262_vm15 = vcmp.lt.s32.totalorder %v3811_v23, 94  ;;  %v1260_v14 = vrot.slane %v2801_v51, %v3804_v31  ;;  %2538 = vrot.lane.b32.xlu0 %v3551_v43, %s6730_s28  ;;  %6742 = sst [smem:[#allocation78_spill]] %s4789_s17  ;;  %6811 = vst [vmem:[#allocation140_spill] sm:$0xff] %v5048_v59  ;;  %v6821_v59 = vld [vmem:[#allocation21_spill] sm:$0xff] }
 0x49a   : > { %v1211_v62 = vadd.f32 %v1209_v0, %v4142_v37  ;;  %v1236_v5 = vsel %vm1235_vm3, %v1232_v60, %v1234_v22  ;;  %v1239_v41 = vsel %vm1235_vm3, %v1234_v22, %v6712_v15  ;;  %vm2302_vm8 = vcmp.lt.s32.totalorder %v3811_v23, 93  ;;  %v6715_v37 = vld [vmem:[#allocation55_spill] sm:$0xff]  ;;  %v6716_v60 = vld [vmem:[#allocation54_spill] sm:$0xff]  ;;  %v6720_v0 = vld [vmem:[#allocation56_spill] sm:$0xff]  ;;  %6749 = sst [smem:[#allocation79_spill]] %s4807_s15  ;;  %2540 = vrot.lane.b32.xlu1 %v3561_v44, %s6730_s28 }
 0x49b   : > { %v1248_v28 = vmul.f32 %v1247_v21, %v1237_v52  ;;  %v1223_v57 = vmul.f32 %v1216_v53, %v1210_v11  ;;  %v6713_v8 = vstv %s6578_s1  ;;  %v1249_v33 = vmul.f32 %v1247_v21, %v1236_v5  ;;  %v6719_v21 = vld [vmem:[#allocation57_spill] sm:$0xff]  ;;  %s6721_s1 = sld [smem:[#allocation101_spill]] }
 0x49c   : > { %v1244_v27 = vmul.f32 %v6713_v8, %v1239_v41  ;;  %v1985_v51 = vsel %vm6336_vm11, %v6716_v60, %v6715_v37  ;;  %v1224_v19 = vmul.f32 %v1220_v55, %v1211_v62  ;;  %v6717_v53 = vstv %s6711_s27  ;;  %v4701_v41 = vpop.permute.xlu0 %1351  ;;  %v4706_v55 = vld [vmem:[%s6582_s20 + $0x17] ss:$8 sm:$0x3]  ;;  %s4710_s27 = sld [smem:[#allocation2 + $0x46]] }
 0x49d   : > { %v4693_v52 = vmul.f32 %v6717_v53, %v1905_v50  ;;  %v2025_v11 = vsel %vm6335_vm13, %v6720_v0, %v6719_v21  ;;  %vm2342_vm3 = vcmp.lt.s32.totalorder %v3811_v23, 83  ;;  %v1225_v22 = vadd.f32 %v1223_v57, %v1185_v46  ;;  %v4708_v50 = vpop.permute.xlu1 %1273  ;;  %v4860_v21 = vld [vmem:[%s6582_s20 + $0x26] ss:$8 sm:$0x3]  ;;  %s6777_s28 = sld [smem:[#allocation116_spill]] }
 0x49e   : > { %v1250_v5 = vadd.f32 %v1248_v28, %v1244_v27  ;;  %v1251_v15 = vadd.f32 %v1249_v33, %v4146_v35  ;;  %vm2382_vm13 = vcmp.lt.s32.totalorder %v3811_v23, 82  ;;  %v1226_v62 = vadd.f32 %v1224_v19, %v1186_v12  ;;  %v4718_v35 = vld [vmem:[%s6582_s20 + $0x20] ss:$8 sm:$0x3]  ;;  %v6729_v33 = vld [vmem:[#allocation58_spill] sm:$0xff]  ;;  %s4954_s17 = sld [smem:[#allocation2 + $0x52]] }
 0x49f   : > { %6718 = vst [vmem:[#allocation41_spill] sm:$0xff] %v4693_v52  ;;  %v6728_v27 = vld [vmem:[#allocation59_spill] sm:$0xff]  ;;  %vm2422_vm11 = vcmp.lt.s32.totalorder %v3811_v23, 81  ;;  %v6732_v28 = vstv %s6722_s5  ;;  %s6738_s5 = sld [smem:[#allocation104_spill]]  ;;  %vm2502_vm14 = vcmp.lt.s32.totalorder %v3811_v23, 79  ;;  %v6765_v60 = vstv %s6752_s16 }
 0x4a0   : > { %v2065_v53 = vsel %vm6337_vm5, %v6729_v33, %v6728_v27  ;;  %v1263_v12 = vmul.f32 %v1256_v47, %v1250_v5  ;;  %v1264_v19 = vmul.f32 %v1260_v14, %v1251_v15  ;;  %v4737_v46 = vmul.f32 %v6732_v28, %v1985_v51  ;;  %v4749_v14 = vld [vmem:[%s6582_s20 + $0x21] ss:$8 sm:$0x3]  ;;  %v6736_v51 = vld [vmem:[#allocation61_spill] sm:$0xff]  ;;  %v4765_v18 = vpop.permute.xlu0 %1391  ;;  %s6783_s16 = sld [smem:[#allocation117_spill]] }
 0x4a1   : > { %v6726_v57 = vstv %s6721_s1  ;;  %v6734_v5 = vstv %s6724_s18  ;;  %v6737_v28 = vld [vmem:[#allocation60_spill] sm:$0xff]  ;;  %vm2462_vm5 = vcmp.lt.s32.totalorder %v3811_v23, 80  ;;  %v6745_v33 = vld [vmem:[#allocation72_spill] sm:$0xff]  ;;  %s6747_s1 = smov 77   ;;  %s6748_s18 = sld [smem:[#allocation110_spill]]  ;;  %v6767_v37 = vstv %s6757_s10 }
 0x4a2   : > { %6723 = sst [smem:[#allocation64_spill]] %s4710_s27  ;;  %v4724_v8 = vmul.f32 %v6726_v57, %v1945_v63  ;;  %6733 = vst [vmem:[#allocation8_spill] sm:$0xff] %v4737_v46  ;;  %v4753_v15 = vmul.f32 %v6734_v5, %v2025_v11  ;;  %v2105_v63 = vsel %vm6339_vm1, %v6737_v28, %v6736_v51  ;;  %v4761_v57 = vadd.f32 %v1263_v12, %v1225_v22  ;;  %v4769_v5 = vpop.permute.xlu1 %1313  ;;  %v4774_v51 = vld [vmem:[%s6582_s20 + $0x22] ss:$8 sm:$0x3] }
 0x4a3   : > { %v4763_v47 = vadd.f32 %v1264_v19, %v1226_v62  ;;  %v6739_v28 = vld [vmem:[#allocation66_spill] sm:$0xff]  ;;  %vm6380_vm1 = vcmp.lt.s32.totalorder %v3811_v23, 78  ;;  %v6746_v46 = vld [vmem:[#allocation71_spill] sm:$0xff]  ;;  %2578 = vrot.lane.b32.xlu0 %v3551_v43, %s6747_s1  ;;  %v6753_v62 = vstv %s6741_s9  ;;  %s4844_s9 = sld [smem:[#allocation2 + $0x4c]]  ;;  %v6786_v34 = vstv %s6777_s28  ;;  %2580 = vrot.lane.b32.xlu1 %v3561_v44, %s6747_s1 }
 0x4a4   : > { %6727 = vst [vmem:[#allocation40_spill] sm:$0xff] %v4724_v8  ;;  %6735 = vst [vmem:[#allocation43_spill] sm:$0xff] %v4753_v15  ;;  %v6740_v15 = vld [vmem:[#allocation65_spill] sm:$0xff]  ;;  %v4787_v19 = vld [vmem:[%s6582_s20 + $0x23] ss:$8 sm:$0x3]  ;;  %v4832_v8 = vpop.permute.xlu0 %1431  ;;  %v6837_v4 = vstv %s6581_s21  ;;  %v6860_v20 = vstv %s3761_s4 }
 0x4a5   : > { %v2145_v22 = vsel %vm6340_vm10, %v6740_v15, %v6739_v28  ;;  %v6743_v11 = vstv %s6738_s5  ;;  %v2185_v28 = vsel %vm2182_vm2, %v6746_v46, %v6745_v33  ;;  %vm6373_vm10 = vcmp.lt.s32.totalorder %v3811_v23, 77  ;;  %v6751_v15 = vld [vmem:[#allocation76_spill] sm:$0xff]  ;;  %s4862_s5 = sld [smem:[#allocation2 + $0x4d]]  ;;  %v4876_v12 = vld [vmem:[%s6582_s20 + $0x27] ss:$8 sm:$0x3] }
 0x4a6   : > { %v4793_v27 = vmul.f32 %v6743_v11, %v2065_v53  ;;  %v6750_v11 = vld [vmem:[#allocation77_spill] sm:$0xff]  ;;  %v4826_v46 = vmul.f32 %v6753_v62, %v2105_v63  ;;  %v4834_v43 = vpop.permute.xlu1 %1353  ;;  %s4899_s10 = sld [smem:[#allocation2 + $0x4f]] }
 0x4a7   : > { %v2225_v33 = vsel %vm2222_vm9, %v6751_v15, %v6750_v11  ;;  %v4822_v53 = vld [vmem:[%s6582_s20 + $0x24] ss:$8 sm:$0x3]  ;;  %v6755_v11 = vld [vmem:[#allocation83_spill] sm:$0xff]  ;;  %v6759_v62 = vstv %s6748_s18  ;;  %s6787_s24 = sld [smem:[#allocation120_spill]] }
 0x4a8   : > { %6744 = vst [vmem:[#allocation42_spill] sm:$0xff] %v4793_v27  ;;  %6754 = vst [vmem:[#allocation10_spill] sm:$0xff] %v4826_v46  ;;  %v6756_v15 = vld [vmem:[#allocation82_spill] sm:$0xff]  ;;  %v4848_v46 = vmul.f32 %v6759_v62, %v2145_v22  ;;  %v4866_v22 = vmul.f32 %v6765_v60, %v2185_v28  ;;  %v6770_v60 = vld [vmem:[#allocation94_spill] sm:$0xff]  ;;  %s4977_s18 = sld [smem:[#allocation2 + $0x53]] }
 0x4a9   : > { %v2265_v27 = vsel %vm2262_vm15, %v6756_v15, %v6755_v11  ;;  %v4842_v63 = vld [vmem:[%s6582_s20 + $0x25] ss:$8 sm:$0x3]  ;;  %6758 = sst [smem:[#allocation80_spill]] %s4844_s9  ;;  %v6762_v15 = vld [vmem:[#allocation86_spill] sm:$0xff]  ;;  %v6771_v28 = vld [vmem:[#allocation93_spill] sm:$0xff] }
 0x4aa   : > { %6760 = vst [vmem:[#allocation9_spill] sm:$0xff] %v4848_v46  ;;  %v6761_v11 = vld [vmem:[#allocation87_spill] sm:$0xff]  ;;  %6766 = vst [vmem:[#allocation44_spill] sm:$0xff] %v4866_v22  ;;  %v4882_v46 = vmul.f32 %v6767_v37, %v2225_v33  ;;  %v2345_v62 = vsel %vm2342_vm3, %v6771_v28, %v6770_v60  ;;  %v4897_v37 = vld [vmem:[%s6582_s20 + $0x31] ss:$8 sm:$0x3]  ;;  %v6773_v33 = vstv %s6763_s6  ;;  %v4911_v52 = vpop.permute.xlu1 %1393 }
 0x4ab   : > { %v2305_v0 = vsel %vm2302_vm8, %v6762_v15, %v6761_v11  ;;  %6764 = sst [smem:[#allocation81_spill]] %s4862_s5  ;;  %6772 = vst [vmem:[#allocation11_spill] sm:$0xff] %v4897_v37  ;;  %v6775_v60 = vld [vmem:[#allocation100_spill] sm:$0xff]  ;;  %v6776_v28 = vld [vmem:[#allocation99_spill] sm:$0xff]  ;;  %v4909_v15 = vpop.permute.xlu0 %1471  ;;  %v6859_v37 = vstv %s4661_s19 }
 0x4ac   : > { %6769 = vst [vmem:[#allocation12_spill] sm:$0xff] %v4882_v46  ;;  %v4903_v46 = vmul.f32 %v6773_v33, %v2265_v27  ;;  %v2385_v22 = vsel %vm2382_vm13, %v6776_v28, %v6775_v60  ;;  %v4920_v27 = vld [vmem:[%s6582_s20 + $0x32] ss:$8 sm:$0x3]  ;;  %s4922_s6 = sld [smem:[#allocation2 + $0x50]]  ;;  %v6779_v33 = vstv %s6768_s13 }
 0x4ad   : > { %6778 = vst [vmem:[#allocation13_spill] sm:$0xff] %v4920_v27  ;;  %v4926_v60 = vmul.f32 %v6779_v33, %v2305_v0  ;;  %v6781_v28 = vld [vmem:[#allocation106_spill] sm:$0xff]  ;;  %s4942_s13 = sld [smem:[#allocation2 + $0x51]]  ;;  %v6792_v33 = vld [vmem:[#allocation118_spill] sm:$0xff] }
 0x4ae   : > { %6774 = vst [vmem:[#allocation14_spill] sm:$0xff] %v4903_v46  ;;  %v6782_v46 = vld [vmem:[#allocation105_spill] sm:$0xff]  ;;  %v2505_v11 = vsel %vm2502_vm14, %v6792_v33, %v6791_v30  ;;  %v4989_v30 = vpop.permute.xlu1 %1433  ;;  %s6798_s1 = sld [smem:[#allocation121_spill]] }
 0x4af   : > { %6780 = vst [vmem:[#allocation16_spill] sm:$0xff] %v4926_v60  ;;  %v2425_v54 = vsel %vm2422_vm11, %v6782_v46, %v6781_v28  ;;  %v4958_v28 = vmul.f32 %v6786_v34, %v2345_v62  ;;  %v6789_v46 = vld [vmem:[#allocation114_spill] sm:$0xff]  ;;  %v6790_v60 = vld [vmem:[#allocation113_spill] sm:$0xff]  ;;  %v6794_v62 = vstv %s6783_s16  ;;  %v4987_v44 = vpop.permute.xlu0 %1511  ;;  %s6799_s27 = sld [smem:[#allocation122_spill]] }
 0x4b0   : > { %v2465_v0 = vsel %vm2462_vm5, %v6790_v60, %v6789_v46  ;;  %v4975_v34 = vld [vmem:[%s6582_s20 + $0x35] ss:$8 sm:$0x3]  ;;  %v4981_v60 = vmul.f32 %v6794_v62, %v2385_v22  ;;  %v4997_v22 = vld [vmem:[%s6582_s20 + $0x36] ss:$8 sm:$0x3]  ;;  %v6801_v62 = vstv %s6787_s24 }
 0x4b1   : > { %6788 = vst [vmem:[#allocation17_spill] sm:$0xff] %v4958_v28  ;;  %6793 = vst [vmem:[#allocation19_spill] sm:$0xff] %v4975_v34  ;;  %v6796_v46 = vld [vmem:[#allocation125_spill] sm:$0xff]  ;;  %v6797_v28 = vld [vmem:[#allocation124_spill] sm:$0xff]  ;;  %s4999_s16 = sld [smem:[#allocation2 + $0x54]]  ;;  %v1276_v34 = vsel %vm1275_vm4, %v4625_v7, %v4708_v50 }
 0x4b2   : > { %6795 = vst [vmem:[#allocation18_spill] sm:$0xff] %v4981_v60  ;;  %v2545_v33 = vsel %vm6380_vm1, %v6797_v28, %v6796_v46  ;;  %6800 = vst [vmem:[#allocation134_spill] sm:$0xff] %v4997_v22  ;;  %v5003_v28 = vmul.f32 %v6801_v62, %v2425_v54  ;;  %v6803_v46 = vld [vmem:[#allocation128_spill] sm:$0xff]  ;;  %v6804_v60 = vld [vmem:[#allocation127_spill] sm:$0xff]  ;;  %s5019_s24 = sld [smem:[#allocation2 + $0x55]]  ;;  %v1277_v22 = vsel %vm1275_vm4, %v6821_v59, %v4625_v7 }
 0x4b3   : > { %v2585_v3 = vsel %vm6373_vm10, %v6804_v60, %v6803_v46  ;;  %s5030_s5 = sld [smem:[#allocation2 + $0x56]]  ;;  %v5083_v54 = vld [vmem:[%s6582_s20 + $0x43] ss:$8 sm:$0x3]  ;;  %v6835_v7 = vld [vmem:[#allocation25_spill] sm:$0xff] }
 0x4b4   : > { %6802 = vst [vmem:[#allocation135_spill] sm:$0xff] %v5003_v28  ;;  %v6807_v10 = vstv %s6798_s1  ;;  %s5050_s28 = sld [smem:[#allocation2 + $0x57]]  ;;  %6817 = vst [vmem:[#allocation144_spill] sm:$0xff] %v5083_v54  ;;  %v5097_v28 = vld [vmem:[%s6582_s20 + $0x44] ss:$8 sm:$0x3]  ;;  %v6828_v54 = vstv %s4614_s26 }
 0x4b5   : > { %v5034_v9 = vmul.f32 %v6807_v10, %v2465_v0  ;;  %v6809_v60 = vstv %s6799_s27  ;;  %v6812_v10 = vstv %s3974_s3  ;;  %6818 = vst [vmem:[#allocation145_spill] sm:$0xff] %v5097_v28  ;;  %v6819_v62 = vld [vmem:[#allocation20_spill] sm:$0xff]  ;;  %s5142_s15 = sld [smem:[#allocation2 + $0x5a]]  ;;  %v6829_v28 = vmov %v6828_v54 }
 0x4b6   : > { %v5038_v46 = vmul.f32 %v6809_v60, %v2505_v11  ;;  %v5054_v0 = vmul.f32 %v6812_v10, %v2545_v33  ;;  %v5056_v11 = vpop.permute.xlu0 %1551  ;;  %v5058_v60 = vpop.permute.xlu1 %1473  ;;  %v6815_v33 = vstv %s3990_s2  ;;  %s5113_s2 = sld [smem:[#allocation2 + $0x59]]  ;;  %v1289_v16 = vmul.f32 %v6829_v28, %v1276_v34  ;;  %v6833_v34 = vld [vmem:[#allocation24_spill] sm:$0xff] }
 0x4b7   : > { %6808 = vst [vmem:[#allocation138_spill] sm:$0xff] %v5034_v9  ;;  %v5072_v10 = vmul.f32 %v6815_v33, %v2585_v3  ;;  %v5111_v9 = vld [vmem:[%s6582_s20 + $0x45] ss:$8 sm:$0x3]  ;;  %v6823_v3 = vstv %s6580_s0  ;;  %s5167_s0 = sld [smem:[#allocation2 + $0x5b]] }
 0x4b8   : > { %6810 = vst [vmem:[#allocation139_spill] sm:$0xff] %v5038_v46  ;;  %6813 = vst [vmem:[#allocation141_spill] sm:$0xff] %v5054_v0  ;;  %v5068_v46 = vld [vmem:[%s6582_s20 + $0x42] ss:$8 sm:$0x3]  ;;  %s6871_s4 = sld [smem:[#allocation64_spill]] }
 0x4b9   : > { %6814 = vst [vmem:[#allocation142_spill] sm:$0xff] %v5068_v46  ;;  %6816 = vst [vmem:[#allocation143_spill] sm:$0xff] %v5072_v10  ;;  %v1279_v10 = vsel %vm1275_vm4, %v4708_v50, %v6819_v62  ;;  %v5140_v33 = vld [vmem:[%s6582_s20 + $0x46] ss:$8 sm:$0x3]  ;;  %vm6825_vm4 = vcmp.lt.s32.totalorder %v3811_v23, 17  ;;  %v1288_v46 = vmul.f32 %v6828_v54, %v1277_v22 }
 0x4ba   : > { %6820 = vst [vmem:[#allocation20_spill] sm:$0xff] %v5111_v9  ;;  %v5115_v0 = vpop.permute.xlu0 %1591  ;;  %v5117_v56 = vpop.permute.xlu1 %1513  ;;  %6822 = vst [vmem:[#allocation21_spill] sm:$0xff] %v5140_v33  ;;  %v1284_v59 = vmul.f32 %v6823_v3, %v1279_v10  ;;  %v5154_v50 = vld [vmem:[%s6582_s20 + $0x47] ss:$8 sm:$0x3]  ;;  %v1316_v48 = vsel %vm6825_vm4, %v4664_v25, %v4769_v5  ;;  %v6826_v62 = vld [vmem:[#allocation22_spill] sm:$0xff] }
 0x4bb   : > { %6824 = vst [vmem:[#allocation146_spill] sm:$0xff] %v5154_v50  ;;  %vm6827_vm10 = vmmov %vm6825_vm4  ;;  %v5184_v3 = vld [vmem:[%s6582_s20 + $0x50] ss:$8 sm:$0x3]  ;;  %v6831_v22 = vld [vmem:[#allocation23_spill] sm:$0xff]  ;;  %s5421_s1 = sld [smem:[#allocation2 + $0x5f]] }
 0x4bc   : > { %v1319_v10 = vsel %vm6827_vm10, %v4769_v5, %v6826_v62  ;;  %6830 = vst [vmem:[#allocation22_spill] sm:$0xff] %v5184_v3  ;;  %vm6832_vm10 = vmmov %vm6825_vm4  ;;  %vm6834_vm4 = vcmp.lt.s32.totalorder %v3811_v23, 16  ;;  %v1290_v9 = vadd.f32 %v1288_v46, %v1284_v59  ;;  %v5233_v46 = vld [vmem:[%s6582_s20 + $0x52] ss:$8 sm:$0x3]  ;;  %s6902_s9 = sld [smem:[#allocation78_spill]] }
 0x4bd   : > { %v1317_v28 = vsel %vm6832_vm10, %v6831_v22, %v4664_v25  ;;  %v1359_v54 = vsel %vm6834_vm4, %v4834_v43, %v6833_v34  ;;  %vm6836_vm1 = vmmov %vm6834_vm4  ;;  %v1324_v61 = vmul.f32 %v6837_v4, %v1319_v10  ;;  %v6838_v25 = vstv %s4627_s8  ;;  %v5208_v34 = vld [vmem:[%s6582_s20 + $0x51] ss:$8 sm:$0x3]  ;;  %s5376_s8 = sld [smem:[#allocation2 + $0x5d]] }
 0x4be   : > { %v5173_v27 = vpop.permute.xlu0 %1658  ;;  %v5175_v38 = vpop.permute.xlu1 %1553  ;;  %v1357_v33 = vsel %vm6836_vm1, %v6835_v7, %v4701_v41  ;;  %v1329_v22 = vmul.f32 %v6838_v25, %v1316_v48  ;;  %v6839_v59 = vmov %v6838_v25  ;;  %v1291_v48 = vadd.f32 %v1289_v16, %v4150_v36  ;;  %v6842_v36 = vld [vmem:[#allocation27_spill] sm:$0xff]  ;;  %v6845_v50 = vld [vmem:[#allocation26_spill] sm:$0xff]  ;;  %s5540_s27 = sld [smem:[#allocation2 + $0x61]] }
 0x4bf   : > { %v1328_v4 = vmul.f32 %v6839_v59, %v1317_v28  ;;  %v1356_v7 = vsel %vm6836_vm1, %v4701_v41, %v4834_v43  ;;  %v6840_v10 = vstv %s6584_s7  ;;  %v6841_v28 = vstv %s4639_s23  ;;  %s5334_s7 = sld [smem:[#allocation2 + $0x5c]] }
 0x4c0   : > { %v1364_v25 = vmul.f32 %v6840_v10, %v1359_v54  ;;  %v1368_v59 = vmul.f32 %v6841_v28, %v1357_v33  ;;  %vm6843_vm10 = vcmp.lt.s32.totalorder %v3811_v23, 15  ;;  %v6844_v43 = vrot.slane %v4706_v55, %v3801_v42  ;;  %s6891_s23 = sld [smem:[#allocation75_spill]] }
 0x4c1   : > { %v1397_v16 = vsel %vm6843_vm10, %v6842_v36, %v4765_v18  ;;  %v1330_v10 = vadd.f32 %v1328_v4, %v1324_v61  ;;  %v1331_v3 = vadd.f32 %v1329_v22, %v4159_v24  ;;  %vm6846_vm4 = vmmov %vm6843_vm10  ;;  %v1369_v36 = vmul.f32 %v6841_v28, %v1356_v7  ;;  %v6849_v22 = vld [vmem:[#allocation28_spill] sm:$0xff]  ;;  %s6923_s26 = sld [smem:[#allocation92_spill]] }
 0x4c2   : > { %v5226_v62 = vpop.permute.xlu0 %1698  ;;  %v5228_v5 = vpop.permute.xlu1 %1593  ;;  %v1303_v54 = vmul.f32 %v6844_v43, %v1290_v9  ;;  %v1399_v33 = vsel %vm6846_vm4, %v4911_v52, %v6845_v50  ;;  %v6847_v9 = vrot.slane %v4706_v55, %v3804_v31  ;;  %v1370_v24 = vadd.f32 %v1368_v59, %v1364_v25  ;;  %vm6848_vm1 = vmmov %vm6846_vm4 }
 0x4c3   : > { %v1396_v50 = vsel %vm6848_vm1, %v4765_v18, %v4911_v52  ;;  %vm6850_vm10 = vcmp.lt.s32.totalorder %v3811_v23, 14  ;;  %v6851_v55 = vstv %s4661_s19  ;;  %v6854_v59 = vstv %s6585_s30  ;;  %s6885_s30 = sld [smem:[#allocation88_spill]] }
 0x4c4   : > { %v1304_v61 = vmul.f32 %v6847_v9, %v1291_v48  ;;  %v1439_v4 = vsel %vm6850_vm10, %v4989_v30, %v6849_v22  ;;  %v1408_v28 = vmul.f32 %v6851_v55, %v1397_v16  ;;  %v6852_v48 = vld [vmem:[#allocation29_spill] sm:$0xff]  ;;  %vm6853_vm4 = vmmov %vm6850_vm10  ;;  %v1404_v9 = vmul.f32 %v6854_v59, %v1399_v33  ;;  %v6858_v33 = vld [vmem:[#allocation130_spill] sm:$0xff]  ;;  %s5397_s19 = sld [smem:[#allocation2 + $0x5e]] }
 0x4c5   : > { %v1437_v25 = vsel %vm6853_vm4, %v6852_v48, %v4832_v8  ;;  %v1305_v52 = vadd.f32 %v1303_v54, %v4761_v57  ;;  %v6855_v22 = vrot.slane %v4718_v35, %v3801_v42  ;;  %v6856_v16 = vrot.slane %v4718_v35, %v3804_v31  ;;  %vm6857_vm1 = vmmov %vm6853_vm4  ;;  %v6861_v54 = vld [vmem:[#allocation30_spill] sm:$0xff] }
 0x4c6   : > { %v5270_v7 = vpop.permute.xlu0 %1738  ;;  %v5272_v43 = vpop.permute.xlu1 %1660  ;;  %v1436_v48 = vsel %vm6857_vm1, %v4832_v8, %v4989_v30  ;;  %v1371_v59 = vadd.f32 %v1369_v36, %v6858_v33  ;;  %v1409_v18 = vmul.f32 %v6859_v37, %v1396_v50  ;;  %v1444_v57 = vmul.f32 %v6860_v20, %v1439_v4  ;;  %v6865_v36 = vld [vmem:[#allocation31_spill] sm:$0xff] }
 0x4c7   : > { %v1343_v41 = vmul.f32 %v6855_v22, %v1330_v10  ;;  %v1344_v55 = vmul.f32 %v6856_v16, %v1331_v3  ;;  %vm6862_vm10 = vcmp.lt.s32.totalorder %v3811_v23, 13  ;;  %v1306_v35 = vadd.f32 %v1304_v61, %v4763_v47 }
 0x4c8   : > { %v1479_v10 = vsel %vm6862_vm10, %v5058_v60, %v6861_v54  ;;  %v6863_v3 = vstv %s4675_s11  ;;  %v6864_v30 = vrot.slane %v4749_v14, %v3801_v42  ;;  %vm6866_vm4 = vmmov %vm6862_vm10  ;;  %v1410_v4 = vadd.f32 %v1408_v28, %v1404_v9  ;;  %s6912_s11 = sld [smem:[#allocation91_spill]] }
 0x4c9   : > { %v1448_v22 = vmul.f32 %v6863_v3, %v1437_v25  ;;  %v1477_v37 = vsel %vm6866_vm4, %v6865_v36, %v4909_v15  ;;  %v6867_v47 = vmov %v6863_v3  ;;  %vm6868_vm1 = vmmov %vm6866_vm4  ;;  %v1345_v33 = vadd.f32 %v1343_v41, %v1305_v52  ;;  %v6870_v3 = vld [vmem:[#allocation33_spill] sm:$0xff] }
 0x4ca   : > { %v1383_v8 = vmul.f32 %v6864_v30, %v1370_v24  ;;  %v5314_v20 = vpop.permute.xlu0 %1778  ;;  %v5316_v50 = vpop.permute.xlu1 %1700  ;;  %v1449_v61 = vmul.f32 %v6867_v47, %v1436_v48  ;;  %v1476_v25 = vsel %vm6868_vm1, %v4909_v15, %v5058_v60  ;;  %v6869_v24 = vld [vmem:[#allocation32_spill] sm:$0xff]  ;;  %v1346_v54 = vadd.f32 %v1344_v55, %v1306_v35  ;;  %v6875_v47 = vld [vmem:[#allocation131_spill] sm:$0xff] }
 0x4cb   : > { %v1519_v16 = vsel %vm1515_vm0, %v5117_v56, %v6869_v24  ;;  %v1517_v28 = vsel %vm1515_vm0, %v6870_v3, %v4987_v44  ;;  %v6872_v9 = vstv %s6530_s22  ;;  %v6873_v15 = vrot.slane %v4749_v14, %v3804_v31  ;;  %s6879_s22 = sld [smem:[#allocation85_spill]] }
 0x4cc   : > { %v1484_v48 = vmul.f32 %v6872_v9, %v1479_v10  ;;  %v6874_v30 = vstv %s4682_s12  ;;  %v1411_v24 = vadd.f32 %v1409_v18, %v6875_v47  ;;  %v1450_v41 = vadd.f32 %v1448_v22, %v1444_v57  ;;  %v6878_v9 = vld [vmem:[#allocation34_spill] sm:$0xff]  ;;  %s6919_s12 = sld [smem:[#allocation80_spill]] }
 0x4cd   : > { %v1384_v60 = vmul.f32 %v6873_v15, %v1371_v59  ;;  %v1488_v36 = vmul.f32 %v6874_v30, %v1477_v37  ;;  %v6876_v52 = vmov %v6874_v30  ;;  %v1516_v35 = vsel %vm1515_vm0, %v4987_v44, %v5117_v56  ;;  %v6882_v44 = vld [vmem:[#allocation132_spill] sm:$0xff] }
 0x4ce   : > { %v1489_v55 = vmul.f32 %v6876_v52, %v1476_v25  ;;  %v6877_v3 = vstv %s3769_s14  ;;  %v1559_v14 = vsel %vm1555_vm6, %v5175_v38, %v6878_v9  ;;  %v5354_v59 = vpop.permute.xlu0 %1818  ;;  %v5356_v18 = vpop.permute.xlu1 %1740  ;;  %v1385_v57 = vadd.f32 %v1383_v8, %v1345_v33  ;;  %s6884_s14 = sld [smem:[#allocation67_spill]]  ;;  %v6890_v9 = vld [vmem:[#allocation133_spill] sm:$0xff] }
 0x4cf   : > { %v1524_v10 = vmul.f32 %v6877_v3, %v1519_v16  ;;  %v6880_v22 = vrot.slane %v4774_v51, %v3801_v42  ;;  %v6881_v25 = vstv %s6871_s4  ;;  %v1451_v15 = vadd.f32 %v1449_v61, %v6882_v44  ;;  %v6883_v16 = vld [vmem:[#allocation35_spill] sm:$0xff]  ;;  %s5468_s4 = sld [smem:[#allocation2 + $0x60]] }
 0x4d0   : > { %v1528_v56 = vmul.f32 %v6881_v25, %v1517_v28  ;;  %v1557_v30 = vsel %vm1555_vm6, %v6883_v16, %v5056_v11  ;;  %v1490_v47 = vadd.f32 %v1488_v36, %v1484_v48  ;;  %v1556_v8 = vsel %vm1555_vm6, %v5056_v11, %v5175_v38 }
 0x4d1   : > { %v1423_v37 = vmul.f32 %v6880_v22, %v1410_v4  ;;  %v1599_v4 = vsel %vm1595_vm7, %v5228_v5, %v6619_v6  ;;  %v1386_v61 = vadd.f32 %v1384_v60, %v1346_v54  ;;  %v6886_v33 = vrot.slane %v4774_v51, %v3804_v31 }
 0x4d2   : > { %v6887_v48 = vmov %v6881_v25  ;;  %v6888_v52 = vstv %s6879_s22  ;;  %v6889_v38 = vrot.slane %v4787_v19, %v3801_v42  ;;  %v1491_v22 = vadd.f32 %v1489_v55, %v6890_v9  ;;  %v5393_v51 = vpop.permute.xlu0 %1858  ;;  %v5395_v60 = vpop.permute.xlu1 %1780  ;;  %s6907_s22 = sld [smem:[#allocation90_spill]] }
 0x4d3   : > { %v1424_v28 = vmul.f32 %v6886_v33, %v1411_v24  ;;  %v1529_v36 = vmul.f32 %v6887_v48, %v1516_v35  ;;  %v1564_v3 = vmul.f32 %v6888_v52, %v1559_v14  ;;  %v1597_v6 = vsel %vm1595_vm7, %v6618_v26, %v5115_v0 }
 0x4d4   : > { %v1463_v11 = vmul.f32 %v6889_v38, %v1450_v41  ;;  %v1530_v54 = vadd.f32 %v1528_v56, %v1524_v10  ;;  %v6892_v24 = vstv %s6884_s14  ;;  %v1596_v41 = vsel %vm1595_vm7, %v5115_v0, %v5228_v5  ;;  %s6953_s14 = sld [smem:[#allocation96_spill]] }
 0x4d5   : > { %v1568_v35 = vmul.f32 %v6892_v24, %v1557_v30  ;;  %v6893_v14 = vmov %v6892_v24  ;;  %v6894_v55 = vstv %s6885_s30  ;;  %v1425_v44 = vadd.f32 %v1423_v37, %v1385_v57  ;;  %v5418_v30 = vld [vmem:[%s6582_s20 + $0x53] ss:$8 sm:$0x3]  ;;  %s6960_s30 = sld [smem:[#allocation97_spill]] }
 0x4d6   : > { %v1569_v25 = vmul.f32 %v6893_v14, %v1556_v8  ;;  %v1604_v26 = vmul.f32 %v6894_v55, %v1599_v4  ;;  %v6895_v10 = vrot.slane %v4787_v19, %v3804_v31  ;;  %v6896_v16 = vrot.slane %v4822_v53, %v3801_v42  ;;  %v5434_v24 = vpop.permute.xlu0 %1898 }
 0x4d7   : > { %v2394_v8 = vstv %s5334_s7  ;;  %v1426_v0 = vadd.f32 %v1424_v28, %v1386_v61  ;;  %v6897_v5 = vstv %s6891_s23  ;;  %v1531_v57 = vadd.f32 %v1529_v36, %v4264_v17  ;;  %v5436_v61 = vpop.permute.xlu1 %1820  ;;  %v5441_v17 = vld [vmem:[%s6582_s20 + $0x54] ss:$8 sm:$0x3]  ;;  %s6908_s23 = sld [smem:[#allocation79_spill]] }
 0x4d8   : > { %v1464_v56 = vmul.f32 %v6895_v10, %v1451_v15  ;;  %v1503_v33 = vmul.f32 %v6896_v16, %v1490_v47  ;;  %v1608_v4 = vmul.f32 %v6897_v5, %v1597_v6  ;;  %v1570_v19 = vadd.f32 %v1568_v35, %v1564_v3  ;;  %s7131_s7 = sld [smem:[#allocation122_spill]] }
 0x4d9   : > { %v1465_v37 = vadd.f32 %v1463_v11, %v1425_v44  ;;  %v6898_v15 = vrot.slane %v4822_v53, %v3804_v31  ;;  %v6899_v48 = vrot.slane %v4842_v63, %v3801_v42  ;;  %v6900_v38 = vmov %v6897_v5 }
 0x4da   : > { %v1609_v9 = vmul.f32 %v6900_v38, %v1596_v41  ;;  %v1571_v28 = vadd.f32 %v1569_v25, %v4322_v40  ;;  %v1610_v36 = vadd.f32 %v1608_v4, %v1604_v26  ;;  %v2403_v53 = vrot.slane %v5418_v30, %v3801_v42  ;;  %v5466_v26 = vld [vmem:[%s6582_s20 + $0x55] ss:$8 sm:$0x3] }
 0x4db   : > { %v1504_v47 = vmul.f32 %v6898_v15, %v1491_v22  ;;  %v1543_v52 = vmul.f32 %v6899_v48, %v1530_v54  ;;  %v2407_v3 = vrot.slane %v5418_v30, %v3804_v31  ;;  %v1466_v11 = vadd.f32 %v1464_v56, %v1426_v0  ;;  %v5471_v56 = vpop.permute.xlu0 %1938  ;;  %v5473_v16 = vpop.permute.xlu1 %1860  ;;  %v5491_v15 = vld [vmem:[%s6582_s20 + $0x56] ss:$8 sm:$0x3] }
 0x4dc   : > { %v1505_v22 = vadd.f32 %v1503_v33, %v1465_v37  ;;  %v1663_v6 = vsel %vm1662_vm12, %v5173_v27, %v5272_v43  ;;  %v2434_v54 = vstv %s5376_s8  ;;  %v6901_v35 = vrot.slane %v4842_v63, %v3804_v31  ;;  %s7137_s8 = sld [smem:[#allocation123_spill]] }
 0x4dd   : > { %v6903_v14 = vrot.slane %v4860_v21, %v3801_v42  ;;  %v2443_v41 = vrot.slane %v5441_v17, %v3801_v42  ;;  %v2447_v55 = vrot.slane %v5441_v17, %v3804_v31  ;;  %v1506_v63 = vadd.f32 %v1504_v47, %v1466_v11 }
 0x4de   : > { %v1544_v40 = vmul.f32 %v6901_v35, %v1531_v57  ;;  %v1545_v44 = vadd.f32 %v1543_v52, %v1505_v22  ;;  %v1611_v10 = vadd.f32 %v1609_v9, %v4358_v58  ;;  %v2474_v33 = vstv %s5397_s19  ;;  %s7140_s19 = sld [smem:[#allocation126_spill]] }
 0x4df   : > { %v1583_v25 = vmul.f32 %v6903_v14, %v1570_v19  ;;  %v6904_v0 = vrot.slane %v4860_v21, %v3804_v31  ;;  %v6905_v4 = vrot.slane %v4876_v12, %v3801_v42  ;;  %v1666_v19 = vsel %vm1662_vm12, %v5272_v43, %v6632_v39  ;;  %v5519_v22 = vpop.permute.xlu0 %1978 }
 0x4e0   : > { %v6906_v58 = vstv %s6902_s9  ;;  %v1664_v21 = vsel %vm1662_vm12, %v6631_v13, %v5173_v27  ;;  %v2483_v47 = vrot.slane %v5466_v26, %v3801_v42  ;;  %v2487_v48 = vrot.slane %v5466_v26, %v3804_v31  ;;  %s6924_s9 = sld [smem:[#allocation81_spill]] }
 0x4e1   : > { %v1584_v5 = vmul.f32 %v6904_v0, %v1571_v28  ;;  %v1623_v57 = vmul.f32 %v6905_v4, %v1610_v36  ;;  %v1675_v37 = vmul.f32 %v6906_v58, %v1663_v6  ;;  %v2514_v39 = vstv %s5421_s1  ;;  %s7153_s1 = sld [smem:[#allocation6_spill]] }
 0x4e2   : > { %v1546_v43 = vadd.f32 %v1544_v40, %v1506_v63  ;;  %v1585_v52 = vadd.f32 %v1583_v25, %v1545_v44  ;;  %vm6909_vm6 = vcmp.lt.s32.totalorder %v3811_v23, 126  ;;  %v6913_v9 = vrot.slane %v4876_v12, %v3804_v31  ;;  %v5526_v25 = vpop.permute.xlu1 %1900 }
 0x4e3   : > { %v1703_v38 = vsel %vm6909_vm6, %v5226_v62, %v5316_v50  ;;  %vm6910_vm0 = vmmov %vm6909_vm6  ;;  %v6914_v36 = vmov %v6906_v58  ;;  %v2523_v6 = vrot.slane %v5491_v15, %v3801_v42  ;;  %v6915_v35 = vstv %s6907_s22  ;;  %s6928_s22 = sld [smem:[#allocation95_spill]] }
 0x4e4   : > { %v1706_v13 = vsel %vm6910_vm0, %v5316_v50, %v6640_v2  ;;  %vm6911_vm7 = vmmov %vm6910_vm0  ;;  %v1624_v28 = vmul.f32 %v6913_v9, %v1611_v10  ;;  %v1676_v11 = vmul.f32 %v6914_v36, %v1666_v19  ;;  %v1672_v2 = vmul.f32 %v6915_v35, %v1664_v21 }
 0x4e5   : > { %v1704_v27 = vsel %vm6911_vm7, %v6639_v1, %v5226_v62  ;;  %v1586_v50 = vadd.f32 %v1584_v5, %v1546_v43  ;;  %v1625_v40 = vadd.f32 %v1623_v57, %v1585_v52  ;;  %v1677_v14 = vadd.f32 %v1675_v37, %v4397_v32  ;;  %v6927_v37 = vld [vmem:[#allocation109_spill] sm:$0xff]  ;;  %v6929_v43 = vld [vmem:[#allocation45_spill] sm:$0xff] }
 0x4e6   : > { %v6916_v1 = vstv %s6908_s23  ;;  %vm6918_vm12 = vcmp.lt.s32.totalorder %v3811_v23, 125  ;;  %v6921_v32 = vstv %s6912_s11  ;;  %v2527_v4 = vrot.slane %v5491_v15, %v3804_v31  ;;  %s7088_s11 = sld [smem:[#allocation115_spill]] }
 0x4e7   : > { %v1715_v62 = vmul.f32 %v6916_v1, %v1703_v38  ;;  %v6917_v12 = vmov %v6916_v1  ;;  %v1743_v44 = vsel %vm6918_vm12, %v5270_v7, %v5356_v18  ;;  %vm6920_vm10 = vmmov %vm6918_vm12  ;;  %v1712_v0 = vmul.f32 %v6921_v32, %v1704_v27 }
 0x4e8   : > { %v1716_v63 = vmul.f32 %v6917_v12, %v1706_v13  ;;  %v1746_v10 = vsel %vm6920_vm10, %v5356_v18, %v6655_v29  ;;  %vm6922_vm4 = vmmov %vm6920_vm10  ;;  %v2554_v57 = vstv %s5468_s4  ;;  %v1626_v19 = vadd.f32 %v1624_v28, %v1586_v50  ;;  %s2750_s4 = sshll.u32 %s7153_s1, 1 }
 0x4e9   : > { %v1744_v5 = vsel %vm6922_vm4, %v6654_v45, %v5270_v7  ;;  %v1678_v58 = vadd.f32 %v1676_v11, %v1672_v2  ;;  %vm6925_vm1 = vcmp.lt.s32.totalorder %v3811_v23, 115  ;;  %v5559_v45 = vpop.permute.xlu0 %2018  ;;  %v5564_v7 = vld [vmem:[%s6582_s20 + $0x57] ss:$8 sm:$0x3]  ;;  %v1652_v21 = vadd.f32 %v6927_v37, %v1625_v40 }
 0x4ea   : > { %v1783_v29 = vsel %vm6925_vm1, %v5314_v20, %v5395_v60  ;;  %vm6926_vm6 = vmmov %vm6925_vm1  ;;  %v6931_v38 = vstv %s6919_s12  ;;  %v6935_v11 = vld [vmem:[#allocation37_spill] sm:$0xff]  ;;  %v1718_v2 = vadd.f32 %v1716_v63, %v1712_v0  ;;  %vm6936_vm7 = vcmp.lt.s32.totalorder %v3811_v23, 114 }
 0x4eb   : > { %v1786_v18 = vsel %vm6926_vm6, %v5395_v60, %v6663_v49  ;;  %vm6930_vm0 = vmmov %vm6925_vm1  ;;  %v1755_v13 = vmul.f32 %v6931_v38, %v1743_v44  ;;  %v6932_v27 = vmov %v6931_v38  ;;  %v1941_v49 = vpop.permute.xlu1 %1940  ;;  %v6933_v60 = vld [vmem:[#allocation11_spill] sm:$0xff]  ;;  %v1717_v35 = vadd.f32 %v1715_v62, %v6935_v11 }
 0x4ec   : > { %v1784_v52 = vsel %vm6930_vm0, %v6929_v43, %v5314_v20  ;;  %v1756_v9 = vmul.f32 %v6932_v27, %v1746_v10  ;;  %v6934_v28 = vrot.slane %v6933_v60, %v3801_v42  ;;  %v1823_v50 = vsel %vm6936_vm7, %v5354_v59, %v5436_v61  ;;  %vm6945_vm12 = vmmov %vm6936_vm7 }
 0x4ed   : > { %v6937_v40 = vstv %s6923_s26  ;;  %v6938_v1 = vstv %s6924_s9  ;;  %v2563_v32 = vrot.slane %v5564_v7, %v3801_v42  ;;  %v6941_v62 = vrot.slane %v6933_v60, %v3804_v31  ;;  %v5597_v38 = vpop.permute.xlu0 %2058  ;;  %vm6951_vm10 = vmmov %vm6936_vm7  ;;  %s7158_s26 = sld [smem:[#allocation155_spill]] }
 0x4ee   : > { %v1690_v36 = vmul.f32 %v6934_v28, %v1677_v14  ;;  %v1752_v20 = vmul.f32 %v6937_v40, %v1744_v5  ;;  %v1795_v12 = vmul.f32 %v6938_v1, %v1783_v29  ;;  %v6939_v44 = vmov %v6938_v1  ;;  %v6940_v14 = vld [vmem:[#allocation108_spill] sm:$0xff]  ;;  %v6943_v29 = vld [vmem:[#allocation36_spill] sm:$0xff]  ;;  %v6944_v28 = vld [vmem:[#allocation46_spill] sm:$0xff] }
 0x4ef   : > { %v1796_v10 = vmul.f32 %v6939_v44, %v1786_v18  ;;  %v1653_v37 = vadd.f32 %v6940_v14, %v1626_v19  ;;  %v1691_v63 = vmul.f32 %v6941_v62, %v1678_v58  ;;  %v6942_v0 = vstv %s6928_s22  ;;  %v1981_v60 = vpop.permute.xlu1 %1980  ;;  %v6947_v1 = vld [vmem:[#allocation13_spill] sm:$0xff] }
 0x4f0   : > { %v1792_v43 = vmul.f32 %v6942_v0, %v1784_v52  ;;  %v2567_v5 = vrot.slane %v5564_v7, %v3804_v31  ;;  %v1757_v27 = vadd.f32 %v1755_v13, %v6943_v29  ;;  %v1758_v18 = vadd.f32 %v1756_v9, %v1752_v20  ;;  %v6950_v13 = vld [vmem:[#allocation47_spill] sm:$0xff]  ;;  %v6972_v0 = vld [vmem:[#allocation50_spill] sm:$0xff] }
 0x4f1   : > { %v1826_v19 = vsel %vm6945_vm12, %v5436_v61, %v6944_v28  ;;  %v6946_v11 = vstv %s4878_s29  ;;  %v1692_v58 = vadd.f32 %v1690_v36, %v1652_v21  ;;  %v6948_v52 = vrot.slane %v6947_v1, %v3801_v42  ;;  %v6952_v20 = vld [vmem:[#allocation7_spill] sm:$0xff]  ;;  %s6977_s29 = sld [smem:[#allocation98_spill]] }
 0x4f2   : > { %v1835_v40 = vmul.f32 %v6946_v11, %v1823_v50  ;;  %v6949_v14 = vrot.slane %v6947_v1, %v3804_v31  ;;  %v1824_v9 = vsel %vm6951_vm10, %v6950_v13, %v5354_v59  ;;  %v1797_v61 = vadd.f32 %v1795_v12, %v6952_v20  ;;  %v6958_v59 = vld [vmem:[#allocation48_spill] sm:$0xff] }
 0x4f3   : > { %v1730_v44 = vmul.f32 %v6948_v52, %v1717_v35  ;;  %v1798_v50 = vadd.f32 %v1796_v10, %v1792_v43  ;;  %vm6954_vm4 = vcmp.lt.s32.totalorder %v3811_v23, 113  ;;  %v1693_v36 = vadd.f32 %v1691_v63, %v1653_v37  ;;  %v6955_v35 = vld [vmem:[#allocation49_spill] sm:$0xff]  ;;  %v5634_v10 = vpop.permute.xlu0 %2098  ;;  %v6961_v43 = vld [vmem:[#allocation15_spill] sm:$0xff]  ;;  %s330_s9 = scalar_lea.vmem %s7158_s26, %s2750_s4 }
 0x4f4   : > { %v1731_v62 = vmul.f32 %v6949_v14, %v1718_v2  ;;  %v1863_v21 = vsel %vm6954_vm4, %v5393_v51, %v5473_v16  ;;  %vm6956_vm1 = vmmov %vm6954_vm4  ;;  %v6957_v29 = vmov %v6946_v11  ;;  %v6962_v11 = vrot.slane %v6961_v43, %v3801_v42  ;;  %v2021_v14 = vpop.permute.xlu1 %2020 }
 0x4f5   : > { %v1864_v2 = vsel %vm6956_vm1, %v6955_v35, %v5393_v51  ;;  %v1836_v28 = vmul.f32 %v6957_v29, %v1826_v19  ;;  %vm6959_vm6 = vmmov %vm6956_vm1  ;;  %v6963_v63 = vrot.slane %v6961_v43, %v3804_v31  ;;  %v6964_v51 = vld [vmem:[#allocation39_spill] sm:$0xff]  ;;  %vm6965_vm0 = vcmp.lt.s32.totalorder %v3811_v23, 112 }
 0x4f6   : > { %v1866_v12 = vsel %vm6959_vm6, %v5473_v16, %v6958_v59  ;;  %v1770_v37 = vmul.f32 %v6962_v11, %v1757_v27  ;;  %v1837_v52 = vadd.f32 %v1835_v40, %v6964_v51  ;;  %v1903_v19 = vsel %vm6965_vm0, %v5434_v24, %v5526_v25  ;;  %v6968_v27 = vld [vmem:[#allocation129_spill] sm:$0xff]  ;;  %vm6973_vm7 = vmmov %vm6965_vm0 }
 0x4f7   : > { %v1771_v1 = vmul.f32 %v6963_v63, %v1758_v18  ;;  %v1732_v16 = vadd.f32 %v1730_v44, %v1692_v58  ;;  %v1733_v13 = vadd.f32 %v1731_v62, %v1693_v36  ;;  %v6966_v20 = vstv %s6953_s14  ;;  %vm6976_vm12 = vmmov %vm6965_vm0 }
 0x4f8   : > { %v1832_v35 = vmul.f32 %v6966_v20, %v1824_v9  ;;  %v6967_v29 = vstv %s4899_s10  ;;  %v6969_v11 = vrot.slane %v6968_v27, %v3801_v42  ;;  %v6970_v18 = vrot.slane %v6968_v27, %v3804_v31  ;;  %v6975_v9 = vld [vmem:[#allocation51_spill] sm:$0xff]  ;;  %s6983_s10 = sld [smem:[#allocation101_spill]] }
 0x4f9   : > { %v1875_v59 = vmul.f32 %v6967_v29, %v1863_v21  ;;  %v6971_v63 = vmov %v6967_v29  ;;  %v1906_v58 = vsel %vm6973_vm7, %v5526_v25, %v6972_v0  ;;  %v6974_v44 = vstv %s6960_s30  ;;  %v5671_v29 = vpop.permute.xlu0 %2138  ;;  %v6979_v27 = vld [vmem:[#allocation19_spill] sm:$0xff]  ;;  %v6981_v25 = vld [vmem:[#allocation53_spill] sm:$0xff] }
 0x4fa   : > { %v1810_v43 = vmul.f32 %v6969_v11, %v1797_v61  ;;  %v1811_v40 = vmul.f32 %v6970_v18, %v1798_v50  ;;  %v1876_v51 = vmul.f32 %v6971_v63, %v1866_v12  ;;  %v1872_v62 = vmul.f32 %v6974_v44, %v1864_v2  ;;  %v2061_v2 = vpop.permute.xlu1 %2060  ;;  %v6984_v63 = vld [vmem:[#allocation38_spill] sm:$0xff] }
 0x4fb   : > { %v1904_v21 = vsel %vm6976_vm12, %v6975_v9, %v5434_v24  ;;  %v1838_v61 = vadd.f32 %v1836_v28, %v1832_v35  ;;  %v6978_v36 = vstv %s4922_s6  ;;  %v1772_v50 = vadd.f32 %v1770_v37, %v1732_v16  ;;  %s6996_s6 = sld [smem:[#allocation102_spill]] }
 0x4fc   : > { %v1915_v20 = vmul.f32 %v6978_v36, %v1903_v19  ;;  %v1773_v12 = vadd.f32 %v1771_v1, %v1733_v13  ;;  %v6980_v11 = vrot.slane %v6979_v27, %v3801_v42  ;;  %vm6982_vm10 = vcmp.lt.s32.totalorder %v3811_v23, 111  ;;  %v6987_v1 = vld [vmem:[#allocation52_spill] sm:$0xff] }
 0x4fd   : > { %v1944_v0 = vsel %vm6982_vm10, %v6981_v25, %v5471_v56  ;;  %v1877_v24 = vadd.f32 %v1875_v59, %v6984_v63  ;;  %v6985_v28 = vmov %v6978_v36  ;;  %vm6986_vm4 = vmmov %vm6982_vm10  ;;  %v1812_v16 = vadd.f32 %v1810_v43, %v1772_v50  ;;  %v6993_v25 = vld [vmem:[#allocation54_spill] sm:$0xff]  ;;  %v5701_v43 = vpop.permute.xlu0 %2178 }
 0x4fe   : > { %v1850_v18 = vmul.f32 %v6980_v11, %v1837_v52  ;;  %v1916_v19 = vmul.f32 %v6985_v28, %v1906_v58  ;;  %v1943_v37 = vsel %vm6986_vm4, %v5471_v56, %v1941_v49  ;;  %vm6988_vm1 = vmmov %vm6986_vm4  ;;  %v1813_v13 = vadd.f32 %v1811_v40, %v1773_v12  ;;  %v6991_v11 = vld [vmem:[#allocation41_spill] sm:$0xff]  ;;  %v7001_v28 = vld [vmem:[#allocation134_spill] sm:$0xff] }
 0x4ff   : > { %v1946_v52 = vsel %vm6988_vm1, %v1941_v49, %v6987_v1  ;;  %v6989_v35 = vstv %s6977_s29  ;;  %v1878_v9 = vadd.f32 %v1876_v51, %v1872_v62  ;;  %v6990_v36 = vrot.slane %v6979_v27, %v3804_v31  ;;  %v6997_v62 = vld [vmem:[#allocation55_spill] sm:$0xff]  ;;  %v2101_v27 = vpop.permute.xlu1 %2100 }
 0x500   : > { %v1912_v44 = vmul.f32 %v6989_v35, %v1904_v21  ;;  %v1917_v58 = vadd.f32 %v1915_v20, %v6991_v11  ;;  %vm6992_vm6 = vcmp.lt.s32.totalorder %v3811_v23, 110  ;;  %v6995_v40 = vstv %s6983_s10 }
 0x501   : > { %v1851_v59 = vmul.f32 %v6990_v36, %v1838_v61  ;;  %v1983_v56 = vsel %vm6992_vm6, %v5519_v22, %v1981_v60  ;;  %vm6994_vm0 = vmmov %vm6992_vm6  ;;  %v1952_v51 = vmul.f32 %v6995_v40, %v1944_v0  ;;  %v6999_v61 = vstv %s4942_s13 }
 0x502   : > { %v1986_v49 = vsel %vm6994_vm0, %v1981_v60, %v6993_v25  ;;  %vm6998_vm7 = vmmov %vm6994_vm0  ;;  %v1955_v20 = vmul.f32 %v6999_v61, %v1943_v37  ;;  %v7000_v50 = vmov %v6999_v61  ;;  %v1852_v63 = vadd.f32 %v1850_v18, %v1812_v16  ;;  %v7007_v18 = vld [vmem:[#allocation56_spill] sm:$0xff] }
 0x503   : > { %v1984_v21 = vsel %vm6998_vm7, %v6997_v62, %v5519_v22  ;;  %v1956_v12 = vmul.f32 %v7000_v50, %v1946_v52  ;;  %v7002_v1 = vrot.slane %v7001_v28, %v3801_v42  ;;  %v1918_v35 = vadd.f32 %v1916_v19, %v1912_v44  ;;  %v7010_v62 = vld [vmem:[#allocation136_spill] sm:$0xff]  ;;  %v5743_v50 = vpop.permute.xlu0 %2218 }
 0x504   : > { %vm7003_vm12 = vcmp.lt.s32.totalorder %v3811_v23, 109  ;;  %v7004_v36 = vrot.slane %v7001_v28, %v3804_v31  ;;  %v7005_v11 = vstv %s4954_s17  ;;  %v1853_v19 = vadd.f32 %v1851_v59, %v1813_v13  ;;  %s7014_s17 = sld [smem:[#allocation103_spill]] }
 0x505   : > { %v1890_v60 = vmul.f32 %v7002_v1, %v1877_v24  ;;  %v2023_v0 = vsel %vm7003_vm12, %v5559_v45, %v2021_v14  ;;  %v1995_v37 = vmul.f32 %v7005_v11, %v1983_v56  ;;  %v7006_v25 = vmov %v7005_v11  ;;  %vm7008_vm10 = vmmov %vm7003_vm12  ;;  %v5732_v24 = vld [vmem:[%s6582_s20 + $0x60] ss:$8 sm:$0x3]  ;;  %v7012_v56 = vld [vmem:[#allocation57_spill] sm:$0xff]  ;;  %s7023_s20 = sld [smem:[#allocation104_spill]] }
 0x506   : > { %v1891_v22 = vmul.f32 %v7004_v36, %v1878_v9  ;;  %v1996_v52 = vmul.f32 %v7006_v25, %v1986_v49  ;;  %v2026_v16 = vsel %vm7008_vm10, %v2021_v14, %v7007_v18  ;;  %v7009_v44 = vstv %s6996_s6  ;;  %vm7013_vm4 = vmmov %vm7008_vm10  ;;  %v7015_v14 = vld [vmem:[#allocation40_spill] sm:$0xff] }
 0x507   : > { %v1992_v40 = vmul.f32 %v7009_v44, %v1984_v21  ;;  %v7011_v9 = vrot.slane %v7010_v62, %v3801_v42  ;;  %v2024_v49 = vsel %vm7013_vm4, %v7012_v56, %v5559_v45  ;;  %v1957_v28 = vadd.f32 %v1955_v20, %v7015_v14  ;;  %v2141_v21 = vpop.permute.xlu1 %2140 }
 0x508   : > { %v1958_v1 = vadd.f32 %v1956_v12, %v1952_v51  ;;  %v7016_v36 = vstv %s4977_s18  ;;  %vm7017_vm1 = vcmp.lt.s32.totalorder %v3811_v23, 99  ;;  %v7018_v11 = vrot.slane %v7010_v62, %v3804_v31  ;;  %s7051_s18 = sld [smem:[#allocation110_spill]] }
 0x509   : > { %v1930_v61 = vmul.f32 %v7011_v9, %v1917_v58  ;;  %v2035_v13 = vmul.f32 %v7016_v36, %v2023_v0  ;;  %v2063_v59 = vsel %vm7017_vm1, %v5597_v38, %v2061_v2  ;;  %v1892_v58 = vadd.f32 %v1890_v60, %v1852_v63  ;;  %v7020_v9 = vld [vmem:[#allocation8_spill] sm:$0xff]  ;;  %v7021_v0 = vld [vmem:[#allocation58_spill] sm:$0xff]  ;;  %vm7022_vm6 = vmmov %vm7017_vm1 }
 0x50a   : > { %v1931_v25 = vmul.f32 %v7018_v11, %v1918_v35  ;;  %v7019_v45 = vmov %v7016_v36  ;;  %v2603_v44 = vrot.slane %v5732_v24, %v3801_v42  ;;  %v1893_v20 = vadd.f32 %v1891_v22, %v1853_v19  ;;  %v7025_v35 = vld [vmem:[#allocation59_spill] sm:$0xff]  ;;  %vm7026_vm0 = vmmov %vm7017_vm1  ;;  %v5770_v22 = vpop.permute.xlu0 %2258  ;;  %v7028_v19 = vld [vmem:[#allocation137_spill] sm:$0xff] }
 0x50b   : > { %v2036_v18 = vmul.f32 %v7019_v45, %v2026_v16  ;;  %v1997_v51 = vadd.f32 %v1995_v37, %v7020_v9  ;;  %v1998_v12 = vadd.f32 %v1996_v52, %v1992_v40  ;;  %v2066_v56 = vsel %vm7022_vm6, %v2061_v2, %v7021_v0  ;;  %v7034_v0 = vld [vmem:[#allocation60_spill] sm:$0xff] }
 0x50c   : > { %v1932_v63 = vadd.f32 %v1930_v61, %v1892_v58  ;;  %v7024_v60 = vstv %s7014_s17  ;;  %v2064_v16 = vsel %vm7026_vm0, %v7025_v35, %v5597_v38  ;;  %v7027_v62 = vstv %s4999_s16  ;;  %v7031_v61 = vld [vmem:[#allocation43_spill] sm:$0xff]  ;;  %v2181_v38 = vpop.permute.xlu1 %2180  ;;  %s7044_s16 = sld [smem:[#allocation107_spill]] }
 0x50d   : > { %v2032_v14 = vmul.f32 %v7024_v60, %v2024_v49  ;;  %v2075_v36 = vmul.f32 %v7027_v62, %v2063_v59  ;;  %v7029_v37 = vrot.slane %v7028_v19, %v3801_v42  ;;  %v7030_v2 = vrot.slane %v7028_v19, %v3804_v31 }
 0x50e   : > { %v2037_v49 = vadd.f32 %v2035_v13, %v7031_v61  ;;  %vm7032_vm7 = vcmp.lt.s32.totalorder %v3811_v23, 98  ;;  %v1933_v11 = vadd.f32 %v1931_v25, %v1893_v20  ;;  %v7033_v45 = vmov %v7027_v62  ;;  %v7037_v62 = vld [vmem:[#allocation140_spill] sm:$0xff]  ;;  %v7043_v20 = vld [vmem:[#allocation42_spill] sm:$0xff] }
 0x50f   : > { %v1970_v52 = vmul.f32 %v7029_v37, %v1957_v28  ;;  %v1971_v40 = vmul.f32 %v7030_v2, %v1958_v1  ;;  %v2103_v58 = vsel %vm7032_vm7, %v5634_v10, %v2101_v27  ;;  %v2038_v59 = vadd.f32 %v2036_v18, %v2032_v14  ;;  %vm7035_vm12 = vmmov %vm7032_vm7  ;;  %v7041_v18 = vld [vmem:[#allocation61_spill] sm:$0xff] }
 0x510   : > { %v2076_v9 = vmul.f32 %v7033_v45, %v2066_v56  ;;  %v2106_v28 = vsel %vm7035_vm12, %v2101_v27, %v7034_v0  ;;  %v7036_v60 = vstv %s7023_s20  ;;  %v7038_v1 = vrot.slane %v7037_v62, %v3801_v42  ;;  %vm7042_vm4 = vmmov %vm7032_vm7  ;;  %v7048_v0 = vld [vmem:[#allocation142_spill] sm:$0xff] }
 0x511   : > { %v2072_v35 = vmul.f32 %v7036_v60, %v2064_v16  ;;  %v7039_v19 = vrot.slane %v7037_v62, %v3804_v31  ;;  %vm7040_vm10 = vcmp.lt.s32.totalorder %v3811_v23, 97  ;;  %v2104_v27 = vsel %vm7042_vm4, %v7041_v18, %v5634_v10  ;;  %v7046_v16 = vld [vmem:[#allocation65_spill] sm:$0xff]  ;;  %v2221_v10 = vpop.permute.xlu1 %2220 }
 0x512   : > { %v2010_v13 = vmul.f32 %v7038_v1, %v1997_v51  ;;  %v2143_v25 = vsel %vm7040_vm10, %v5671_v29, %v2141_v21  ;;  %v2077_v56 = vadd.f32 %v2075_v36, %v7043_v20  ;;  %v7045_v14 = vstv %s5019_s24  ;;  %vm7047_vm1 = vmmov %vm7040_vm10  ;;  %s7062_s24 = sld [smem:[#allocation111_spill]] }
 0x513   : > { %v2011_v37 = vmul.f32 %v7039_v19, %v1998_v12  ;;  %v2115_v51 = vmul.f32 %v7045_v14, %v2103_v58  ;;  %v2146_v2 = vsel %vm7047_vm1, %v2141_v21, %v7046_v16  ;;  %v2299_v12 = vpop.permute.xlu0 %2298  ;;  %v1972_v61 = vadd.f32 %v1970_v52, %v1932_v63  ;;  %v7053_v58 = vld [vmem:[#allocation66_spill] sm:$0xff]  ;;  %vm7054_vm6 = vmmov %vm7047_vm1 }
 0x514   : > { %v1973_v45 = vadd.f32 %v1971_v40, %v1933_v11  ;;  %v7049_v60 = vrot.slane %v7048_v0, %v3801_v42  ;;  %v7050_v1 = vmov %v7045_v14  ;;  %v7052_v36 = vrot.slane %v7048_v0, %v3804_v31 }
 0x515   : > { %v2116_v19 = vmul.f32 %v7050_v1, %v2106_v28  ;;  %v2144_v21 = vsel %vm7054_vm6, %v7053_v58, %v5671_v29  ;;  %v2078_v20 = vadd.f32 %v2076_v9, %v2072_v35  ;;  %v7055_v63 = vstv %s5030_s5  ;;  %v7061_v9 = vld [vmem:[#allocation71_spill] sm:$0xff]  ;;  %s7074_s5 = sld [smem:[#allocation112_spill]] }
 0x516   : > { %v2050_v62 = vmul.f32 %v7049_v60, %v2037_v49  ;;  %v2051_v18 = vmul.f32 %v7052_v36, %v2038_v59  ;;  %v2155_v52 = vmul.f32 %v7055_v63, %v2143_v25  ;;  %v2012_v40 = vadd.f32 %v2010_v13, %v1972_v61  ;;  %v7058_v60 = vld [vmem:[#allocation144_spill] sm:$0xff]  ;;  %v7060_v59 = vld [vmem:[#allocation10_spill] sm:$0xff] }
 0x517   : > { %v2013_v11 = vadd.f32 %v2011_v37, %v1973_v45  ;;  %v7056_v14 = vstv %s7044_s16  ;;  %v7057_v16 = vmov %v7055_v63  ;;  %v7059_v1 = vrot.slane %v7058_v60, %v3801_v42  ;;  %v2339_v13 = vpop.permute.xlu0 %2338 }
 0x518   : > { %v2112_v49 = vmul.f32 %v7056_v14, %v2104_v27  ;;  %v2156_v28 = vmul.f32 %v7057_v16, %v2146_v2  ;;  %v2117_v36 = vadd.f32 %v2115_v51, %v7060_v59  ;;  %v2183_v29 = vsel %vm2182_vm2, %v5701_v43, %v2181_v38  ;;  %v7064_v2 = vld [vmem:[#allocation72_spill] sm:$0xff]  ;;  %v2261_v51 = vpop.permute.xlu1 %2260 }
 0x519   : > { %v2090_v0 = vmul.f32 %v7059_v1, %v2077_v56  ;;  %v2186_v35 = vsel %vm2182_vm2, %v2181_v38, %v7061_v9  ;;  %v2052_v37 = vadd.f32 %v2050_v62, %v2012_v40  ;;  %v7063_v25 = vstv %s7051_s18  ;;  %v7066_v14 = vld [vmem:[#allocation9_spill] sm:$0xff]  ;;  %v7073_v9 = vld [vmem:[#allocation77_spill] sm:$0xff] }
 0x51a   : > { %v2152_v27 = vmul.f32 %v7063_v25, %v2144_v21  ;;  %v2184_v56 = vsel %vm2182_vm2, %v7064_v2, %v5701_v43  ;;  %v2118_v61 = vadd.f32 %v2116_v19, %v2112_v49  ;;  %v2053_v45 = vadd.f32 %v2051_v18, %v2013_v11  ;;  %v7069_v19 = vld [vmem:[#allocation76_spill] sm:$0xff] }
 0x51b   : > { %v7065_v58 = vrot.slane %v7058_v60, %v3804_v31  ;;  %v2157_v38 = vadd.f32 %v2155_v52, %v7066_v14  ;;  %v2223_v62 = vsel %vm2222_vm9, %v5743_v50, %v2221_v10  ;;  %v7067_v40 = vstv %s5050_s28  ;;  %s7078_s28 = sld [smem:[#allocation84_spill]] }
 0x51c   : > { %v2158_v21 = vadd.f32 %v2156_v28, %v2152_v27  ;;  %v2195_v16 = vmul.f32 %v7067_v40, %v2183_v29  ;;  %v7068_v1 = vmov %v7067_v40  ;;  %v2226_v18 = vsel %vm2222_vm9, %v2221_v10, %v7069_v19  ;;  %v2379_v29 = vpop.permute.xlu0 %2378 }
 0x51d   : > { %v2091_v63 = vmul.f32 %v7065_v58, %v2078_v20  ;;  %v2196_v43 = vmul.f32 %v7068_v1, %v2186_v35  ;;  %v2092_v11 = vadd.f32 %v2090_v0, %v2052_v37  ;;  %v7070_v49 = vstv %s7062_s24  ;;  %v7071_v20 = vld [vmem:[#allocation145_spill] sm:$0xff] }
 0x51e   : > { %v2192_v60 = vmul.f32 %v7070_v49, %v2184_v56  ;;  %v7072_v52 = vrot.slane %v7071_v20, %v3801_v42  ;;  %v2224_v28 = vsel %vm2222_vm9, %v7073_v9, %v5743_v50  ;;  %v7075_v35 = vrot.slane %v7071_v20, %v3804_v31  ;;  %v2301_v50 = vpop.permute.xlu1 %2300  ;;  %v7079_v56 = vld [vmem:[#allocation20_spill] sm:$0xff] }
 0x51f   : > { %v7076_v10 = vstv %s5085_s25  ;;  %v2263_v37 = vsel %vm2262_vm15, %v5770_v22, %v2261_v51  ;;  %v2093_v2 = vadd.f32 %v2091_v63, %v2053_v45  ;;  %v7080_v58 = vrot.slane %v7079_v56, %v3801_v42  ;;  %v7084_v20 = vld [vmem:[#allocation44_spill] sm:$0xff]  ;;  %s7100_s25 = sld [smem:[#allocation116_spill]] }
 0x520   : > { %v2130_v59 = vmul.f32 %v7072_v52, %v2117_v36  ;;  %v2131_v25 = vmul.f32 %v7075_v35, %v2118_v61  ;;  %v2235_v0 = vmul.f32 %v7076_v10, %v2223_v62  ;;  %v7077_v36 = vld [vmem:[#allocation82_spill] sm:$0xff]  ;;  %v7081_v61 = vld [vmem:[#allocation83_spill] sm:$0xff]  ;;  %v7082_v40 = vmov %v7076_v10 }
 0x521   : > { %v2266_v27 = vsel %vm2262_vm15, %v2261_v51, %v7077_v36  ;;  %v2170_v14 = vmul.f32 %v7080_v58, %v2157_v38  ;;  %v2264_v62 = vsel %vm2262_vm15, %v7081_v61, %v5770_v22  ;;  %v2236_v1 = vmul.f32 %v7082_v40, %v2226_v18  ;;  %v2419_v18 = vpop.permute.xlu0 %2418 }
 0x522   : > { %v7083_v19 = vrot.slane %v7079_v56, %v3804_v31  ;;  %v2197_v51 = vadd.f32 %v2195_v16, %v7084_v20  ;;  %v2198_v52 = vadd.f32 %v2196_v43, %v2192_v60  ;;  %v2303_v45 = vsel %vm2302_vm8, %v2299_v12, %v2301_v50  ;;  %v7091_v43 = vld [vmem:[#allocation12_spill] sm:$0xff]  ;;  %v2341_v40 = vpop.permute.xlu1 %2340 }
 0x523   : > { %v2132_v63 = vadd.f32 %v2130_v59, %v2092_v11  ;;  %v7085_v38 = vstv %s7074_s5  ;;  %v7086_v35 = vstv %s5113_s2  ;;  %v2133_v58 = vadd.f32 %v2131_v25, %v2093_v2  ;;  %v7092_v59 = vld [vmem:[#allocation86_spill] sm:$0xff]  ;;  %s7110_s2 = sld [smem:[#allocation117_spill]] }
 0x524   : > { %v2171_v49 = vmul.f32 %v7083_v19, %v2158_v21  ;;  %v2232_v9 = vmul.f32 %v7085_v38, %v2224_v28  ;;  %v2275_v10 = vmul.f32 %v7086_v35, %v2263_v37  ;;  %v7087_v36 = vmov %v7086_v35  ;;  %v7090_v21 = vld [vmem:[#allocation87_spill] sm:$0xff]  ;;  %v7094_v19 = vld [vmem:[#allocation21_spill] sm:$0xff]  ;;  %v7098_v35 = vld [vmem:[#allocation14_spill] sm:$0xff] }
 0x525   : > { %v2276_v22 = vmul.f32 %v7087_v36, %v2266_v27  ;;  %v7089_v61 = vstv %s7078_s28  ;;  %v2304_v16 = vsel %vm2302_vm8, %v7090_v21, %v2299_v12  ;;  %v2237_v60 = vadd.f32 %v2235_v0, %v7091_v43  ;;  %v7099_v36 = vld [vmem:[#allocation93_spill] sm:$0xff] }
 0x526   : > { %v2272_v56 = vmul.f32 %v7089_v61, %v2264_v62  ;;  %v2238_v11 = vadd.f32 %v2236_v1, %v2232_v9  ;;  %v2306_v28 = vsel %vm2302_vm8, %v2301_v50, %v7092_v59  ;;  %v7093_v37 = vstv %s5142_s15  ;;  %v7103_v61 = vld [vmem:[#allocation94_spill] sm:$0xff]  ;;  %v2381_v59 = vpop.permute.xlu1 %2380  ;;  %s7120_s15 = sld [smem:[#allocation120_spill]] }
 0x527   : > { %v2315_v27 = vmul.f32 %v7093_v37, %v2303_v45  ;;  %v2343_v25 = vsel %vm2342_vm3, %v2339_v13, %v2341_v40  ;;  %v2172_v2 = vadd.f32 %v2170_v14, %v2132_v63  ;;  %v2173_v62 = vadd.f32 %v2171_v49, %v2133_v58  ;;  %v2459_v49 = vpop.permute.xlu0 %2458  ;;  %v7101_v63 = vld [vmem:[#allocation146_spill] sm:$0xff] }
 0x528   : > { %v7095_v12 = vrot.slane %v7094_v19, %v3801_v42  ;;  %v7096_v0 = vrot.slane %v7094_v19, %v3804_v31  ;;  %v7097_v38 = vstv %s7088_s11  ;;  %v2277_v50 = vadd.f32 %v2275_v10, %v7098_v35 }
 0x529   : > { %v2312_v9 = vmul.f32 %v7097_v38, %v2304_v16  ;;  %v2278_v45 = vadd.f32 %v2276_v22, %v2272_v56  ;;  %v2346_v14 = vsel %vm2342_vm3, %v2341_v40, %v7099_v36  ;;  %v7104_v21 = vmov %v7093_v37  ;;  %v7107_v37 = vld [vmem:[#allocation16_spill] sm:$0xff] }
 0x52a   : > { %v2210_v20 = vmul.f32 %v7095_v12, %v2197_v51  ;;  %v2211_v1 = vmul.f32 %v7096_v0, %v2198_v52  ;;  %v7102_v51 = vrot.slane %v7101_v63, %v3801_v42  ;;  %v2344_v52 = vsel %vm2342_vm3, %v7103_v61, %v2339_v13 }
 0x52b   : > { %v2316_v16 = vmul.f32 %v7104_v21, %v2306_v28  ;;  %v7105_v43 = vstv %s5167_s0  ;;  %v7106_v22 = vrot.slane %v7101_v63, %v3804_v31  ;;  %v2317_v40 = vadd.f32 %v2315_v27, %v7107_v37  ;;  %v7115_v21 = vld [vmem:[#allocation100_spill] sm:$0xff]  ;;  %s7123_s0 = sld [smem:[#allocation121_spill]] }
 0x52c   : > { %v2250_v58 = vmul.f32 %v7102_v51, %v2237_v60  ;;  %v2355_v10 = vmul.f32 %v7105_v43, %v2343_v25  ;;  %v2383_v19 = vsel %vm2382_vm13, %v2379_v29, %v2381_v59  ;;  %v7108_v60 = vld [vmem:[#allocation99_spill] sm:$0xff]  ;;  %v2212_v13 = vadd.f32 %v2210_v20, %v2172_v2 }
 0x52d   : > { %v2251_v56 = vmul.f32 %v7106_v22, %v2238_v11  ;;  %v2386_v12 = vsel %vm2382_vm13, %v2381_v59, %v7108_v60  ;;  %v2213_v0 = vadd.f32 %v2211_v1, %v2173_v62  ;;  %v7109_v28 = vmov %v7105_v43  ;;  %v7112_v11 = vld [vmem:[#allocation22_spill] sm:$0xff]  ;;  %v2499_v62 = vpop.permute.xlu0 %2498  ;;  %v2421_v59 = vpop.permute.xlu1 %2420 }
 0x52e   : > { %v2356_v38 = vmul.f32 %v7109_v28, %v2346_v14  ;;  %v2395_v25 = vmul.f32 %v2394_v8, %v2383_v19  ;;  %v7111_v35 = vstv %s7100_s25  ;;  %v7113_v63 = vrot.slane %v7112_v11, %v3801_v42  ;;  %v7116_v14 = vld [vmem:[#allocation17_spill] sm:$0xff] }
 0x52f   : > { %v2352_v36 = vmul.f32 %v7111_v35, %v2344_v52  ;;  %v7114_v51 = vrot.slane %v7112_v11, %v3804_v31  ;;  %v2384_v2 = vsel %vm2382_vm13, %v7115_v21, %v2379_v29  ;;  %v2252_v20 = vadd.f32 %v2250_v58, %v2212_v13  ;;  %v7118_v19 = vld [vmem:[#allocation105_spill] sm:$0xff] }
 0x530   : > { %v2290_v27 = vmul.f32 %v7113_v63, %v2277_v50  ;;  %v2318_v1 = vadd.f32 %v2316_v16, %v2312_v9  ;;  %v2357_v43 = vadd.f32 %v2355_v10, %v7116_v14  ;;  %v2396_v52 = vmul.f32 %v2394_v8, %v2386_v12  ;;  %v7121_v16 = vld [vmem:[#allocation106_spill] sm:$0xff] }
 0x531   : > { %v2291_v61 = vmul.f32 %v7114_v51, %v2278_v45  ;;  %v2253_v22 = vadd.f32 %v2251_v56, %v2213_v0  ;;  %v7117_v50 = vrot.slane %v5208_v34, %v3801_v42  ;;  %v2423_v45 = vsel %vm2422_vm11, %v2419_v18, %v2421_v59  ;;  %v7122_v56 = vld [vmem:[#allocation18_spill] sm:$0xff]  ;;  %v2539_v28 = vpop.permute.xlu0 %2538 }
 0x532   : > { %v2426_v29 = vsel %vm2422_vm11, %v2421_v59, %v7118_v19  ;;  %v7119_v58 = vstv %s7110_s2  ;;  %v2424_v8 = vsel %vm2422_vm11, %v7121_v16, %v2419_v18  ;;  %v2358_v10 = vadd.f32 %v2356_v38, %v2352_v36  ;;  %v7126_v36 = vld [vmem:[#allocation114_spill] sm:$0xff] }
 0x533   : > { %v2330_v37 = vmul.f32 %v7117_v50, %v2317_v40  ;;  %v2392_v9 = vmul.f32 %v7119_v58, %v2384_v2  ;;  %v2397_v60 = vadd.f32 %v2395_v25, %v7122_v56  ;;  %v2292_v12 = vadd.f32 %v2290_v27, %v2252_v20  ;;  %v2461_v27 = vpop.permute.xlu1 %2460  ;;  %v7128_v2 = vld [vmem:[#allocation113_spill] sm:$0xff]  ;;  %v7134_v58 = vld [vmem:[#allocation138_spill] sm:$0xff]  ;;  %v7135_v56 = vld [vmem:[#allocation118_spill] sm:$0xff] }
 0x534   : > { %v2293_v40 = vadd.f32 %v2291_v61, %v2253_v22  ;;  %v2435_v13 = vmul.f32 %v2434_v54, %v2423_v45  ;;  %v2436_v0 = vmul.f32 %v2434_v54, %v2426_v29  ;;  %v7124_v35 = vrot.slane %v5208_v34, %v3804_v31 }
 0x535   : > { %v7125_v18 = vrot.slane %v5233_v46, %v3801_v42  ;;  %v2464_v25 = vsel %vm2462_vm5, %v7126_v36, %v2459_v49  ;;  %v2398_v63 = vadd.f32 %v2396_v52, %v2392_v9  ;;  %v2332_v51 = vadd.f32 %v2330_v37, %v2292_v12  ;;  %v7133_v37 = vld [vmem:[#allocation135_spill] sm:$0xff] }
 0x536   : > { %v2331_v11 = vmul.f32 %v7124_v35, %v2318_v1  ;;  %v7127_v61 = vstv %s7120_s15  ;;  %v2463_v54 = vsel %vm2462_vm5, %v2459_v49, %v2461_v27  ;;  %v2466_v34 = vsel %vm2462_vm5, %v2461_v27, %v7128_v2  ;;  %v7132_v49 = vld [vmem:[#allocation119_spill] sm:$0xff]  ;;  %v7138_v35 = vld [vmem:[#allocation125_spill] sm:$0xff] }
 0x537   : > { %v2370_v38 = vmul.f32 %v7125_v18, %v2357_v43  ;;  %v2432_v21 = vmul.f32 %v7127_v61, %v2424_v8  ;;  %v7129_v20 = vrot.slane %v5233_v46, %v3804_v31  ;;  %v2410_v14 = vmul.f32 %v2403_v53, %v2397_v60  ;;  %v2501_v9 = vpop.permute.xlu1 %2500  ;;  %v2579_v8 = vpop.permute.xlu0 %2578  ;;  %v7145_v61 = vld [vmem:[#allocation124_spill] sm:$0xff] }
 0x538   : > { %v2475_v43 = vmul.f32 %v2474_v33, %v2463_v54  ;;  %v2476_v52 = vmul.f32 %v2474_v33, %v2466_v34  ;;  %v7130_v59 = vstv %s7123_s0  ;;  %v2504_v50 = vsel %vm2502_vm14, %v7132_v49, %v2499_v62 }
 0x539   : > { %v2371_v1 = vmul.f32 %v7129_v20, %v2358_v10  ;;  %v2472_v22 = vmul.f32 %v7130_v59, %v2464_v25  ;;  %v2437_v45 = vadd.f32 %v2435_v13, %v7133_v37  ;;  %v2438_v46 = vadd.f32 %v2436_v0, %v2432_v21  ;;  %v7141_v25 = vld [vmem:[#allocation128_spill] sm:$0xff] }
 0x53a   : > { %v2333_v19 = vadd.f32 %v2331_v11, %v2293_v40  ;;  %v2372_v29 = vadd.f32 %v2370_v38, %v2332_v51  ;;  %v2411_v53 = vmul.f32 %v2407_v3, %v2398_v63  ;;  %v2477_v33 = vadd.f32 %v2475_v43, %v7134_v58  ;;  %v7143_v63 = vld [vmem:[#allocation139_spill] sm:$0xff] }
 0x53b   : > { %v2478_v16 = vadd.f32 %v2476_v52, %v2472_v22  ;;  %v2503_v10 = vsel %vm2502_vm14, %v2499_v62, %v2501_v9  ;;  %v2506_v60 = vsel %vm2502_vm14, %v2501_v9, %v7135_v56  ;;  %v7136_v13 = vstv %s7131_s7  ;;  %v2541_v17 = vpop.permute.xlu1 %2540 }
 0x53c   : > { %v2373_v12 = vadd.f32 %v2371_v1, %v2333_v19  ;;  %v2412_v40 = vadd.f32 %v2410_v14, %v2372_v29  ;;  %v2512_v0 = vmul.f32 %v7136_v13, %v2504_v50  ;;  %v2515_v30 = vmul.f32 %v2514_v39, %v2503_v10  ;;  %v7151_v19 = vld [vmem:[#allocation127_spill] sm:$0xff] }
 0x53d   : > { %v2450_v3 = vmul.f32 %v2443_v41, %v2437_v45  ;;  %v2451_v62 = vmul.f32 %v2447_v55, %v2438_v46  ;;  %vm7139_vm14 = vcmp.lt.s32.totalorder %v3811_v23, 78  ;;  %v2516_v18 = vmul.f32 %v2514_v39, %v2506_v60  ;;  %v7156_v10 = vld [vmem:[#allocation143_spill] sm:$0xff] }
 0x53e   : > { %v2544_v11 = vsel %vm7139_vm14, %v7138_v35, %v2539_v28  ;;  %v2413_v38 = vadd.f32 %v2411_v53, %v2373_v12  ;;  %v2490_v36 = vmul.f32 %v2483_v47, %v2477_v33  ;;  %vm7142_vm8 = vcmp.lt.s32.totalorder %v3811_v23, 77  ;;  %vm7144_vm9 = vmmov %vm7139_vm14 }
 0x53f   : > { %v2584_v41 = vsel %vm7142_vm8, %v7141_v25, %v2579_v8  ;;  %v2517_v27 = vadd.f32 %v2515_v30, %v7143_v63  ;;  %v2491_v55 = vmul.f32 %v2487_v48, %v2478_v16  ;;  %v2518_v51 = vadd.f32 %v2516_v18, %v2512_v0  ;;  %vm7146_vm5 = vmmov %vm7144_vm9  ;;  %v2581_v50 = vpop.permute.xlu1 %2580 }
 0x540   : > { %v2543_v39 = vsel %vm7144_vm9, %v2539_v28, %v2541_v17  ;;  %v2546_v21 = vsel %vm7146_vm5, %v2541_v17, %v7145_v61  ;;  %v7147_v47 = vstv %s7137_s8  ;;  %v2607_v20 = vrot.slane %v5732_v24, %v3804_v31  ;;  %vm7150_vm15 = vmmov %vm7142_vm8  ;;  %v7157_v31 = vld [vmem:[#allocation89_spill] sm:$0xff] }
 0x541   : > { %v2552_v54 = vmul.f32 %v7147_v47, %v2544_v11  ;;  %v2555_v2 = vmul.f32 %v2554_v57, %v2543_v39  ;;  %v2556_v34 = vmul.f32 %v2554_v57, %v2546_v21  ;;  %v2452_v1 = vadd.f32 %v2450_v3, %v2412_v40  ;;  %v7149_v57 = vld [vmem:[#allocation141_spill] sm:$0xff]  ;;  %vm7152_vm11 = vmmov %vm7142_vm8 }
 0x542   : > { %v2453_v26 = vadd.f32 %v2451_v62, %v2413_v38  ;;  %v7148_v48 = vstv %s7140_s19  ;;  %v3107_v28 = vmov 1966171168   ;;  %v2530_v52 = vmul.f32 %v2523_v6, %v2517_v27 }
 0x543   : > { %v2592_v14 = vmul.f32 %v7148_v48, %v2584_v41  ;;  %v2622_v43 = vunpack.c.l.s4 %v3107_v28  ;;  %v2531_v59 = vmul.f32 %v2527_v4, %v2518_v51  ;;  %v2557_v22 = vadd.f32 %v2555_v2, %v7149_v57 }
 0x544   : > { %v2558_v49 = vadd.f32 %v2556_v34, %v2552_v54  ;;  %v2492_v37 = vadd.f32 %v2490_v36, %v2452_v1  ;;  %v2493_v45 = vadd.f32 %v2491_v55, %v2453_v26  ;;  %v2583_v46 = vsel %vm7150_vm15, %v2579_v8, %v2581_v50 }
 0x545   : > { %v2586_v29 = vsel %vm7152_vm11, %v2581_v50, %v7151_v19  ;;  %v2570_v6 = vmul.f32 %v2563_v32, %v2557_v22  ;;  %v7154_v4 = vstv %s5540_s27  ;;  %v2623_v9 = vunpack.c.0.s8 %v2622_v43 }
 0x546   : > { %v2571_v15 = vmul.f32 %v2567_v5, %v2558_v49  ;;  %v2595_v53 = vmul.f32 %v7154_v4, %v2583_v46  ;;  %v7155_v58 = vmov %v7154_v4  ;;  %v2532_v16 = vadd.f32 %v2530_v52, %v2492_v37 }
 0x547   : > { %v2596_v33 = vmul.f32 %v7155_v58, %v2586_v29  ;;  %v2533_v8 = vadd.f32 %v2531_v59, %v2493_v45  ;;  %v2626_v7 = vsub.s32 %v2623_v9, %v7157_v31  ;;  %v7159_v3 = vlaneseq }
 0x548   : > { %v2597_v56 = vadd.f32 %v2595_v53, %v7156_v10  ;;  %v2572_v60 = vadd.f32 %v2570_v6, %v2532_v16 }
 0x549   : > { %v2598_v23 = vadd.f32 %v2596_v33, %v2592_v14  ;;  %v2573_v12 = vadd.f32 %v2571_v15, %v2533_v8  ;;  %vm2638_vm13 = vcmp.lt.s32.totalorder %v7159_v3, 256 }
 0x54a   : > { %v2610_v32 = vmul.f32 %v2603_v44, %v2597_v56 }
 0x54b   : > { %v2611_v40 = vmul.f32 %v2607_v20, %v2598_v23 }
 0x54c   : > { %v2612_v5 = vadd.f32 %v2610_v32, %v2572_v60 }
 0x54d   : > { %v2613_v13 = vadd.f32 %v2611_v40, %v2573_v12 }
 0x54f   : > { %v2620_v0 = vcombine.low %v2612_v5, %v2613_v13 }
 0x551   : > { %v2627_v30 = vrot.slane %v2620_v0, %v2626_v7 }
 0x553   : > { %v2634_v62 = vrot.slane %v2627_v30, %v2626_v7 }
 0x555   : > { %2640 = vst.msk [vmem:[%s330_s9] sm:$0x3] %vm2638_vm13, %v2634_v62 }
 0x556 PF: > { %s7160_s21 = sld [smem:[#allocation5_spill]] }
 0x55c   : > { %s20_s27 = sadd.s32 1, %s7160_s21  }
 0x55d   : > { %p17_p1 = scmp.ge.s32.totalorder %s20_s27, 4  }
 0x55f   :  { %19 = sbr.rel (!%p17_p1) target bundleno = 11 (0xb), region = 143 }
 0x564   :  { %2676 = vsyncpa [#allocation3], 1 }
 0x565   :  { %2678 = vsyncpa [#allocation3 + $0x1], 1 }

</bundles_post_ra>
